<compile_context>
chip_gen: v5e
topology: v5e:2x2
jax: 0.10.0
libtpu: 0.0.40
codegen_flags: <defaults>
</compile_context>

<pallas_src>
import functools

import jax
import jax.numpy as jnp
from jax.experimental import pallas as pl
from jax.experimental.pallas import tpu as pltpu


_GRAY_R, _GRAY_G, _GRAY_B = 0.2989, 0.587, 0.114


def _fmod1(x):
    # floor-mod by 1.0 (matches torch's `% 1.0` on the hue channel)
    return x - jnp.floor(x)


def _gray(r, g, b):
    # torchvision rgb_to_grayscale weights
    return _GRAY_R * r + _GRAY_G * g + _GRAY_B * b


def _hue_channels(r, g, b, hf):
    """torchvision adjust_hue: RGB -> HSV, shift hue, HSV -> RGB."""
    maxc = jnp.maximum(jnp.maximum(r, g), b)
    minc = jnp.minimum(jnp.minimum(r, g), b)
    eqc = maxc == minc
    cr = maxc - minc
    ones = jnp.ones_like(maxc)

    # EUP approx reciprocals (own VLIW slot) instead of serialized f32 divides.
    inv_max = pl.reciprocal(jnp.where(eqc, ones, maxc), approx=True)
    inv_crd = pl.reciprocal(jnp.where(eqc, ones, cr), approx=True)

    # Single clip on s guards approx-reciprocal overshoot; p/q/t then stay in
    # [0, 1] without their own clips (3 fewer VALU ops per pixel).
    s = jnp.minimum(cr * inv_max, 1.0)
    rc_ = (maxc - r) * inv_crd
    gc_ = (maxc - g) * inv_crd
    bc_ = (maxc - b) * inv_crd

    max_is_r = maxc == r
    hr = jnp.where(max_is_r, bc_ - gc_, 0.0)
    hg = jnp.where((maxc == g) & ~max_is_r, 2.0 + rc_ - bc_, 0.0)
    hb = jnp.where((maxc != g) & ~max_is_r, 4.0 + gc_ - rc_, 0.0)
    h = _fmod1((hr + hg + hb) * (1.0 / 6.0) + 1.0)
    h = _fmod1(h + hf)  # hue shift

    v = maxc
    h6 = h * 6.0
    i6 = jnp.floor(h6)
    fr = h6 - i6
    i6 = jnp.where(i6 >= 6.0, i6 - 6.0, i6)  # i6 in {0,...,5}

    p = v * (1.0 - s)
    q = v * (1.0 - s * fr)
    t = v * (1.0 - s * (1.0 - fr))

    # hoisted bucket masks, reused across all three channels
    m = [i6 == float(k) for k in range(6)]

    def sel(vals):
        out = vals[5]
        for k in range(4, -1, -1):
            out = jnp.where(m[k], vals[k], out)
        return out

    return sel((v, q, p, p, t, v)), sel((t, v, v, q, p, p)), sel((p, p, t, v, v, q))


def _color_jitter_kernel(fparams_ref, iparams_ref, x_ref, o_ref, *, inv_hw):
    # fparams_ref: SMEM float32 (4*N,): [brightness, contrast, saturation, hue]
    # iparams_ref: SMEM int32   (5*N,): [apply, op0, op1, op2, op3]
    # x_ref/o_ref: VMEM (btile, 3*rows_c, 128) channel-folded image slabs.
    btile, rows, _ = x_ref.shape
    rows_c = rows // 3                       # sublane rows per channel
    base = pl.program_id(0) * btile
    dt = o_ref.dtype

    def load_ch(src, j, c):
        return src[j, pl.ds(c * rows_c, rows_c), :].astype(jnp.float32)

    def store_ch(j, c, val):
        o_ref[j, pl.ds(c * rows_c, rows_c), :] = val.astype(dt)

    # fori-style loop over images in the block: bounds live ranges, keeps the
    # generated code size independent of btile (so blocks can grow to MiBs).
    @pl.loop(0, btile)
    def _per_image(j):
        i = base + j
        apply_i = iparams_ref[i * 5 + 0]

        # Non-applied samples (prob. epsilon): one VMEM copy, nothing else.
        @pl.when(apply_i == 0)
        def _identity():
            o_ref[j] = x_ref[j]

        @pl.when(apply_i != 0)
        def _jitter():
            bf = fparams_ref[i * 4 + 0]
            cf = fparams_ref[i * 4 + 1]
            sf = fparams_ref[i * 4 + 2]
            hf = fparams_ref[i * 4 + 3]

            # 4 steps; exactly one scalar-predicated op body runs per step.
            # Step 0 reads straight from x_ref (no priming x->o copy for
            # applied samples), steps 1..3 read the running result in o_ref.
            for step in range(4):
                op = iparams_ref[i * 5 + 1 + step]
                src = x_ref if step == 0 else o_ref

                @pl.when(op == 0)
                def _brightness(src=src):
                    img = src[j].astype(jnp.float32)
                    o_ref[j] = jnp.clip(img * bf, 0.0, 1.0).astype(dt)

                @pl.when(op == 1)
                def _contrast(src=src):
                    r = load_ch(src, j, 0)
                    g = load_ch(src, j, 1)
                    b = load_ch(src, j, 2)
                    # sum * 1/(H*W): lane-padding rows stay zero for every op
                    # order, so the whole-image gray mean is unbiased.
                    mean = jnp.sum(_gray(r, g, b)) * inv_hw
                    # hoist the single broadcast of (1-cf)*mean (shared by all
                    # three channels; JAX does not CSE broadcast_in_dim).
                    add_b = jnp.broadcast_to((1.0 - cf) * mean, r.shape)
                    store_ch(j, 0, jnp.clip(cf * r + add_b, 0.0, 1.0))
                    store_ch(j, 1, jnp.clip(cf * g + add_b, 0.0, 1.0))
                    store_ch(j, 2, jnp.clip(cf * b + add_b, 0.0, 1.0))

                @pl.when(op == 2)
                def _saturation(src=src):
                    r = load_ch(src, j, 0)
                    g = load_ch(src, j, 1)
                    b = load_ch(src, j, 2)
                    gr = (1.0 - sf) * _gray(r, g, b)   # hoisted, shared plane
                    store_ch(j, 0, jnp.clip(sf * r + gr, 0.0, 1.0))
                    store_ch(j, 1, jnp.clip(sf * g + gr, 0.0, 1.0))
                    store_ch(j, 2, jnp.clip(sf * b + gr, 0.0, 1.0))

                @pl.when(op == 3)
                def _hue(src=src):
                    r = load_ch(src, j, 0)
                    g = load_ch(src, j, 1)
                    b = load_ch(src, j, 2)
                    ro, go, bo = _hue_channels(r, g, b, hf)
                    store_ch(j, 0, ro)
                    store_ch(j, 1, go)
                    store_ch(j, 2, bo)


def _detect_num_tensorcores():
    """Heuristic: chips whose Pallas device exposes 2 TensorCores."""
    try:
        kind = str(getattr(jax.devices()[0], "device_kind", "")).lower()
        if any(tag in kind for tag in ("v4", "v5p", "v7")):
            return 2
    except Exception:
        pass
    return 1


_NUM_TC = _detect_num_tensorcores()


def _pick_btile(n, bytes_per_img, num_tc):
    """Images per grid step: ~2-4 MiB of payload per block (HBM roofline),
    an even grid split across TensorCores on multi-TC chips, and >=2 grid
    steps for DMA/compute overlap only when the batch is big enough."""
    target_bytes = 4 << 20
    bt = max(1, min(n, target_bytes // max(1, bytes_per_img)))
    if num_tc > 1 and n >= num_tc:
        bt = min(bt, n // num_tc)                      # grid length multiple of TCs
    elif n >= 2 and bt * bytes_per_img > (2 << 20):
        bt = min(bt, max(1, n // 2))                   # single TC: just keep 2+ steps
    while bt > 1 and (n % bt != 0 or (num_tc > 1 and (n // bt) % num_tc != 0)):
        bt -= 1
    return max(bt, 1)


@functools.partial(jax.jit, static_argnames=("training", "epsilon",
                                             "brightness", "contrast",
                                             "saturation", "hue"))
def batchwise_img_color_jitter_aug(x, key, *, training=True, epsilon=0.1,
                                   brightness=0.3, contrast=0.3,
                                   saturation=0.3, hue=0.3):
    """Forward pass of BatchWiseImgColorJitterAug.

    x: (N, 3, H, W) float32 in [0, 1].  Per batch element, with probability
    (1 - epsilon) apply ColorJitter(brightness, contrast, saturation, hue)
    with freshly sampled factors and a random op order; otherwise identity.
    """
    N, C, H, W = x.shape
    assert C == 3, "color jitter requires 3-channel RGB input"
    HW = H * W

    # TODO(synk): RNG streams intentionally differ from torch/np host RNG;
    # distributions match but sample-for-sample parity is impossible.
    k_apply, k_b, k_c, k_s, k_h, k_perm = jax.random.split(key, 6)

    if training:
        apply_i = (jax.random.uniform(k_apply, (N,)) > epsilon).astype(jnp.int32)
    else:
        apply_i = jnp.zeros((N,), jnp.int32)

    bf = jax.random.uniform(k_b, (N,), minval=max(0.0, 1.0 - brightness),
                            maxval=1.0 + brightness)
    cf = jax.random.uniform(k_c, (N,), minval=max(0.0, 1.0 - contrast),
                            maxval=1.0 + contrast)
    sf = jax.random.uniform(k_s, (N,), minval=max(0.0, 1.0 - saturation),
                            maxval=1.0 + saturation)
    hf = jax.random.uniform(k_h, (N,), minval=-hue, maxval=hue)

    # Per-sample uniform random op order: argsort of iid uniforms == randperm.
    orders = jnp.argsort(jax.random.uniform(k_perm, (N, 4)), axis=-1).astype(jnp.int32)

    # Flat 1-D SMEM tables (avoid 2-D SMEM column padding to 128 words).
    fparams = jnp.stack([bf, cf, sf, hf], axis=1).reshape(-1).astype(jnp.float32)   # (4N,)
    iparams = jnp.concatenate([apply_i[:, None], orders],
                              axis=1).reshape(-1).astype(jnp.int32)                 # (5N,)

    # Lane-dense layout: pad H*W to a multiple of 128 (zeros) and fold the
    # channel axis into sublanes -> one (3*Rc, 128) slab per image.  Full-lane
    # stores everywhere; tiny frames (Rc < 8) waste at most 2 sublanes.
    HWp = ((HW + 127) // 128) * 128
    Rc = HWp // 128
    rows = 3 * Rc
    x_flat = x.reshape(N, 3, HW)
    if HWp != HW:
        x_flat = jnp.pad(x_flat, ((0, 0), (0, 0), (0, HWp - HW)))
    x_r = x_flat.reshape(N, rows, 128)

    bytes_per_img = rows * 128 * x.dtype.itemsize
    btile = _pick_btile(N, bytes_per_img, _NUM_TC)
    grid = (N // btile,)
    block_bytes = btile * bytes_per_img
    # Double-buffered in + out blocks plus headroom; stay well below the 64 MiB
    # physical VMEM of a v7x TensorCore.
    vmem_limit = int(min(48 << 20, max(32 << 20, 4 * block_bytes + (4 << 20))))

    kernel = functools.partial(_color_jitter_kernel, inv_hw=float(1.0 / HW))

    out = pl.pallas_call(
        kernel,
        out_shape=jax.ShapeDtypeStruct((N, rows, 128), x.dtype),
        grid_spec=pltpu.PrefetchScalarGridSpec(
            num_scalar_prefetch=0,
            grid=grid,
            in_specs=[
                pl.BlockSpec(memory_space=pltpu.MemorySpace.SMEM),      # float factors
                pl.BlockSpec(memory_space=pltpu.MemorySpace.SMEM),      # int apply/op-order
                pl.BlockSpec((btile, rows, 128), lambda i: (i, 0, 0)),
            ],
            out_specs=pl.BlockSpec((btile, rows, 128), lambda i: (i, 0, 0)),
        ),
        compiler_params=pltpu.CompilerParams(
            dimension_semantics=("parallel",),
            vmem_limit_bytes=vmem_limit,
        ),
    )(fparams, iparams, x_r)

    out = out.reshape(N, 3, HWp)
    if HWp != HW:
        out = out[:, :, :HW]
    return out.reshape(N, C, H, W)


# ----------------------------------------------------------------------------
# Pure-JAX reference (exact divisions) for the self-test in __main__.
# ----------------------------------------------------------------------------
def _ref_adjust_hue(img, f):
    r, g, b = img[0], img[1], img[2]
    maxc = jnp.maximum(jnp.maximum(r, g), b)
    minc = jnp.minimum(jnp.minimum(r, g), b)
    eqc = maxc == minc
    cr = maxc - minc
    ones = jnp.ones_like(maxc)
    s = cr / jnp.where(eqc, ones, maxc)
    crd = jnp.where(eqc, ones, cr)
    rc = (maxc - r) / crd
    gc = (maxc - g) / crd
    bc = (maxc - b) / crd
    hr = jnp.where(maxc == r, bc - gc, 0.0)
    hg = jnp.where((maxc == g) & (maxc != r), 2.0 + rc - bc, 0.0)
    hb = jnp.where((maxc != g) & (maxc != r), 4.0 + gc - rc, 0.0)
    h = (hr + hg + hb) / 6.0 + 1.0
    h = h - jnp.floor(h)
    h = h + f
    h = h - jnp.floor(h)
    h6 = h * 6.0
    i = jnp.floor(h6)
    fr = h6 - i
    i = i.astype(jnp.int32) % 6
    v = maxc
    p = jnp.clip(v * (1.0 - s), 0.0, 1.0)
    q = jnp.clip(v * (1.0 - s * fr), 0.0, 1.0)
    t = jnp.clip(v * (1.0 - s * (1.0 - fr)), 0.0, 1.0)
    masks = [i == k for k in range(6)]
    ro = jnp.select(masks, [v, q, p, p, t, v])
    go = jnp.select(masks, [t, v, v, q, p, p])
    bo = jnp.select(masks, [p, p, t, v, v, q])
    return jnp.stack([ro, go, bo])


def _ref_forward(x, key, training, epsilon, brightness, contrast, saturation, hue):
    N = x.shape[0]
    k_apply, k_b, k_c, k_s, k_h, k_perm = jax.random.split(key, 6)
    if training:
        apply_i = jax.random.uniform(k_apply, (N,)) > epsilon
    else:
        apply_i = jnp.zeros((N,), bool)
    bf = jax.random.uniform(k_b, (N,), minval=max(0.0, 1.0 - brightness),
                            maxval=1.0 + brightness)
    cf = jax.random.uniform(k_c, (N,), minval=max(0.0, 1.0 - contrast),
                            maxval=1.0 + contrast)
    sf = jax.random.uniform(k_s, (N,), minval=max(0.0, 1.0 - saturation),
                            maxval=1.0 + saturation)
    hf = jax.random.uniform(k_h, (N,), minval=-hue, maxval=hue)
    orders = jnp.argsort(jax.random.uniform(k_perm, (N, 4)), axis=-1)

    outs = []
    for n in range(N):
        img = x[n]
        if bool(apply_i[n]):
            for s in range(4):
                op = int(orders[n, s])
                if op == 0:
                    img = jnp.clip(img * bf[n], 0.0, 1.0)
                elif op == 1:
                    mean = jnp.mean(_gray(img[0], img[1], img[2]))
                    img = jnp.clip(cf[n] * img + (1.0 - cf[n]) * mean, 0.0, 1.0)
                elif op == 2:
                    gr = _gray(img[0], img[1], img[2])
                    img = jnp.clip(sf[n] * img + (1.0 - sf[n]) * gr[None], 0.0, 1.0)
                else:
                    img = _ref_adjust_hue(img, hf[n])
        outs.append(img)
    return jnp.stack(outs)


if __name__ == "__main__":
    key = jax.random.PRNGKey(0)
    kx, kaug = jax.random.split(key)
    # small NCHW RGB batch, values in [0, 1]
    x = jax.random.uniform(kx, (2, 3, 16, 16), dtype=jnp.float32)

    y = jax.block_until_ready(batchwise_img_color_jitter_aug(x, kaug, training=True))
    assert y.shape == x.shape and y.dtype == x.dtype
    assert bool(jnp.all(jnp.isfinite(y)))
    assert bool(jnp.all((y >= 0.0) & (y <= 1.0)))

    # compare against an exact-division pure-JAX reference (kernel uses EUP
    # approx reciprocals in the hue path, so allow a small tolerance)
    y_ref = _ref_forward(x, kaug, True, 0.1, 0.3, 0.3, 0.3, 0.3)
    assert float(jnp.max(jnp.abs(y - y_ref))) < 1e-2

    # eval mode must be an exact pass-through
    y_eval = jax.block_until_ready(
        batchwise_img_color_jitter_aug(x, kaug, training=False))
    assert bool(jnp.all(y_eval == x))

    # training with epsilon=1.0: apply flag always 0 -> in-kernel identity path
    y_id = jax.block_until_ready(
        batchwise_img_color_jitter_aug(x, kaug, training=True, epsilon=1.0))
    assert bool(jnp.all(y_id == x))

    print("KERNEL_OK")
</pallas_src>

<mosaic_0001>
module attributes {stable_mosaic.version = 11 : i64} {
  func.func @_color_jitter_kernel(%arg0: i32, %arg1: memref<8xf32, #tpu.memory_space<smem>>, %arg2: memref<10xi32, #tpu.memory_space<smem>>, %arg3: memref<2x6x128xf32, #tpu.memory_space<vmem>>, %arg4: memref<2x6x128xf32, #tpu.memory_space<vmem>>) attributes {dimension_semantics = [#tpu.dimension_semantics<parallel>], iteration_bounds = array<i64: 1>, scalar_prefetch = 0 : i64, scratch_operands = 0 : i64, tpu.core_type = #tpu.core_type<tc>, window_params = [{transform_indices = @transform_0, window_bounds = array<i64: 8>}, {transform_indices = @transform_1, window_bounds = array<i64: 10>}, {transform_indices = @transform_2, window_bounds = array<i64: 2, 6, 128>}, {transform_indices = @transform_3, window_bounds = array<i64: 2, 6, 128>}]} {
    %c2_i32 = arith.constant 2 : i32
    %0 = arith.muli %arg0, %c2_i32 : i32
    %c0_i32 = arith.constant 0 : i32
    %c2_i32_0 = arith.constant 2 : i32
    %1 = arith.addi %c0_i32, %c2_i32_0 : i32
    %c1_i32 = arith.constant 1 : i32
    scf.for %arg5 = %c0_i32 to %1 step %c1_i32  : i32 {
      %c1_i32_2 = arith.constant 1 : i32
      %2 = arith.muli %arg5, %c1_i32_2 : i32
      %c0_i32_3 = arith.constant 0 : i32
      %3 = arith.addi %c0_i32_3, %2 : i32
      %4 = arith.addi %0, %3 : i32
      %c5_i32 = arith.constant 5 : i32
      %5 = arith.muli %4, %c5_i32 : i32
      %c0_i32_4 = arith.constant 0 : i32
      %6 = arith.addi %5, %c0_i32_4 : i32
      %7 = arith.index_cast %6 : i32 to index
      %8 = memref.load %arg2[%7] : memref<10xi32, #tpu.memory_space<smem>>
      %c0_i32_5 = arith.constant 0 : i32
      %9 = arith.cmpi eq, %8, %c0_i32_5 : i32
      %10 = arith.extui %9 : i1 to i32
      %c0_i32_6 = arith.constant 0 : i32
      %11 = arith.cmpi ne, %10, %c0_i32_6 : i32
      scf.if %11 {
        %15 = arith.index_cast %3 : i32 to index
        %c0 = arith.constant 0 : index
        %c0_9 = arith.constant 0 : index
        %16 = vector.load %arg3[%15, %c0, %c0_9] : memref<2x6x128xf32, #tpu.memory_space<vmem>>, vector<1x6x128xf32>
        %17 = vector.shape_cast %16 : vector<1x6x128xf32> to vector<6x128xf32>
        %18 = arith.index_cast %3 : i32 to index
        %c0_10 = arith.constant 0 : index
        %c0_11 = arith.constant 0 : index
        %19 = vector.load %arg4[%18, %c0_10, %c0_11] : memref<2x6x128xf32, #tpu.memory_space<vmem>>, vector<1x6x128xf32>
        %20 = vector.shape_cast %19 : vector<1x6x128xf32> to vector<6x128xf32>
        %21 = vector.shape_cast %17 : vector<6x128xf32> to vector<1x6x128xf32>
        tpu.vector_store %arg4[%18, %c0_10, %c0_11], %21 {strides = array<i32>} : memref<2x6x128xf32, #tpu.memory_space<vmem>>, vector<1x6x128xf32>,
      } else {
      }
      %c0_i32_7 = arith.constant 0 : i32
      %12 = arith.cmpi ne, %8, %c0_i32_7 : i32
      %13 = arith.extui %12 : i1 to i32
      %c0_i32_8 = arith.constant 0 : i32
      %14 = arith.cmpi ne, %13, %c0_i32_8 : i32
      scf.if %14 {
        %c4_i32 = arith.constant 4 : i32
        %15 = arith.muli %4, %c4_i32 : i32
        %c0_i32_9 = arith.constant 0 : i32
        %16 = arith.addi %15, %c0_i32_9 : i32
        %17 = arith.index_cast %16 : i32 to index
        %18 = memref.load %arg1[%17] : memref<8xf32, #tpu.memory_space<smem>>
        %c4_i32_10 = arith.constant 4 : i32
        %19 = arith.muli %4, %c4_i32_10 : i32
        %c1_i32_11 = arith.constant 1 : i32
        %20 = arith.addi %19, %c1_i32_11 : i32
        %21 = arith.index_cast %20 : i32 to index
        %22 = memref.load %arg1[%21] : memref<8xf32, #tpu.memory_space<smem>>
        %c4_i32_12 = arith.constant 4 : i32
        %23 = arith.muli %4, %c4_i32_12 : i32
        %c2_i32_13 = arith.constant 2 : i32
        %24 = arith.addi %23, %c2_i32_13 : i32
        %25 = arith.index_cast %24 : i32 to index
        %26 = memref.load %arg1[%25] : memref<8xf32, #tpu.memory_space<smem>>
        %c4_i32_14 = arith.constant 4 : i32
        %27 = arith.muli %4, %c4_i32_14 : i32
        %c3_i32 = arith.constant 3 : i32
        %28 = arith.addi %27, %c3_i32 : i32
        %29 = arith.index_cast %28 : i32 to index
        %30 = memref.load %arg1[%29] : memref<8xf32, #tpu.memory_space<smem>>
        %c5_i32_15 = arith.constant 5 : i32
        %31 = arith.muli %4, %c5_i32_15 : i32
        %c1_i32_16 = arith.constant 1 : i32
        %32 = arith.addi %31, %c1_i32_16 : i32
        %c0_i32_17 = arith.constant 0 : i32
        %33 = arith.addi %32, %c0_i32_17 : i32
        %34 = arith.index_cast %33 : i32 to index
        %35 = memref.load %arg2[%34] : memref<10xi32, #tpu.memory_space<smem>>
        %c0_i32_18 = arith.constant 0 : i32
        %36 = arith.cmpi eq, %35, %c0_i32_18 : i32
        %37 = arith.extui %36 : i1 to i32
        %c0_i32_19 = arith.constant 0 : i32
        %38 = arith.cmpi ne, %37, %c0_i32_19 : i32
        scf.if %38 {
          %99 = arith.index_cast %3 : i32 to index
          %c0 = arith.constant 0 : index
          %c0_59 = arith.constant 0 : index
          %100 = vector.load %arg3[%99, %c0, %c0_59] : memref<2x6x128xf32, #tpu.memory_space<vmem>>, vector<1x6x128xf32>
          %101 = vector.shape_cast %100 : vector<1x6x128xf32> to vector<6x128xf32>
          %102 = vector.broadcast %18 : f32 to vector<6x128xf32>
          %103 = arith.mulf %101, %102 : vector<6x128xf32>
          %cst = arith.constant 0.000000e+00 : f32
          %cst_60 = arith.constant 1.000000e+00 : f32
          %104 = vector.broadcast %cst : f32 to vector<6x128xf32>
          %105 = arith.maximumf %104, %103 : vector<6x128xf32>
          %106 = vector.broadcast %cst_60 : f32 to vector<6x128xf32>
          %107 = arith.minimumf %106, %105 : vector<6x128xf32>
          %108 = arith.index_cast %3 : i32 to index
          %c0_61 = arith.constant 0 : index
          %c0_62 = arith.constant 0 : index
          %109 = vector.load %arg4[%108, %c0_61, %c0_62] : memref<2x6x128xf32, #tpu.memory_space<vmem>>, vector<1x6x128xf32>
          %110 = vector.shape_cast %109 : vector<1x6x128xf32> to vector<6x128xf32>
          %111 = vector.shape_cast %107 : vector<6x128xf32> to vector<1x6x128xf32>
          tpu.vector_store %arg4[%108, %c0_61, %c0_62], %111 {strides = array<i32>} : memref<2x6x128xf32, #tpu.memory_space<vmem>>, vector<1x6x128xf32>,
        } else {
        }
        %c1_i32_20 = arith.constant 1 : i32
        %39 = arith.cmpi eq, %35, %c1_i32_20 : i32
        %40 = arith.extui %39 : i1 to i32
        %c0_i32_21 = arith.constant 0 : i32
        %41 = arith.cmpi ne, %40, %c0_i32_21 : i32
        scf.if %41 {
          %99 = arith.index_cast %3 : i32 to index
          %c0 = arith.constant 0 : index
          %c0_59 = arith.constant 0 : index
          %100 = vector.load %arg3[%99, %c0, %c0_59] : memref<2x6x128xf32, #tpu.memory_space<vmem>>, vector<1x2x128xf32>
          %101 = vector.shape_cast %100 : vector<1x2x128xf32> to vector<2x128xf32>
          %102 = arith.index_cast %3 : i32 to index
          %c2 = arith.constant 2 : index
          %c0_60 = arith.constant 0 : index
          %103 = vector.load %arg3[%102, %c2, %c0_60] : memref<2x6x128xf32, #tpu.memory_space<vmem>>, vector<1x2x128xf32>
          %104 = vector.shape_cast %103 : vector<1x2x128xf32> to vector<2x128xf32>
          %105 = arith.index_cast %3 : i32 to index
          %c4 = arith.constant 4 : index
          %c0_61 = arith.constant 0 : index
          %106 = vector.load %arg3[%105, %c4, %c0_61] : memref<2x6x128xf32, #tpu.memory_space<vmem>>, vector<1x2x128xf32>
          %107 = vector.shape_cast %106 : vector<1x2x128xf32> to vector<2x128xf32>
          %cst = arith.constant 2.989000e-01 : f32
          %108 = vector.broadcast %cst : f32 to vector<2x128xf32>
          %109 = arith.mulf %108, %101 : vector<2x128xf32>
          %cst_62 = arith.constant 5.870000e-01 : f32
          %110 = vector.broadcast %cst_62 : f32 to vector<2x128xf32>
          %111 = arith.mulf %110, %104 : vector<2x128xf32>
          %112 = arith.addf %109, %111 : vector<2x128xf32>
          %cst_63 = arith.constant 1.140000e-01 : f32
          %113 = vector.broadcast %cst_63 : f32 to vector<2x128xf32>
          %114 = arith.mulf %113, %107 : vector<2x128xf32>
          %115 = arith.addf %112, %114 : vector<2x128xf32>
          %116 = vector.shape_cast %115 : vector<2x128xf32> to vector<1x2x128xf32>
          %cst_64 = arith.constant dense<0.000000e+00> : vector<1xf32>
          %117 = vector.multi_reduction <add>, %116, %cst_64 [1, 2] : vector<1x2x128xf32> to vector<1xf32>
          %118 = vector.shape_cast %117 : vector<1xf32> to vector<1x1x1xf32>
          %119 = vector.extract %118[0, 0, 0] : f32 from vector<1x1x1xf32>
          %cst_65 = arith.constant 3.906250e-03 : f32
          %120 = arith.mulf %119, %cst_65 : f32
          %cst_66 = arith.constant 1.000000e+00 : f32
          %121 = arith.subf %cst_66, %22 : f32
          %122 = arith.mulf %121, %120 : f32
          %123 = vector.broadcast %122 : f32 to vector<2x128xf32>
          %124 = vector.broadcast %22 : f32 to vector<2x128xf32>
          %125 = arith.mulf %124, %101 : vector<2x128xf32>
          %126 = arith.addf %125, %123 : vector<2x128xf32>
          %cst_67 = arith.constant 0.000000e+00 : f32
          %cst_68 = arith.constant 1.000000e+00 : f32
          %127 = vector.broadcast %cst_67 : f32 to vector<2x128xf32>
          %128 = arith.maximumf %127, %126 : vector<2x128xf32>
          %129 = vector.broadcast %cst_68 : f32 to vector<2x128xf32>
          %130 = arith.minimumf %129, %128 : vector<2x128xf32>
          %131 = arith.index_cast %3 : i32 to index
          %c0_69 = arith.constant 0 : index
          %c0_70 = arith.constant 0 : index
          %132 = vector.load %arg4[%131, %c0_69, %c0_70] : memref<2x6x128xf32, #tpu.memory_space<vmem>>, vector<1x2x128xf32>
          %133 = vector.shape_cast %132 : vector<1x2x128xf32> to vector<2x128xf32>
          %134 = vector.shape_cast %130 : vector<2x128xf32> to vector<1x2x128xf32>
          tpu.vector_store %arg4[%131, %c0_69, %c0_70], %134 {strides = array<i32>} : memref<2x6x128xf32, #tpu.memory_space<vmem>>, vector<1x2x128xf32>,
          %135 = vector.broadcast %22 : f32 to vector<2x128xf32>
          %136 = arith.mulf %135, %104 : vector<2x128xf32>
          %137 = arith.addf %136, %123 : vector<2x128xf32>
          %cst_71 = arith.constant 0.000000e+00 : f32
          %cst_72 = arith.constant 1.000000e+00 : f32
          %138 = vector.broadcast %cst_71 : f32 to vector<2x128xf32>
          %139 = arith.maximumf %138, %137 : vector<2x128xf32>
          %140 = vector.broadcast %cst_72 : f32 to vector<2x128xf32>
          %141 = arith.minimumf %140, %139 : vector<2x128xf32>
          %142 = arith.index_cast %3 : i32 to index
          %c2_73 = arith.constant 2 : index
          %c0_74 = arith.constant 0 : index
          %143 = vector.load %arg4[%142, %c2_73, %c0_74] : memref<2x6x128xf32, #tpu.memory_space<vmem>>, vector<1x2x128xf32>
          %144 = vector.shape_cast %143 : vector<1x2x128xf32> to vector<2x128xf32>
          %145 = vector.shape_cast %141 : vector<2x128xf32> to vector<1x2x128xf32>
          tpu.vector_store %arg4[%142, %c2_73, %c0_74], %145 {strides = array<i32>} : memref<2x6x128xf32, #tpu.memory_space<vmem>>, vector<1x2x128xf32>,
          %146 = vector.broadcast %22 : f32 to vector<2x128xf32>
          %147 = arith.mulf %146, %107 : vector<2x128xf32>
          %148 = arith.addf %147, %123 : vector<2x128xf32>
          %cst_75 = arith.constant 0.000000e+00 : f32
          %cst_76 = arith.constant 1.000000e+00 : f32
          %149 = vector.broadcast %cst_75 : f32 to vector<2x128xf32>
          %150 = arith.maximumf %149, %148 : vector<2x128xf32>
          %151 = vector.broadcast %cst_76 : f32 to vector<2x128xf32>
          %152 = arith.minimumf %151, %150 : vector<2x128xf32>
          %153 = arith.index_cast %3 : i32 to index
          %c4_77 = arith.constant 4 : index
          %c0_78 = arith.constant 0 : index
          %154 = vector.load %arg4[%153, %c4_77, %c0_78] : memref<2x6x128xf32, #tpu.memory_space<vmem>>, vector<1x2x128xf32>
          %155 = vector.shape_cast %154 : vector<1x2x128xf32> to vector<2x128xf32>
          %156 = vector.shape_cast %152 : vector<2x128xf32> to vector<1x2x128xf32>
          tpu.vector_store %arg4[%153, %c4_77, %c0_78], %156 {strides = array<i32>} : memref<2x6x128xf32, #tpu.memory_space<vmem>>, vector<1x2x128xf32>,
        } else {
        }
        %c2_i32_22 = arith.constant 2 : i32
        %42 = arith.cmpi eq, %35, %c2_i32_22 : i32
        %43 = arith.extui %42 : i1 to i32
        %c0_i32_23 = arith.constant 0 : i32
        %44 = arith.cmpi ne, %43, %c0_i32_23 : i32
        scf.if %44 {
          %99 = arith.index_cast %3 : i32 to index
          %c0 = arith.constant 0 : index
          %c0_59 = arith.constant 0 : index
          %100 = vector.load %arg3[%99, %c0, %c0_59] : memref<2x6x128xf32, #tpu.memory_space<vmem>>, vector<1x2x128xf32>
          %101 = vector.shape_cast %100 : vector<1x2x128xf32> to vector<2x128xf32>
          %102 = arith.index_cast %3 : i32 to index
          %c2 = arith.constant 2 : index
          %c0_60 = arith.constant 0 : index
          %103 = vector.load %arg3[%102, %c2, %c0_60] : memref<2x6x128xf32, #tpu.memory_space<vmem>>, vector<1x2x128xf32>
          %104 = vector.shape_cast %103 : vector<1x2x128xf32> to vector<2x128xf32>
          %105 = arith.index_cast %3 : i32 to index
          %c4 = arith.constant 4 : index
          %c0_61 = arith.constant 0 : index
          %106 = vector.load %arg3[%105, %c4, %c0_61] : memref<2x6x128xf32, #tpu.memory_space<vmem>>, vector<1x2x128xf32>
          %107 = vector.shape_cast %106 : vector<1x2x128xf32> to vector<2x128xf32>
          %cst = arith.constant 1.000000e+00 : f32
          %108 = arith.subf %cst, %26 : f32
          %cst_62 = arith.constant 2.989000e-01 : f32
          %109 = vector.broadcast %cst_62 : f32 to vector<2x128xf32>
          %110 = arith.mulf %109, %101 : vector<2x128xf32>
          %cst_63 = arith.constant 5.870000e-01 : f32
          %111 = vector.broadcast %cst_63 : f32 to vector<2x128xf32>
          %112 = arith.mulf %111, %104 : vector<2x128xf32>
          %113 = arith.addf %110, %112 : vector<2x128xf32>
          %cst_64 = arith.constant 1.140000e-01 : f32
          %114 = vector.broadcast %cst_64 : f32 to vector<2x128xf32>
          %115 = arith.mulf %114, %107 : vector<2x128xf32>
          %116 = arith.addf %113, %115 : vector<2x128xf32>
          %117 = vector.broadcast %108 : f32 to vector<2x128xf32>
          %118 = arith.mulf %117, %116 : vector<2x128xf32>
          %119 = vector.broadcast %26 : f32 to vector<2x128xf32>
          %120 = arith.mulf %119, %101 : vector<2x128xf32>
          %121 = arith.addf %120, %118 : vector<2x128xf32>
          %cst_65 = arith.constant 0.000000e+00 : f32
          %cst_66 = arith.constant 1.000000e+00 : f32
          %122 = vector.broadcast %cst_65 : f32 to vector<2x128xf32>
          %123 = arith.maximumf %122, %121 : vector<2x128xf32>
          %124 = vector.broadcast %cst_66 : f32 to vector<2x128xf32>
          %125 = arith.minimumf %124, %123 : vector<2x128xf32>
          %126 = arith.index_cast %3 : i32 to index
          %c0_67 = arith.constant 0 : index
          %c0_68 = arith.constant 0 : index
          %127 = vector.load %arg4[%126, %c0_67, %c0_68] : memref<2x6x128xf32, #tpu.memory_space<vmem>>, vector<1x2x128xf32>
          %128 = vector.shape_cast %127 : vector<1x2x128xf32> to vector<2x128xf32>
          %129 = vector.shape_cast %125 : vector<2x128xf32> to vector<1x2x128xf32>
          tpu.vector_store %arg4[%126, %c0_67, %c0_68], %129 {strides = array<i32>} : memref<2x6x128xf32, #tpu.memory_space<vmem>>, vector<1x2x128xf32>,
          %130 = vector.broadcast %26 : f32 to vector<2x128xf32>
          %131 = arith.mulf %130, %104 : vector<2x128xf32>
          %132 = arith.addf %131, %118 : vector<2x128xf32>
          %cst_69 = arith.constant 0.000000e+00 : f32
          %cst_70 = arith.constant 1.000000e+00 : f32
          %133 = vector.broadcast %cst_69 : f32 to vector<2x128xf32>
          %134 = arith.maximumf %133, %132 : vector<2x128xf32>
          %135 = vector.broadcast %cst_70 : f32 to vector<2x128xf32>
          %136 = arith.minimumf %135, %134 : vector<2x128xf32>
          %137 = arith.index_cast %3 : i32 to index
          %c2_71 = arith.constant 2 : index
          %c0_72 = arith.constant 0 : index
          %138 = vector.load %arg4[%137, %c2_71, %c0_72] : memref<2x6x128xf32, #tpu.memory_space<vmem>>, vector<1x2x128xf32>
          %139 = vector.shape_cast %138 : vector<1x2x128xf32> to vector<2x128xf32>
          %140 = vector.shape_cast %136 : vector<2x128xf32> to vector<1x2x128xf32>
          tpu.vector_store %arg4[%137, %c2_71, %c0_72], %140 {strides = array<i32>} : memref<2x6x128xf32, #tpu.memory_space<vmem>>, vector<1x2x128xf32>,
          %141 = vector.broadcast %26 : f32 to vector<2x128xf32>
          %142 = arith.mulf %141, %107 : vector<2x128xf32>
          %143 = arith.addf %142, %118 : vector<2x128xf32>
          %cst_73 = arith.constant 0.000000e+00 : f32
          %cst_74 = arith.constant 1.000000e+00 : f32
          %144 = vector.broadcast %cst_73 : f32 to vector<2x128xf32>
          %145 = arith.maximumf %144, %143 : vector<2x128xf32>
          %146 = vector.broadcast %cst_74 : f32 to vector<2x128xf32>
          %147 = arith.minimumf %146, %145 : vector<2x128xf32>
          %148 = arith.index_cast %3 : i32 to index
          %c4_75 = arith.constant 4 : index
          %c0_76 = arith.constant 0 : index
          %149 = vector.load %arg4[%148, %c4_75, %c0_76] : memref<2x6x128xf32, #tpu.memory_space<vmem>>, vector<1x2x128xf32>
          %150 = vector.shape_cast %149 : vector<1x2x128xf32> to vector<2x128xf32>
          %151 = vector.shape_cast %147 : vector<2x128xf32> to vector<1x2x128xf32>
          tpu.vector_store %arg4[%148, %c4_75, %c0_76], %151 {strides = array<i32>} : memref<2x6x128xf32, #tpu.memory_space<vmem>>, vector<1x2x128xf32>,
        } else {
        }
        %c3_i32_24 = arith.constant 3 : i32
        %45 = arith.cmpi eq, %35, %c3_i32_24 : i32
        %46 = arith.extui %45 : i1 to i32
        %c0_i32_25 = arith.constant 0 : i32
        %47 = arith.cmpi ne, %46, %c0_i32_25 : i32
        scf.if %47 {
          %99 = arith.index_cast %3 : i32 to index
          %c0 = arith.constant 0 : index
          %c0_59 = arith.constant 0 : index
          %100 = vector.load %arg3[%99, %c0, %c0_59] : memref<2x6x128xf32, #tpu.memory_space<vmem>>, vector<1x2x128xf32>
          %101 = vector.shape_cast %100 : vector<1x2x128xf32> to vector<2x128xf32>
          %102 = arith.index_cast %3 : i32 to index
          %c2 = arith.constant 2 : index
          %c0_60 = arith.constant 0 : index
          %103 = vector.load %arg3[%102, %c2, %c0_60] : memref<2x6x128xf32, #tpu.memory_space<vmem>>, vector<1x2x128xf32>
          %104 = vector.shape_cast %103 : vector<1x2x128xf32> to vector<2x128xf32>
          %105 = arith.index_cast %3 : i32 to index
          %c4 = arith.constant 4 : index
          %c0_61 = arith.constant 0 : index
          %106 = vector.load %arg3[%105, %c4, %c0_61] : memref<2x6x128xf32, #tpu.memory_space<vmem>>, vector<1x2x128xf32>
          %107 = vector.shape_cast %106 : vector<1x2x128xf32> to vector<2x128xf32>
          %108 = arith.maximumf %101, %104 : vector<2x128xf32>
          %109 = arith.maximumf %108, %107 : vector<2x128xf32>
          %110 = arith.minimumf %101, %104 : vector<2x128xf32>
          %111 = arith.minimumf %110, %107 : vector<2x128xf32>
          %112 = arith.cmpf oeq, %109, %111 : vector<2x128xf32>
          %113 = arith.subf %109, %111 : vector<2x128xf32>
          %cst = arith.constant 1.000000e+00 : f32
          %114 = vector.broadcast %cst : f32 to vector<2x128xf32>
          %115 = arith.select %112, %114, %109 : vector<2x128xi1>, vector<2x128xf32>
          %116 = tpu.reciprocal %115 {approx = true} : vector<2x128xf32> -> vector<2x128xf32>
          %117 = arith.select %112, %114, %113 : vector<2x128xi1>, vector<2x128xf32>
          %118 = tpu.reciprocal %117 {approx = true} : vector<2x128xf32> -> vector<2x128xf32>
          %119 = arith.mulf %113, %116 : vector<2x128xf32>
          %cst_62 = arith.constant 1.000000e+00 : f32
          %120 = vector.broadcast %cst_62 : f32 to vector<2x128xf32>
          %121 = arith.minimumf %119, %120 : vector<2x128xf32>
          %122 = arith.subf %109, %101 : vector<2x128xf32>
          %123 = arith.mulf %122, %118 : vector<2x128xf32>
          %124 = arith.subf %109, %104 : vector<2x128xf32>
          %125 = arith.mulf %124, %118 : vector<2x128xf32>
          %126 = arith.subf %109, %107 : vector<2x128xf32>
          %127 = arith.mulf %126, %118 : vector<2x128xf32>
          %128 = arith.cmpf oeq, %109, %101 : vector<2x128xf32>
          %129 = arith.subf %127, %125 : vector<2x128xf32>
          %cst_63 = arith.constant 0.000000e+00 : f32
          %130 = vector.broadcast %cst_63 : f32 to vector<2x128xf32>
          %131 = arith.select %128, %129, %130 : vector<2x128xi1>, vector<2x128xf32>
          %132 = arith.cmpf oeq, %109, %104 : vector<2x128xf32>
          %cst_64 = arith.constant dense<true> : vector<2x128xi1>
          %133 = arith.xori %128, %cst_64 : vector<2x128xi1>
          %134 = arith.andi %132, %133 : vector<2x128xi1>
          %cst_65 = arith.constant 2.000000e+00 : f32
          %135 = vector.broadcast %cst_65 : f32 to vector<2x128xf32>
          %136 = arith.addf %135, %123 : vector<2x128xf32>
          %137 = arith.subf %136, %127 : vector<2x128xf32>
          %cst_66 = arith.constant 0.000000e+00 : f32
          %138 = vector.broadcast %cst_66 : f32 to vector<2x128xf32>
          %139 = arith.select %134, %137, %138 : vector<2x128xi1>, vector<2x128xf32>
          %140 = arith.cmpf one, %109, %104 : vector<2x128xf32>
          %cst_67 = arith.constant dense<true> : vector<2x128xi1>
          %141 = arith.xori %128, %cst_67 : vector<2x128xi1>
          %142 = arith.andi %140, %141 : vector<2x128xi1>
          %cst_68 = arith.constant 4.000000e+00 : f32
          %143 = vector.broadcast %cst_68 : f32 to vector<2x128xf32>
          %144 = arith.addf %143, %125 : vector<2x128xf32>
          %145 = arith.subf %144, %123 : vector<2x128xf32>
          %cst_69 = arith.constant 0.000000e+00 : f32
          %146 = vector.broadcast %cst_69 : f32 to vector<2x128xf32>
          %147 = arith.select %142, %145, %146 : vector<2x128xi1>, vector<2x128xf32>
          %148 = arith.addf %131, %139 : vector<2x128xf32>
          %149 = arith.addf %148, %147 : vector<2x128xf32>
          %cst_70 = arith.constant 0.166666672 : f32
          %150 = vector.broadcast %cst_70 : f32 to vector<2x128xf32>
          %151 = arith.mulf %149, %150 : vector<2x128xf32>
          %cst_71 = arith.constant 1.000000e+00 : f32
          %152 = vector.broadcast %cst_71 : f32 to vector<2x128xf32>
          %153 = arith.addf %151, %152 : vector<2x128xf32>
          %154 = math.floor %153 : vector<2x128xf32>
          %155 = arith.subf %153, %154 : vector<2x128xf32>
          %156 = vector.broadcast %30 : f32 to vector<2x128xf32>
          %157 = arith.addf %155, %156 : vector<2x128xf32>
          %158 = math.floor %157 : vector<2x128xf32>
          %159 = arith.subf %157, %158 : vector<2x128xf32>
          %cst_72 = arith.constant 6.000000e+00 : f32
          %160 = vector.broadcast %cst_72 : f32 to vector<2x128xf32>
          %161 = arith.mulf %159, %160 : vector<2x128xf32>
          %162 = math.floor %161 : vector<2x128xf32>
          %163 = arith.subf %161, %162 : vector<2x128xf32>
          %cst_73 = arith.constant 6.000000e+00 : f32
          %164 = vector.broadcast %cst_73 : f32 to vector<2x128xf32>
          %165 = arith.cmpf oge, %162, %164 : vector<2x128xf32>
          %cst_74 = arith.constant 6.000000e+00 : f32
          %166 = vector.broadcast %cst_74 : f32 to vector<2x128xf32>
          %167 = arith.subf %162, %166 : vector<2x128xf32>
          %168 = arith.select %165, %167, %162 : vector<2x128xi1>, vector<2x128xf32>
          %cst_75 = arith.constant 1.000000e+00 : f32
          %169 = vector.broadcast %cst_75 : f32 to vector<2x128xf32>
          %170 = arith.subf %169, %121 : vector<2x128xf32>
          %171 = arith.mulf %109, %170 : vector<2x128xf32>
          %172 = arith.mulf %121, %163 : vector<2x128xf32>
          %cst_76 = arith.constant 1.000000e+00 : f32
          %173 = vector.broadcast %cst_76 : f32 to vector<2x128xf32>
          %174 = arith.subf %173, %172 : vector<2x128xf32>
          %175 = arith.mulf %109, %174 : vector<2x128xf32>
          %cst_77 = arith.constant 1.000000e+00 : f32
          %176 = vector.broadcast %cst_77 : f32 to vector<2x128xf32>
          %177 = arith.subf %176, %163 : vector<2x128xf32>
          %178 = arith.mulf %121, %177 : vector<2x128xf32>
          %cst_78 = arith.constant 1.000000e+00 : f32
          %179 = vector.broadcast %cst_78 : f32 to vector<2x128xf32>
          %180 = arith.subf %179, %178 : vector<2x128xf32>
          %181 = arith.mulf %109, %180 : vector<2x128xf32>
          %cst_79 = arith.constant 0.000000e+00 : f32
          %182 = vector.broadcast %cst_79 : f32 to vector<2x128xf32>
          %183 = arith.cmpf oeq, %168, %182 : vector<2x128xf32>
          %cst_80 = arith.constant 1.000000e+00 : f32
          %184 = vector.broadcast %cst_80 : f32 to vector<2x128xf32>
          %185 = arith.cmpf oeq, %168, %184 : vector<2x128xf32>
          %cst_81 = arith.constant 2.000000e+00 : f32
          %186 = vector.broadcast %cst_81 : f32 to vector<2x128xf32>
          %187 = arith.cmpf oeq, %168, %186 : vector<2x128xf32>
          %cst_82 = arith.constant 3.000000e+00 : f32
          %188 = vector.broadcast %cst_82 : f32 to vector<2x128xf32>
          %189 = arith.cmpf oeq, %168, %188 : vector<2x128xf32>
          %cst_83 = arith.constant 4.000000e+00 : f32
          %190 = vector.broadcast %cst_83 : f32 to vector<2x128xf32>
          %191 = arith.cmpf oeq, %168, %190 : vector<2x128xf32>
          %192 = arith.select %191, %181, %109 : vector<2x128xi1>, vector<2x128xf32>
          %193 = arith.select %189, %171, %192 : vector<2x128xi1>, vector<2x128xf32>
          %194 = arith.select %187, %171, %193 : vector<2x128xi1>, vector<2x128xf32>
          %195 = arith.select %185, %175, %194 : vector<2x128xi1>, vector<2x128xf32>
          %196 = arith.select %183, %109, %195 : vector<2x128xi1>, vector<2x128xf32>
          %197 = arith.select %191, %171, %171 : vector<2x128xi1>, vector<2x128xf32>
          %198 = arith.select %189, %175, %197 : vector<2x128xi1>, vector<2x128xf32>
          %199 = arith.select %187, %109, %198 : vector<2x128xi1>, vector<2x128xf32>
          %200 = arith.select %185, %109, %199 : vector<2x128xi1>, vector<2x128xf32>
          %201 = arith.select %183, %181, %200 : vector<2x128xi1>, vector<2x128xf32>
          %202 = arith.select %191, %109, %175 : vector<2x128xi1>, vector<2x128xf32>
          %203 = arith.select %189, %109, %202 : vector<2x128xi1>, vector<2x128xf32>
          %204 = arith.select %187, %181, %203 : vector<2x128xi1>, vector<2x128xf32>
          %205 = arith.select %185, %171, %204 : vector<2x128xi1>, vector<2x128xf32>
          %206 = arith.select %183, %171, %205 : vector<2x128xi1>, vector<2x128xf32>
          %207 = arith.index_cast %3 : i32 to index
          %c0_84 = arith.constant 0 : index
          %c0_85 = arith.constant 0 : index
          %208 = vector.load %arg4[%207, %c0_84, %c0_85] : memref<2x6x128xf32, #tpu.memory_space<vmem>>, vector<1x2x128xf32>
          %209 = vector.shape_cast %208 : vector<1x2x128xf32> to vector<2x128xf32>
          %210 = vector.shape_cast %196 : vector<2x128xf32> to vector<1x2x128xf32>
          tpu.vector_store %arg4[%207, %c0_84, %c0_85], %210 {strides = array<i32>} : memref<2x6x128xf32, #tpu.memory_space<vmem>>, vector<1x2x128xf32>,
          %211 = arith.index_cast %3 : i32 to index
          %c2_86 = arith.constant 2 : index
          %c0_87 = arith.constant 0 : index
          %212 = vector.load %arg4[%211, %c2_86, %c0_87] : memref<2x6x128xf32, #tpu.memory_space<vmem>>, vector<1x2x128xf32>
          %213 = vector.shape_cast %212 : vector<1x2x128xf32> to vector<2x128xf32>
          %214 = vector.shape_cast %201 : vector<2x128xf32> to vector<1x2x128xf32>
          tpu.vector_store %arg4[%211, %c2_86, %c0_87], %214 {strides = array<i32>} : memref<2x6x128xf32, #tpu.memory_space<vmem>>, vector<1x2x128xf32>,
          %215 = arith.index_cast %3 : i32 to index
          %c4_88 = arith.constant 4 : index
          %c0_89 = arith.constant 0 : index
          %216 = vector.load %arg4[%215, %c4_88, %c0_89] : memref<2x6x128xf32, #tpu.memory_space<vmem>>, vector<1x2x128xf32>
          %217 = vector.shape_cast %216 : vector<1x2x128xf32> to vector<2x128xf32>
          %218 = vector.shape_cast %206 : vector<2x128xf32> to vector<1x2x128xf32>
          tpu.vector_store %arg4[%215, %c4_88, %c0_89], %218 {strides = array<i32>} : memref<2x6x128xf32, #tpu.memory_space<vmem>>, vector<1x2x128xf32>,
        } else {
        }
        %c5_i32_26 = arith.constant 5 : i32
        %48 = arith.muli %4, %c5_i32_26 : i32
        %c1_i32_27 = arith.constant 1 : i32
        %49 = arith.addi %48, %c1_i32_27 : i32
        %c1_i32_28 = arith.constant 1 : i32
        %50 = arith.addi %49, %c1_i32_28 : i32
        %51 = arith.index_cast %50 : i32 to index
        %52 = memref.load %arg2[%51] : memref<10xi32, #tpu.memory_space<smem>>
        %c0_i32_29 = arith.constant 0 : i32
        %53 = arith.cmpi eq, %52, %c0_i32_29 : i32
        %54 = arith.extui %53 : i1 to i32
        %c0_i32_30 = arith.constant 0 : i32
        %55 = arith.cmpi ne, %54, %c0_i32_30 : i32
        scf.if %55 {
          %99 = arith.index_cast %3 : i32 to index
          %c0 = arith.constant 0 : index
          %c0_59 = arith.constant 0 : index
          %100 = vector.load %arg4[%99, %c0, %c0_59] : memref<2x6x128xf32, #tpu.memory_space<vmem>>, vector<1x6x128xf32>
          %101 = vector.shape_cast %100 : vector<1x6x128xf32> to vector<6x128xf32>
          %102 = vector.broadcast %18 : f32 to vector<6x128xf32>
          %103 = arith.mulf %101, %102 : vector<6x128xf32>
          %cst = arith.constant 0.000000e+00 : f32
          %cst_60 = arith.constant 1.000000e+00 : f32
          %104 = vector.broadcast %cst : f32 to vector<6x128xf32>
          %105 = arith.maximumf %104, %103 : vector<6x128xf32>
          %106 = vector.broadcast %cst_60 : f32 to vector<6x128xf32>
          %107 = arith.minimumf %106, %105 : vector<6x128xf32>
          %108 = arith.index_cast %3 : i32 to index
          %c0_61 = arith.constant 0 : index
          %c0_62 = arith.constant 0 : index
          %109 = vector.load %arg4[%108, %c0_61, %c0_62] : memref<2x6x128xf32, #tpu.memory_space<vmem>>, vector<1x6x128xf32>
          %110 = vector.shape_cast %109 : vector<1x6x128xf32> to vector<6x128xf32>
          %111 = vector.shape_cast %107 : vector<6x128xf32> to vector<1x6x128xf32>
          tpu.vector_store %arg4[%108, %c0_61, %c0_62], %111 {strides = array<i32>} : memref<2x6x128xf32, #tpu.memory_space<vmem>>, vector<1x6x128xf32>,
        } else {
        }
        %c1_i32_31 = arith.constant 1 : i32
        %56 = arith.cmpi eq, %52, %c1_i32_31 : i32
        %57 = arith.extui %56 : i1 to i32
        %c0_i32_32 = arith.constant 0 : i32
        %58 = arith.cmpi ne, %57, %c0_i32_32 : i32
        scf.if %58 {
          %99 = arith.index_cast %3 : i32 to index
          %c0 = arith.constant 0 : index
          %c0_59 = arith.constant 0 : index
          %100 = vector.load %arg4[%99, %c0, %c0_59] : memref<2x6x128xf32, #tpu.memory_space<vmem>>, vector<1x2x128xf32>
          %101 = vector.shape_cast %100 : vector<1x2x128xf32> to vector<2x128xf32>
          %102 = arith.index_cast %3 : i32 to index
          %c2 = arith.constant 2 : index
          %c0_60 = arith.constant 0 : index
          %103 = vector.load %arg4[%102, %c2, %c0_60] : memref<2x6x128xf32, #tpu.memory_space<vmem>>, vector<1x2x128xf32>
          %104 = vector.shape_cast %103 : vector<1x2x128xf32> to vector<2x128xf32>
          %105 = arith.index_cast %3 : i32 to index
          %c4 = arith.constant 4 : index
          %c0_61 = arith.constant 0 : index
          %106 = vector.load %arg4[%105, %c4, %c0_61] : memref<2x6x128xf32, #tpu.memory_space<vmem>>, vector<1x2x128xf32>
          %107 = vector.shape_cast %106 : vector<1x2x128xf32> to vector<2x128xf32>
          %cst = arith.constant 2.989000e-01 : f32
          %108 = vector.broadcast %cst : f32 to vector<2x128xf32>
          %109 = arith.mulf %108, %101 : vector<2x128xf32>
          %cst_62 = arith.constant 5.870000e-01 : f32
          %110 = vector.broadcast %cst_62 : f32 to vector<2x128xf32>
          %111 = arith.mulf %110, %104 : vector<2x128xf32>
          %112 = arith.addf %109, %111 : vector<2x128xf32>
          %cst_63 = arith.constant 1.140000e-01 : f32
          %113 = vector.broadcast %cst_63 : f32 to vector<2x128xf32>
          %114 = arith.mulf %113, %107 : vector<2x128xf32>
          %115 = arith.addf %112, %114 : vector<2x128xf32>
          %116 = vector.shape_cast %115 : vector<2x128xf32> to vector<1x2x128xf32>
          %cst_64 = arith.constant dense<0.000000e+00> : vector<1xf32>
          %117 = vector.multi_reduction <add>, %116, %cst_64 [1, 2] : vector<1x2x128xf32> to vector<1xf32>
          %118 = vector.shape_cast %117 : vector<1xf32> to vector<1x1x1xf32>
          %119 = vector.extract %118[0, 0, 0] : f32 from vector<1x1x1xf32>
          %cst_65 = arith.constant 3.906250e-03 : f32
          %120 = arith.mulf %119, %cst_65 : f32
          %cst_66 = arith.constant 1.000000e+00 : f32
          %121 = arith.subf %cst_66, %22 : f32
          %122 = arith.mulf %121, %120 : f32
          %123 = vector.broadcast %122 : f32 to vector<2x128xf32>
          %124 = vector.broadcast %22 : f32 to vector<2x128xf32>
          %125 = arith.mulf %124, %101 : vector<2x128xf32>
          %126 = arith.addf %125, %123 : vector<2x128xf32>
          %cst_67 = arith.constant 0.000000e+00 : f32
          %cst_68 = arith.constant 1.000000e+00 : f32
          %127 = vector.broadcast %cst_67 : f32 to vector<2x128xf32>
          %128 = arith.maximumf %127, %126 : vector<2x128xf32>
          %129 = vector.broadcast %cst_68 : f32 to vector<2x128xf32>
          %130 = arith.minimumf %129, %128 : vector<2x128xf32>
          %131 = arith.index_cast %3 : i32 to index
          %c0_69 = arith.constant 0 : index
          %c0_70 = arith.constant 0 : index
          %132 = vector.load %arg4[%131, %c0_69, %c0_70] : memref<2x6x128xf32, #tpu.memory_space<vmem>>, vector<1x2x128xf32>
          %133 = vector.shape_cast %132 : vector<1x2x128xf32> to vector<2x128xf32>
          %134 = vector.shape_cast %130 : vector<2x128xf32> to vector<1x2x128xf32>
          tpu.vector_store %arg4[%131, %c0_69, %c0_70], %134 {strides = array<i32>} : memref<2x6x128xf32, #tpu.memory_space<vmem>>, vector<1x2x128xf32>,
          %135 = vector.broadcast %22 : f32 to vector<2x128xf32>
          %136 = arith.mulf %135, %104 : vector<2x128xf32>
          %137 = arith.addf %136, %123 : vector<2x128xf32>
          %cst_71 = arith.constant 0.000000e+00 : f32
          %cst_72 = arith.constant 1.000000e+00 : f32
          %138 = vector.broadcast %cst_71 : f32 to vector<2x128xf32>
          %139 = arith.maximumf %138, %137 : vector<2x128xf32>
          %140 = vector.broadcast %cst_72 : f32 to vector<2x128xf32>
          %141 = arith.minimumf %140, %139 : vector<2x128xf32>
          %142 = arith.index_cast %3 : i32 to index
          %c2_73 = arith.constant 2 : index
          %c0_74 = arith.constant 0 : index
          %143 = vector.load %arg4[%142, %c2_73, %c0_74] : memref<2x6x128xf32, #tpu.memory_space<vmem>>, vector<1x2x128xf32>
          %144 = vector.shape_cast %143 : vector<1x2x128xf32> to vector<2x128xf32>
          %145 = vector.shape_cast %141 : vector<2x128xf32> to vector<1x2x128xf32>
          tpu.vector_store %arg4[%142, %c2_73, %c0_74], %145 {strides = array<i32>} : memref<2x6x128xf32, #tpu.memory_space<vmem>>, vector<1x2x128xf32>,
          %146 = vector.broadcast %22 : f32 to vector<2x128xf32>
          %147 = arith.mulf %146, %107 : vector<2x128xf32>
          %148 = arith.addf %147, %123 : vector<2x128xf32>
          %cst_75 = arith.constant 0.000000e+00 : f32
          %cst_76 = arith.constant 1.000000e+00 : f32
          %149 = vector.broadcast %cst_75 : f32 to vector<2x128xf32>
          %150 = arith.maximumf %149, %148 : vector<2x128xf32>
          %151 = vector.broadcast %cst_76 : f32 to vector<2x128xf32>
          %152 = arith.minimumf %151, %150 : vector<2x128xf32>
          %153 = arith.index_cast %3 : i32 to index
          %c4_77 = arith.constant 4 : index
          %c0_78 = arith.constant 0 : index
          %154 = vector.load %arg4[%153, %c4_77, %c0_78] : memref<2x6x128xf32, #tpu.memory_space<vmem>>, vector<1x2x128xf32>
          %155 = vector.shape_cast %154 : vector<1x2x128xf32> to vector<2x128xf32>
          %156 = vector.shape_cast %152 : vector<2x128xf32> to vector<1x2x128xf32>
          tpu.vector_store %arg4[%153, %c4_77, %c0_78], %156 {strides = array<i32>} : memref<2x6x128xf32, #tpu.memory_space<vmem>>, vector<1x2x128xf32>,
        } else {
        }
        %c2_i32_33 = arith.constant 2 : i32
        %59 = arith.cmpi eq, %52, %c2_i32_33 : i32
        %60 = arith.extui %59 : i1 to i32
        %c0_i32_34 = arith.constant 0 : i32
        %61 = arith.cmpi ne, %60, %c0_i32_34 : i32
        scf.if %61 {
          %99 = arith.index_cast %3 : i32 to index
          %c0 = arith.constant 0 : index
          %c0_59 = arith.constant 0 : index
          %100 = vector.load %arg4[%99, %c0, %c0_59] : memref<2x6x128xf32, #tpu.memory_space<vmem>>, vector<1x2x128xf32>
          %101 = vector.shape_cast %100 : vector<1x2x128xf32> to vector<2x128xf32>
          %102 = arith.index_cast %3 : i32 to index
          %c2 = arith.constant 2 : index
          %c0_60 = arith.constant 0 : index
          %103 = vector.load %arg4[%102, %c2, %c0_60] : memref<2x6x128xf32, #tpu.memory_space<vmem>>, vector<1x2x128xf32>
          %104 = vector.shape_cast %103 : vector<1x2x128xf32> to vector<2x128xf32>
          %105 = arith.index_cast %3 : i32 to index
          %c4 = arith.constant 4 : index
          %c0_61 = arith.constant 0 : index
          %106 = vector.load %arg4[%105, %c4, %c0_61] : memref<2x6x128xf32, #tpu.memory_space<vmem>>, vector<1x2x128xf32>
          %107 = vector.shape_cast %106 : vector<1x2x128xf32> to vector<2x128xf32>
          %cst = arith.constant 1.000000e+00 : f32
          %108 = arith.subf %cst, %26 : f32
          %cst_62 = arith.constant 2.989000e-01 : f32
          %109 = vector.broadcast %cst_62 : f32 to vector<2x128xf32>
          %110 = arith.mulf %109, %101 : vector<2x128xf32>
          %cst_63 = arith.constant 5.870000e-01 : f32
          %111 = vector.broadcast %cst_63 : f32 to vector<2x128xf32>
          %112 = arith.mulf %111, %104 : vector<2x128xf32>
          %113 = arith.addf %110, %112 : vector<2x128xf32>
          %cst_64 = arith.constant 1.140000e-01 : f32
          %114 = vector.broadcast %cst_64 : f32 to vector<2x128xf32>
          %115 = arith.mulf %114, %107 : vector<2x128xf32>
          %116 = arith.addf %113, %115 : vector<2x128xf32>
          %117 = vector.broadcast %108 : f32 to vector<2x128xf32>
          %118 = arith.mulf %117, %116 : vector<2x128xf32>
          %119 = vector.broadcast %26 : f32 to vector<2x128xf32>
          %120 = arith.mulf %119, %101 : vector<2x128xf32>
          %121 = arith.addf %120, %118 : vector<2x128xf32>
          %cst_65 = arith.constant 0.000000e+00 : f32
          %cst_66 = arith.constant 1.000000e+00 : f32
          %122 = vector.broadcast %cst_65 : f32 to vector<2x128xf32>
          %123 = arith.maximumf %122, %121 : vector<2x128xf32>
          %124 = vector.broadcast %cst_66 : f32 to vector<2x128xf32>
          %125 = arith.minimumf %124, %123 : vector<2x128xf32>
          %126 = arith.index_cast %3 : i32 to index
          %c0_67 = arith.constant 0 : index
          %c0_68 = arith.constant 0 : index
          %127 = vector.load %arg4[%126, %c0_67, %c0_68] : memref<2x6x128xf32, #tpu.memory_space<vmem>>, vector<1x2x128xf32>
          %128 = vector.shape_cast %127 : vector<1x2x128xf32> to vector<2x128xf32>
          %129 = vector.shape_cast %125 : vector<2x128xf32> to vector<1x2x128xf32>
          tpu.vector_store %arg4[%126, %c0_67, %c0_68], %129 {strides = array<i32>} : memref<2x6x128xf32, #tpu.memory_space<vmem>>, vector<1x2x128xf32>,
          %130 = vector.broadcast %26 : f32 to vector<2x128xf32>
          %131 = arith.mulf %130, %104 : vector<2x128xf32>
          %132 = arith.addf %131, %118 : vector<2x128xf32>
          %cst_69 = arith.constant 0.000000e+00 : f32
          %cst_70 = arith.constant 1.000000e+00 : f32
          %133 = vector.broadcast %cst_69 : f32 to vector<2x128xf32>
          %134 = arith.maximumf %133, %132 : vector<2x128xf32>
          %135 = vector.broadcast %cst_70 : f32 to vector<2x128xf32>
          %136 = arith.minimumf %135, %134 : vector<2x128xf32>
          %137 = arith.index_cast %3 : i32 to index
          %c2_71 = arith.constant 2 : index
          %c0_72 = arith.constant 0 : index
          %138 = vector.load %arg4[%137, %c2_71, %c0_72] : memref<2x6x128xf32, #tpu.memory_space<vmem>>, vector<1x2x128xf32>
          %139 = vector.shape_cast %138 : vector<1x2x128xf32> to vector<2x128xf32>
          %140 = vector.shape_cast %136 : vector<2x128xf32> to vector<1x2x128xf32>
          tpu.vector_store %arg4[%137, %c2_71, %c0_72], %140 {strides = array<i32>} : memref<2x6x128xf32, #tpu.memory_space<vmem>>, vector<1x2x128xf32>,
          %141 = vector.broadcast %26 : f32 to vector<2x128xf32>
          %142 = arith.mulf %141, %107 : vector<2x128xf32>
          %143 = arith.addf %142, %118 : vector<2x128xf32>
          %cst_73 = arith.constant 0.000000e+00 : f32
          %cst_74 = arith.constant 1.000000e+00 : f32
          %144 = vector.broadcast %cst_73 : f32 to vector<2x128xf32>
          %145 = arith.maximumf %144, %143 : vector<2x128xf32>
          %146 = vector.broadcast %cst_74 : f32 to vector<2x128xf32>
          %147 = arith.minimumf %146, %145 : vector<2x128xf32>
          %148 = arith.index_cast %3 : i32 to index
          %c4_75 = arith.constant 4 : index
          %c0_76 = arith.constant 0 : index
          %149 = vector.load %arg4[%148, %c4_75, %c0_76] : memref<2x6x128xf32, #tpu.memory_space<vmem>>, vector<1x2x128xf32>
          %150 = vector.shape_cast %149 : vector<1x2x128xf32> to vector<2x128xf32>
          %151 = vector.shape_cast %147 : vector<2x128xf32> to vector<1x2x128xf32>
          tpu.vector_store %arg4[%148, %c4_75, %c0_76], %151 {strides = array<i32>} : memref<2x6x128xf32, #tpu.memory_space<vmem>>, vector<1x2x128xf32>,
        } else {
        }
        %c3_i32_35 = arith.constant 3 : i32
        %62 = arith.cmpi eq, %52, %c3_i32_35 : i32
        %63 = arith.extui %62 : i1 to i32
        %c0_i32_36 = arith.constant 0 : i32
        %64 = arith.cmpi ne, %63, %c0_i32_36 : i32
        scf.if %64 {
          %99 = arith.index_cast %3 : i32 to index
          %c0 = arith.constant 0 : index
          %c0_59 = arith.constant 0 : index
          %100 = vector.load %arg4[%99, %c0, %c0_59] : memref<2x6x128xf32, #tpu.memory_space<vmem>>, vector<1x2x128xf32>
          %101 = vector.shape_cast %100 : vector<1x2x128xf32> to vector<2x128xf32>
          %102 = arith.index_cast %3 : i32 to index
          %c2 = arith.constant 2 : index
          %c0_60 = arith.constant 0 : index
          %103 = vector.load %arg4[%102, %c2, %c0_60] : memref<2x6x128xf32, #tpu.memory_space<vmem>>, vector<1x2x128xf32>
          %104 = vector.shape_cast %103 : vector<1x2x128xf32> to vector<2x128xf32>
          %105 = arith.index_cast %3 : i32 to index
          %c4 = arith.constant 4 : index
          %c0_61 = arith.constant 0 : index
          %106 = vector.load %arg4[%105, %c4, %c0_61] : memref<2x6x128xf32, #tpu.memory_space<vmem>>, vector<1x2x128xf32>
          %107 = vector.shape_cast %106 : vector<1x2x128xf32> to vector<2x128xf32>
          %108 = arith.maximumf %101, %104 : vector<2x128xf32>
          %109 = arith.maximumf %108, %107 : vector<2x128xf32>
          %110 = arith.minimumf %101, %104 : vector<2x128xf32>
          %111 = arith.minimumf %110, %107 : vector<2x128xf32>
          %112 = arith.cmpf oeq, %109, %111 : vector<2x128xf32>
          %113 = arith.subf %109, %111 : vector<2x128xf32>
          %cst = arith.constant 1.000000e+00 : f32
          %114 = vector.broadcast %cst : f32 to vector<2x128xf32>
          %115 = arith.select %112, %114, %109 : vector<2x128xi1>, vector<2x128xf32>
          %116 = tpu.reciprocal %115 {approx = true} : vector<2x128xf32> -> vector<2x128xf32>
          %117 = arith.select %112, %114, %113 : vector<2x128xi1>, vector<2x128xf32>
          %118 = tpu.reciprocal %117 {approx = true} : vector<2x128xf32> -> vector<2x128xf32>
          %119 = arith.mulf %113, %116 : vector<2x128xf32>
          %cst_62 = arith.constant 1.000000e+00 : f32
          %120 = vector.broadcast %cst_62 : f32 to vector<2x128xf32>
          %121 = arith.minimumf %119, %120 : vector<2x128xf32>
          %122 = arith.subf %109, %101 : vector<2x128xf32>
          %123 = arith.mulf %122, %118 : vector<2x128xf32>
          %124 = arith.subf %109, %104 : vector<2x128xf32>
          %125 = arith.mulf %124, %118 : vector<2x128xf32>
          %126 = arith.subf %109, %107 : vector<2x128xf32>
          %127 = arith.mulf %126, %118 : vector<2x128xf32>
          %128 = arith.cmpf oeq, %109, %101 : vector<2x128xf32>
          %129 = arith.subf %127, %125 : vector<2x128xf32>
          %cst_63 = arith.constant 0.000000e+00 : f32
          %130 = vector.broadcast %cst_63 : f32 to vector<2x128xf32>
          %131 = arith.select %128, %129, %130 : vector<2x128xi1>, vector<2x128xf32>
          %132 = arith.cmpf oeq, %109, %104 : vector<2x128xf32>
          %cst_64 = arith.constant dense<true> : vector<2x128xi1>
          %133 = arith.xori %128, %cst_64 : vector<2x128xi1>
          %134 = arith.andi %132, %133 : vector<2x128xi1>
          %cst_65 = arith.constant 2.000000e+00 : f32
          %135 = vector.broadcast %cst_65 : f32 to vector<2x128xf32>
          %136 = arith.addf %135, %123 : vector<2x128xf32>
          %137 = arith.subf %136, %127 : vector<2x128xf32>
          %cst_66 = arith.constant 0.000000e+00 : f32
          %138 = vector.broadcast %cst_66 : f32 to vector<2x128xf32>
          %139 = arith.select %134, %137, %138 : vector<2x128xi1>, vector<2x128xf32>
          %140 = arith.cmpf one, %109, %104 : vector<2x128xf32>
          %cst_67 = arith.constant dense<true> : vector<2x128xi1>
          %141 = arith.xori %128, %cst_67 : vector<2x128xi1>
          %142 = arith.andi %140, %141 : vector<2x128xi1>
          %cst_68 = arith.constant 4.000000e+00 : f32
          %143 = vector.broadcast %cst_68 : f32 to vector<2x128xf32>
          %144 = arith.addf %143, %125 : vector<2x128xf32>
          %145 = arith.subf %144, %123 : vector<2x128xf32>
          %cst_69 = arith.constant 0.000000e+00 : f32
          %146 = vector.broadcast %cst_69 : f32 to vector<2x128xf32>
          %147 = arith.select %142, %145, %146 : vector<2x128xi1>, vector<2x128xf32>
          %148 = arith.addf %131, %139 : vector<2x128xf32>
          %149 = arith.addf %148, %147 : vector<2x128xf32>
          %cst_70 = arith.constant 0.166666672 : f32
          %150 = vector.broadcast %cst_70 : f32 to vector<2x128xf32>
          %151 = arith.mulf %149, %150 : vector<2x128xf32>
          %cst_71 = arith.constant 1.000000e+00 : f32
          %152 = vector.broadcast %cst_71 : f32 to vector<2x128xf32>
          %153 = arith.addf %151, %152 : vector<2x128xf32>
          %154 = math.floor %153 : vector<2x128xf32>
          %155 = arith.subf %153, %154 : vector<2x128xf32>
          %156 = vector.broadcast %30 : f32 to vector<2x128xf32>
          %157 = arith.addf %155, %156 : vector<2x128xf32>
          %158 = math.floor %157 : vector<2x128xf32>
          %159 = arith.subf %157, %158 : vector<2x128xf32>
          %cst_72 = arith.constant 6.000000e+00 : f32
          %160 = vector.broadcast %cst_72 : f32 to vector<2x128xf32>
          %161 = arith.mulf %159, %160 : vector<2x128xf32>
          %162 = math.floor %161 : vector<2x128xf32>
          %163 = arith.subf %161, %162 : vector<2x128xf32>
          %cst_73 = arith.constant 6.000000e+00 : f32
          %164 = vector.broadcast %cst_73 : f32 to vector<2x128xf32>
          %165 = arith.cmpf oge, %162, %164 : vector<2x128xf32>
          %cst_74 = arith.constant 6.000000e+00 : f32
          %166 = vector.broadcast %cst_74 : f32 to vector<2x128xf32>
          %167 = arith.subf %162, %166 : vector<2x128xf32>
          %168 = arith.select %165, %167, %162 : vector<2x128xi1>, vector<2x128xf32>
          %cst_75 = arith.constant 1.000000e+00 : f32
          %169 = vector.broadcast %cst_75 : f32 to vector<2x128xf32>
          %170 = arith.subf %169, %121 : vector<2x128xf32>
          %171 = arith.mulf %109, %170 : vector<2x128xf32>
          %172 = arith.mulf %121, %163 : vector<2x128xf32>
          %cst_76 = arith.constant 1.000000e+00 : f32
          %173 = vector.broadcast %cst_76 : f32 to vector<2x128xf32>
          %174 = arith.subf %173, %172 : vector<2x128xf32>
          %175 = arith.mulf %109, %174 : vector<2x128xf32>
          %cst_77 = arith.constant 1.000000e+00 : f32
          %176 = vector.broadcast %cst_77 : f32 to vector<2x128xf32>
          %177 = arith.subf %176, %163 : vector<2x128xf32>
          %178 = arith.mulf %121, %177 : vector<2x128xf32>
          %cst_78 = arith.constant 1.000000e+00 : f32
          %179 = vector.broadcast %cst_78 : f32 to vector<2x128xf32>
          %180 = arith.subf %179, %178 : vector<2x128xf32>
          %181 = arith.mulf %109, %180 : vector<2x128xf32>
          %cst_79 = arith.constant 0.000000e+00 : f32
          %182 = vector.broadcast %cst_79 : f32 to vector<2x128xf32>
          %183 = arith.cmpf oeq, %168, %182 : vector<2x128xf32>
          %cst_80 = arith.constant 1.000000e+00 : f32
          %184 = vector.broadcast %cst_80 : f32 to vector<2x128xf32>
          %185 = arith.cmpf oeq, %168, %184 : vector<2x128xf32>
          %cst_81 = arith.constant 2.000000e+00 : f32
          %186 = vector.broadcast %cst_81 : f32 to vector<2x128xf32>
          %187 = arith.cmpf oeq, %168, %186 : vector<2x128xf32>
          %cst_82 = arith.constant 3.000000e+00 : f32
          %188 = vector.broadcast %cst_82 : f32 to vector<2x128xf32>
          %189 = arith.cmpf oeq, %168, %188 : vector<2x128xf32>
          %cst_83 = arith.constant 4.000000e+00 : f32
          %190 = vector.broadcast %cst_83 : f32 to vector<2x128xf32>
          %191 = arith.cmpf oeq, %168, %190 : vector<2x128xf32>
          %192 = arith.select %191, %181, %109 : vector<2x128xi1>, vector<2x128xf32>
          %193 = arith.select %189, %171, %192 : vector<2x128xi1>, vector<2x128xf32>
          %194 = arith.select %187, %171, %193 : vector<2x128xi1>, vector<2x128xf32>
          %195 = arith.select %185, %175, %194 : vector<2x128xi1>, vector<2x128xf32>
          %196 = arith.select %183, %109, %195 : vector<2x128xi1>, vector<2x128xf32>
          %197 = arith.select %191, %171, %171 : vector<2x128xi1>, vector<2x128xf32>
          %198 = arith.select %189, %175, %197 : vector<2x128xi1>, vector<2x128xf32>
          %199 = arith.select %187, %109, %198 : vector<2x128xi1>, vector<2x128xf32>
          %200 = arith.select %185, %109, %199 : vector<2x128xi1>, vector<2x128xf32>
          %201 = arith.select %183, %181, %200 : vector<2x128xi1>, vector<2x128xf32>
          %202 = arith.select %191, %109, %175 : vector<2x128xi1>, vector<2x128xf32>
          %203 = arith.select %189, %109, %202 : vector<2x128xi1>, vector<2x128xf32>
          %204 = arith.select %187, %181, %203 : vector<2x128xi1>, vector<2x128xf32>
          %205 = arith.select %185, %171, %204 : vector<2x128xi1>, vector<2x128xf32>
          %206 = arith.select %183, %171, %205 : vector<2x128xi1>, vector<2x128xf32>
          %207 = arith.index_cast %3 : i32 to index
          %c0_84 = arith.constant 0 : index
          %c0_85 = arith.constant 0 : index
          %208 = vector.load %arg4[%207, %c0_84, %c0_85] : memref<2x6x128xf32, #tpu.memory_space<vmem>>, vector<1x2x128xf32>
          %209 = vector.shape_cast %208 : vector<1x2x128xf32> to vector<2x128xf32>
          %210 = vector.shape_cast %196 : vector<2x128xf32> to vector<1x2x128xf32>
          tpu.vector_store %arg4[%207, %c0_84, %c0_85], %210 {strides = array<i32>} : memref<2x6x128xf32, #tpu.memory_space<vmem>>, vector<1x2x128xf32>,
          %211 = arith.index_cast %3 : i32 to index
          %c2_86 = arith.constant 2 : index
          %c0_87 = arith.constant 0 : index
          %212 = vector.load %arg4[%211, %c2_86, %c0_87] : memref<2x6x128xf32, #tpu.memory_space<vmem>>, vector<1x2x128xf32>
          %213 = vector.shape_cast %212 : vector<1x2x128xf32> to vector<2x128xf32>
          %214 = vector.shape_cast %201 : vector<2x128xf32> to vector<1x2x128xf32>
          tpu.vector_store %arg4[%211, %c2_86, %c0_87], %214 {strides = array<i32>} : memref<2x6x128xf32, #tpu.memory_space<vmem>>, vector<1x2x128xf32>,
          %215 = arith.index_cast %3 : i32 to index
          %c4_88 = arith.constant 4 : index
          %c0_89 = arith.constant 0 : index
          %216 = vector.load %arg4[%215, %c4_88, %c0_89] : memref<2x6x128xf32, #tpu.memory_space<vmem>>, vector<1x2x128xf32>
          %217 = vector.shape_cast %216 : vector<1x2x128xf32> to vector<2x128xf32>
          %218 = vector.shape_cast %206 : vector<2x128xf32> to vector<1x2x128xf32>
          tpu.vector_store %arg4[%215, %c4_88, %c0_89], %218 {strides = array<i32>} : memref<2x6x128xf32, #tpu.memory_space<vmem>>, vector<1x2x128xf32>,
        } else {
        }
        %c5_i32_37 = arith.constant 5 : i32
        %65 = arith.muli %4, %c5_i32_37 : i32
        %c1_i32_38 = arith.constant 1 : i32
        %66 = arith.addi %65, %c1_i32_38 : i32
        %c2_i32_39 = arith.constant 2 : i32
        %67 = arith.addi %66, %c2_i32_39 : i32
        %68 = arith.index_cast %67 : i32 to index
        %69 = memref.load %arg2[%68] : memref<10xi32, #tpu.memory_space<smem>>
        %c0_i32_40 = arith.constant 0 : i32
        %70 = arith.cmpi eq, %69, %c0_i32_40 : i32
        %71 = arith.extui %70 : i1 to i32
        %c0_i32_41 = arith.constant 0 : i32
        %72 = arith.cmpi ne, %71, %c0_i32_41 : i32
        scf.if %72 {
          %99 = arith.index_cast %3 : i32 to index
          %c0 = arith.constant 0 : index
          %c0_59 = arith.constant 0 : index
          %100 = vector.load %arg4[%99, %c0, %c0_59] : memref<2x6x128xf32, #tpu.memory_space<vmem>>, vector<1x6x128xf32>
          %101 = vector.shape_cast %100 : vector<1x6x128xf32> to vector<6x128xf32>
          %102 = vector.broadcast %18 : f32 to vector<6x128xf32>
          %103 = arith.mulf %101, %102 : vector<6x128xf32>
          %cst = arith.constant 0.000000e+00 : f32
          %cst_60 = arith.constant 1.000000e+00 : f32
          %104 = vector.broadcast %cst : f32 to vector<6x128xf32>
          %105 = arith.maximumf %104, %103 : vector<6x128xf32>
          %106 = vector.broadcast %cst_60 : f32 to vector<6x128xf32>
          %107 = arith.minimumf %106, %105 : vector<6x128xf32>
          %108 = arith.index_cast %3 : i32 to index
          %c0_61 = arith.constant 0 : index
          %c0_62 = arith.constant 0 : index
          %109 = vector.load %arg4[%108, %c0_61, %c0_62] : memref<2x6x128xf32, #tpu.memory_space<vmem>>, vector<1x6x128xf32>
          %110 = vector.shape_cast %109 : vector<1x6x128xf32> to vector<6x128xf32>
          %111 = vector.shape_cast %107 : vector<6x128xf32> to vector<1x6x128xf32>
          tpu.vector_store %arg4[%108, %c0_61, %c0_62], %111 {strides = array<i32>} : memref<2x6x128xf32, #tpu.memory_space<vmem>>, vector<1x6x128xf32>,
        } else {
        }
        %c1_i32_42 = arith.constant 1 : i32
        %73 = arith.cmpi eq, %69, %c1_i32_42 : i32
        %74 = arith.extui %73 : i1 to i32
        %c0_i32_43 = arith.constant 0 : i32
        %75 = arith.cmpi ne, %74, %c0_i32_43 : i32
        scf.if %75 {
          %99 = arith.index_cast %3 : i32 to index
          %c0 = arith.constant 0 : index
          %c0_59 = arith.constant 0 : index
          %100 = vector.load %arg4[%99, %c0, %c0_59] : memref<2x6x128xf32, #tpu.memory_space<vmem>>, vector<1x2x128xf32>
          %101 = vector.shape_cast %100 : vector<1x2x128xf32> to vector<2x128xf32>
          %102 = arith.index_cast %3 : i32 to index
          %c2 = arith.constant 2 : index
          %c0_60 = arith.constant 0 : index
          %103 = vector.load %arg4[%102, %c2, %c0_60] : memref<2x6x128xf32, #tpu.memory_space<vmem>>, vector<1x2x128xf32>
          %104 = vector.shape_cast %103 : vector<1x2x128xf32> to vector<2x128xf32>
          %105 = arith.index_cast %3 : i32 to index
          %c4 = arith.constant 4 : index
          %c0_61 = arith.constant 0 : index
          %106 = vector.load %arg4[%105, %c4, %c0_61] : memref<2x6x128xf32, #tpu.memory_space<vmem>>, vector<1x2x128xf32>
          %107 = vector.shape_cast %106 : vector<1x2x128xf32> to vector<2x128xf32>
          %cst = arith.constant 2.989000e-01 : f32
          %108 = vector.broadcast %cst : f32 to vector<2x128xf32>
          %109 = arith.mulf %108, %101 : vector<2x128xf32>
          %cst_62 = arith.constant 5.870000e-01 : f32
          %110 = vector.broadcast %cst_62 : f32 to vector<2x128xf32>
          %111 = arith.mulf %110, %104 : vector<2x128xf32>
          %112 = arith.addf %109, %111 : vector<2x128xf32>
          %cst_63 = arith.constant 1.140000e-01 : f32
          %113 = vector.broadcast %cst_63 : f32 to vector<2x128xf32>
          %114 = arith.mulf %113, %107 : vector<2x128xf32>
          %115 = arith.addf %112, %114 : vector<2x128xf32>
          %116 = vector.shape_cast %115 : vector<2x128xf32> to vector<1x2x128xf32>
          %cst_64 = arith.constant dense<0.000000e+00> : vector<1xf32>
          %117 = vector.multi_reduction <add>, %116, %cst_64 [1, 2] : vector<1x2x128xf32> to vector<1xf32>
          %118 = vector.shape_cast %117 : vector<1xf32> to vector<1x1x1xf32>
          %119 = vector.extract %118[0, 0, 0] : f32 from vector<1x1x1xf32>
          %cst_65 = arith.constant 3.906250e-03 : f32
          %120 = arith.mulf %119, %cst_65 : f32
          %cst_66 = arith.constant 1.000000e+00 : f32
          %121 = arith.subf %cst_66, %22 : f32
          %122 = arith.mulf %121, %120 : f32
          %123 = vector.broadcast %122 : f32 to vector<2x128xf32>
          %124 = vector.broadcast %22 : f32 to vector<2x128xf32>
          %125 = arith.mulf %124, %101 : vector<2x128xf32>
          %126 = arith.addf %125, %123 : vector<2x128xf32>
          %cst_67 = arith.constant 0.000000e+00 : f32
          %cst_68 = arith.constant 1.000000e+00 : f32
          %127 = vector.broadcast %cst_67 : f32 to vector<2x128xf32>
          %128 = arith.maximumf %127, %126 : vector<2x128xf32>
          %129 = vector.broadcast %cst_68 : f32 to vector<2x128xf32>
          %130 = arith.minimumf %129, %128 : vector<2x128xf32>
          %131 = arith.index_cast %3 : i32 to index
          %c0_69 = arith.constant 0 : index
          %c0_70 = arith.constant 0 : index
          %132 = vector.load %arg4[%131, %c0_69, %c0_70] : memref<2x6x128xf32, #tpu.memory_space<vmem>>, vector<1x2x128xf32>
          %133 = vector.shape_cast %132 : vector<1x2x128xf32> to vector<2x128xf32>
          %134 = vector.shape_cast %130 : vector<2x128xf32> to vector<1x2x128xf32>
          tpu.vector_store %arg4[%131, %c0_69, %c0_70], %134 {strides = array<i32>} : memref<2x6x128xf32, #tpu.memory_space<vmem>>, vector<1x2x128xf32>,
          %135 = vector.broadcast %22 : f32 to vector<2x128xf32>
          %136 = arith.mulf %135, %104 : vector<2x128xf32>
          %137 = arith.addf %136, %123 : vector<2x128xf32>
          %cst_71 = arith.constant 0.000000e+00 : f32
          %cst_72 = arith.constant 1.000000e+00 : f32
          %138 = vector.broadcast %cst_71 : f32 to vector<2x128xf32>
          %139 = arith.maximumf %138, %137 : vector<2x128xf32>
          %140 = vector.broadcast %cst_72 : f32 to vector<2x128xf32>
          %141 = arith.minimumf %140, %139 : vector<2x128xf32>
          %142 = arith.index_cast %3 : i32 to index
          %c2_73 = arith.constant 2 : index
          %c0_74 = arith.constant 0 : index
          %143 = vector.load %arg4[%142, %c2_73, %c0_74] : memref<2x6x128xf32, #tpu.memory_space<vmem>>, vector<1x2x128xf32>
          %144 = vector.shape_cast %143 : vector<1x2x128xf32> to vector<2x128xf32>
          %145 = vector.shape_cast %141 : vector<2x128xf32> to vector<1x2x128xf32>
          tpu.vector_store %arg4[%142, %c2_73, %c0_74], %145 {strides = array<i32>} : memref<2x6x128xf32, #tpu.memory_space<vmem>>, vector<1x2x128xf32>,
          %146 = vector.broadcast %22 : f32 to vector<2x128xf32>
          %147 = arith.mulf %146, %107 : vector<2x128xf32>
          %148 = arith.addf %147, %123 : vector<2x128xf32>
          %cst_75 = arith.constant 0.000000e+00 : f32
          %cst_76 = arith.constant 1.000000e+00 : f32
          %149 = vector.broadcast %cst_75 : f32 to vector<2x128xf32>
          %150 = arith.maximumf %149, %148 : vector<2x128xf32>
          %151 = vector.broadcast %cst_76 : f32 to vector<2x128xf32>
          %152 = arith.minimumf %151, %150 : vector<2x128xf32>
          %153 = arith.index_cast %3 : i32 to index
          %c4_77 = arith.constant 4 : index
          %c0_78 = arith.constant 0 : index
          %154 = vector.load %arg4[%153, %c4_77, %c0_78] : memref<2x6x128xf32, #tpu.memory_space<vmem>>, vector<1x2x128xf32>
          %155 = vector.shape_cast %154 : vector<1x2x128xf32> to vector<2x128xf32>
          %156 = vector.shape_cast %152 : vector<2x128xf32> to vector<1x2x128xf32>
          tpu.vector_store %arg4[%153, %c4_77, %c0_78], %156 {strides = array<i32>} : memref<2x6x128xf32, #tpu.memory_space<vmem>>, vector<1x2x128xf32>,
        } else {
        }
        %c2_i32_44 = arith.constant 2 : i32
        %76 = arith.cmpi eq, %69, %c2_i32_44 : i32
        %77 = arith.extui %76 : i1 to i32
        %c0_i32_45 = arith.constant 0 : i32
        %78 = arith.cmpi ne, %77, %c0_i32_45 : i32
        scf.if %78 {
          %99 = arith.index_cast %3 : i32 to index
          %c0 = arith.constant 0 : index
          %c0_59 = arith.constant 0 : index
          %100 = vector.load %arg4[%99, %c0, %c0_59] : memref<2x6x128xf32, #tpu.memory_space<vmem>>, vector<1x2x128xf32>
          %101 = vector.shape_cast %100 : vector<1x2x128xf32> to vector<2x128xf32>
          %102 = arith.index_cast %3 : i32 to index
          %c2 = arith.constant 2 : index
          %c0_60 = arith.constant 0 : index
          %103 = vector.load %arg4[%102, %c2, %c0_60] : memref<2x6x128xf32, #tpu.memory_space<vmem>>, vector<1x2x128xf32>
          %104 = vector.shape_cast %103 : vector<1x2x128xf32> to vector<2x128xf32>
          %105 = arith.index_cast %3 : i32 to index
          %c4 = arith.constant 4 : index
          %c0_61 = arith.constant 0 : index
          %106 = vector.load %arg4[%105, %c4, %c0_61] : memref<2x6x128xf32, #tpu.memory_space<vmem>>, vector<1x2x128xf32>
          %107 = vector.shape_cast %106 : vector<1x2x128xf32> to vector<2x128xf32>
          %cst = arith.constant 1.000000e+00 : f32
          %108 = arith.subf %cst, %26 : f32
          %cst_62 = arith.constant 2.989000e-01 : f32
          %109 = vector.broadcast %cst_62 : f32 to vector<2x128xf32>
          %110 = arith.mulf %109, %101 : vector<2x128xf32>
          %cst_63 = arith.constant 5.870000e-01 : f32
          %111 = vector.broadcast %cst_63 : f32 to vector<2x128xf32>
          %112 = arith.mulf %111, %104 : vector<2x128xf32>
          %113 = arith.addf %110, %112 : vector<2x128xf32>
          %cst_64 = arith.constant 1.140000e-01 : f32
          %114 = vector.broadcast %cst_64 : f32 to vector<2x128xf32>
          %115 = arith.mulf %114, %107 : vector<2x128xf32>
          %116 = arith.addf %113, %115 : vector<2x128xf32>
          %117 = vector.broadcast %108 : f32 to vector<2x128xf32>
          %118 = arith.mulf %117, %116 : vector<2x128xf32>
          %119 = vector.broadcast %26 : f32 to vector<2x128xf32>
          %120 = arith.mulf %119, %101 : vector<2x128xf32>
          %121 = arith.addf %120, %118 : vector<2x128xf32>
          %cst_65 = arith.constant 0.000000e+00 : f32
          %cst_66 = arith.constant 1.000000e+00 : f32
          %122 = vector.broadcast %cst_65 : f32 to vector<2x128xf32>
          %123 = arith.maximumf %122, %121 : vector<2x128xf32>
          %124 = vector.broadcast %cst_66 : f32 to vector<2x128xf32>
          %125 = arith.minimumf %124, %123 : vector<2x128xf32>
          %126 = arith.index_cast %3 : i32 to index
          %c0_67 = arith.constant 0 : index
          %c0_68 = arith.constant 0 : index
          %127 = vector.load %arg4[%126, %c0_67, %c0_68] : memref<2x6x128xf32, #tpu.memory_space<vmem>>, vector<1x2x128xf32>
          %128 = vector.shape_cast %127 : vector<1x2x128xf32> to vector<2x128xf32>
          %129 = vector.shape_cast %125 : vector<2x128xf32> to vector<1x2x128xf32>
          tpu.vector_store %arg4[%126, %c0_67, %c0_68], %129 {strides = array<i32>} : memref<2x6x128xf32, #tpu.memory_space<vmem>>, vector<1x2x128xf32>,
          %130 = vector.broadcast %26 : f32 to vector<2x128xf32>
          %131 = arith.mulf %130, %104 : vector<2x128xf32>
          %132 = arith.addf %131, %118 : vector<2x128xf32>
          %cst_69 = arith.constant 0.000000e+00 : f32
          %cst_70 = arith.constant 1.000000e+00 : f32
          %133 = vector.broadcast %cst_69 : f32 to vector<2x128xf32>
          %134 = arith.maximumf %133, %132 : vector<2x128xf32>
          %135 = vector.broadcast %cst_70 : f32 to vector<2x128xf32>
          %136 = arith.minimumf %135, %134 : vector<2x128xf32>
          %137 = arith.index_cast %3 : i32 to index
          %c2_71 = arith.constant 2 : index
          %c0_72 = arith.constant 0 : index
          %138 = vector.load %arg4[%137, %c2_71, %c0_72] : memref<2x6x128xf32, #tpu.memory_space<vmem>>, vector<1x2x128xf32>
          %139 = vector.shape_cast %138 : vector<1x2x128xf32> to vector<2x128xf32>
          %140 = vector.shape_cast %136 : vector<2x128xf32> to vector<1x2x128xf32>
          tpu.vector_store %arg4[%137, %c2_71, %c0_72], %140 {strides = array<i32>} : memref<2x6x128xf32, #tpu.memory_space<vmem>>, vector<1x2x128xf32>,
          %141 = vector.broadcast %26 : f32 to vector<2x128xf32>
          %142 = arith.mulf %141, %107 : vector<2x128xf32>
          %143 = arith.addf %142, %118 : vector<2x128xf32>
          %cst_73 = arith.constant 0.000000e+00 : f32
          %cst_74 = arith.constant 1.000000e+00 : f32
          %144 = vector.broadcast %cst_73 : f32 to vector<2x128xf32>
          %145 = arith.maximumf %144, %143 : vector<2x128xf32>
          %146 = vector.broadcast %cst_74 : f32 to vector<2x128xf32>
          %147 = arith.minimumf %146, %145 : vector<2x128xf32>
          %148 = arith.index_cast %3 : i32 to index
          %c4_75 = arith.constant 4 : index
          %c0_76 = arith.constant 0 : index
          %149 = vector.load %arg4[%148, %c4_75, %c0_76] : memref<2x6x128xf32, #tpu.memory_space<vmem>>, vector<1x2x128xf32>
          %150 = vector.shape_cast %149 : vector<1x2x128xf32> to vector<2x128xf32>
          %151 = vector.shape_cast %147 : vector<2x128xf32> to vector<1x2x128xf32>
          tpu.vector_store %arg4[%148, %c4_75, %c0_76], %151 {strides = array<i32>} : memref<2x6x128xf32, #tpu.memory_space<vmem>>, vector<1x2x128xf32>,
        } else {
        }
        %c3_i32_46 = arith.constant 3 : i32
        %79 = arith.cmpi eq, %69, %c3_i32_46 : i32
        %80 = arith.extui %79 : i1 to i32
        %c0_i32_47 = arith.constant 0 : i32
        %81 = arith.cmpi ne, %80, %c0_i32_47 : i32
        scf.if %81 {
          %99 = arith.index_cast %3 : i32 to index
          %c0 = arith.constant 0 : index
          %c0_59 = arith.constant 0 : index
          %100 = vector.load %arg4[%99, %c0, %c0_59] : memref<2x6x128xf32, #tpu.memory_space<vmem>>, vector<1x2x128xf32>
          %101 = vector.shape_cast %100 : vector<1x2x128xf32> to vector<2x128xf32>
          %102 = arith.index_cast %3 : i32 to index
          %c2 = arith.constant 2 : index
          %c0_60 = arith.constant 0 : index
          %103 = vector.load %arg4[%102, %c2, %c0_60] : memref<2x6x128xf32, #tpu.memory_space<vmem>>, vector<1x2x128xf32>
          %104 = vector.shape_cast %103 : vector<1x2x128xf32> to vector<2x128xf32>
          %105 = arith.index_cast %3 : i32 to index
          %c4 = arith.constant 4 : index
          %c0_61 = arith.constant 0 : index
          %106 = vector.load %arg4[%105, %c4, %c0_61] : memref<2x6x128xf32, #tpu.memory_space<vmem>>, vector<1x2x128xf32>
          %107 = vector.shape_cast %106 : vector<1x2x128xf32> to vector<2x128xf32>
          %108 = arith.maximumf %101, %104 : vector<2x128xf32>
          %109 = arith.maximumf %108, %107 : vector<2x128xf32>
          %110 = arith.minimumf %101, %104 : vector<2x128xf32>
          %111 = arith.minimumf %110, %107 : vector<2x128xf32>
          %112 = arith.cmpf oeq, %109, %111 : vector<2x128xf32>
          %113 = arith.subf %109, %111 : vector<2x128xf32>
          %cst = arith.constant 1.000000e+00 : f32
          %114 = vector.broadcast %cst : f32 to vector<2x128xf32>
          %115 = arith.select %112, %114, %109 : vector<2x128xi1>, vector<2x128xf32>
          %116 = tpu.reciprocal %115 {approx = true} : vector<2x128xf32> -> vector<2x128xf32>
          %117 = arith.select %112, %114, %113 : vector<2x128xi1>, vector<2x128xf32>
          %118 = tpu.reciprocal %117 {approx = true} : vector<2x128xf32> -> vector<2x128xf32>
          %119 = arith.mulf %113, %116 : vector<2x128xf32>
          %cst_62 = arith.constant 1.000000e+00 : f32
          %120 = vector.broadcast %cst_62 : f32 to vector<2x128xf32>
          %121 = arith.minimumf %119, %120 : vector<2x128xf32>
          %122 = arith.subf %109, %101 : vector<2x128xf32>
          %123 = arith.mulf %122, %118 : vector<2x128xf32>
          %124 = arith.subf %109, %104 : vector<2x128xf32>
          %125 = arith.mulf %124, %118 : vector<2x128xf32>
          %126 = arith.subf %109, %107 : vector<2x128xf32>
          %127 = arith.mulf %126, %118 : vector<2x128xf32>
          %128 = arith.cmpf oeq, %109, %101 : vector<2x128xf32>
          %129 = arith.subf %127, %125 : vector<2x128xf32>
          %cst_63 = arith.constant 0.000000e+00 : f32
          %130 = vector.broadcast %cst_63 : f32 to vector<2x128xf32>
          %131 = arith.select %128, %129, %130 : vector<2x128xi1>, vector<2x128xf32>
          %132 = arith.cmpf oeq, %109, %104 : vector<2x128xf32>
          %cst_64 = arith.constant dense<true> : vector<2x128xi1>
          %133 = arith.xori %128, %cst_64 : vector<2x128xi1>
          %134 = arith.andi %132, %133 : vector<2x128xi1>
          %cst_65 = arith.constant 2.000000e+00 : f32
          %135 = vector.broadcast %cst_65 : f32 to vector<2x128xf32>
          %136 = arith.addf %135, %123 : vector<2x128xf32>
          %137 = arith.subf %136, %127 : vector<2x128xf32>
          %cst_66 = arith.constant 0.000000e+00 : f32
          %138 = vector.broadcast %cst_66 : f32 to vector<2x128xf32>
          %139 = arith.select %134, %137, %138 : vector<2x128xi1>, vector<2x128xf32>
          %140 = arith.cmpf one, %109, %104 : vector<2x128xf32>
          %cst_67 = arith.constant dense<true> : vector<2x128xi1>
          %141 = arith.xori %128, %cst_67 : vector<2x128xi1>
          %142 = arith.andi %140, %141 : vector<2x128xi1>
          %cst_68 = arith.constant 4.000000e+00 : f32
          %143 = vector.broadcast %cst_68 : f32 to vector<2x128xf32>
          %144 = arith.addf %143, %125 : vector<2x128xf32>
          %145 = arith.subf %144, %123 : vector<2x128xf32>
          %cst_69 = arith.constant 0.000000e+00 : f32
          %146 = vector.broadcast %cst_69 : f32 to vector<2x128xf32>
          %147 = arith.select %142, %145, %146 : vector<2x128xi1>, vector<2x128xf32>
          %148 = arith.addf %131, %139 : vector<2x128xf32>
          %149 = arith.addf %148, %147 : vector<2x128xf32>
          %cst_70 = arith.constant 0.166666672 : f32
          %150 = vector.broadcast %cst_70 : f32 to vector<2x128xf32>
          %151 = arith.mulf %149, %150 : vector<2x128xf32>
          %cst_71 = arith.constant 1.000000e+00 : f32
          %152 = vector.broadcast %cst_71 : f32 to vector<2x128xf32>
          %153 = arith.addf %151, %152 : vector<2x128xf32>
          %154 = math.floor %153 : vector<2x128xf32>
          %155 = arith.subf %153, %154 : vector<2x128xf32>
          %156 = vector.broadcast %30 : f32 to vector<2x128xf32>
          %157 = arith.addf %155, %156 : vector<2x128xf32>
          %158 = math.floor %157 : vector<2x128xf32>
          %159 = arith.subf %157, %158 : vector<2x128xf32>
          %cst_72 = arith.constant 6.000000e+00 : f32
          %160 = vector.broadcast %cst_72 : f32 to vector<2x128xf32>
          %161 = arith.mulf %159, %160 : vector<2x128xf32>
          %162 = math.floor %161 : vector<2x128xf32>
          %163 = arith.subf %161, %162 : vector<2x128xf32>
          %cst_73 = arith.constant 6.000000e+00 : f32
          %164 = vector.broadcast %cst_73 : f32 to vector<2x128xf32>
          %165 = arith.cmpf oge, %162, %164 : vector<2x128xf32>
          %cst_74 = arith.constant 6.000000e+00 : f32
          %166 = vector.broadcast %cst_74 : f32 to vector<2x128xf32>
          %167 = arith.subf %162, %166 : vector<2x128xf32>
          %168 = arith.select %165, %167, %162 : vector<2x128xi1>, vector<2x128xf32>
          %cst_75 = arith.constant 1.000000e+00 : f32
          %169 = vector.broadcast %cst_75 : f32 to vector<2x128xf32>
          %170 = arith.subf %169, %121 : vector<2x128xf32>
          %171 = arith.mulf %109, %170 : vector<2x128xf32>
          %172 = arith.mulf %121, %163 : vector<2x128xf32>
          %cst_76 = arith.constant 1.000000e+00 : f32
          %173 = vector.broadcast %cst_76 : f32 to vector<2x128xf32>
          %174 = arith.subf %173, %172 : vector<2x128xf32>
          %175 = arith.mulf %109, %174 : vector<2x128xf32>
          %cst_77 = arith.constant 1.000000e+00 : f32
          %176 = vector.broadcast %cst_77 : f32 to vector<2x128xf32>
          %177 = arith.subf %176, %163 : vector<2x128xf32>
          %178 = arith.mulf %121, %177 : vector<2x128xf32>
          %cst_78 = arith.constant 1.000000e+00 : f32
          %179 = vector.broadcast %cst_78 : f32 to vector<2x128xf32>
          %180 = arith.subf %179, %178 : vector<2x128xf32>
          %181 = arith.mulf %109, %180 : vector<2x128xf32>
          %cst_79 = arith.constant 0.000000e+00 : f32
          %182 = vector.broadcast %cst_79 : f32 to vector<2x128xf32>
          %183 = arith.cmpf oeq, %168, %182 : vector<2x128xf32>
          %cst_80 = arith.constant 1.000000e+00 : f32
          %184 = vector.broadcast %cst_80 : f32 to vector<2x128xf32>
          %185 = arith.cmpf oeq, %168, %184 : vector<2x128xf32>
          %cst_81 = arith.constant 2.000000e+00 : f32
          %186 = vector.broadcast %cst_81 : f32 to vector<2x128xf32>
          %187 = arith.cmpf oeq, %168, %186 : vector<2x128xf32>
          %cst_82 = arith.constant 3.000000e+00 : f32
          %188 = vector.broadcast %cst_82 : f32 to vector<2x128xf32>
          %189 = arith.cmpf oeq, %168, %188 : vector<2x128xf32>
          %cst_83 = arith.constant 4.000000e+00 : f32
          %190 = vector.broadcast %cst_83 : f32 to vector<2x128xf32>
          %191 = arith.cmpf oeq, %168, %190 : vector<2x128xf32>
          %192 = arith.select %191, %181, %109 : vector<2x128xi1>, vector<2x128xf32>
          %193 = arith.select %189, %171, %192 : vector<2x128xi1>, vector<2x128xf32>
          %194 = arith.select %187, %171, %193 : vector<2x128xi1>, vector<2x128xf32>
          %195 = arith.select %185, %175, %194 : vector<2x128xi1>, vector<2x128xf32>
          %196 = arith.select %183, %109, %195 : vector<2x128xi1>, vector<2x128xf32>
          %197 = arith.select %191, %171, %171 : vector<2x128xi1>, vector<2x128xf32>
          %198 = arith.select %189, %175, %197 : vector<2x128xi1>, vector<2x128xf32>
          %199 = arith.select %187, %109, %198 : vector<2x128xi1>, vector<2x128xf32>
          %200 = arith.select %185, %109, %199 : vector<2x128xi1>, vector<2x128xf32>
          %201 = arith.select %183, %181, %200 : vector<2x128xi1>, vector<2x128xf32>
          %202 = arith.select %191, %109, %175 : vector<2x128xi1>, vector<2x128xf32>
          %203 = arith.select %189, %109, %202 : vector<2x128xi1>, vector<2x128xf32>
          %204 = arith.select %187, %181, %203 : vector<2x128xi1>, vector<2x128xf32>
          %205 = arith.select %185, %171, %204 : vector<2x128xi1>, vector<2x128xf32>
          %206 = arith.select %183, %171, %205 : vector<2x128xi1>, vector<2x128xf32>
          %207 = arith.index_cast %3 : i32 to index
          %c0_84 = arith.constant 0 : index
          %c0_85 = arith.constant 0 : index
          %208 = vector.load %arg4[%207, %c0_84, %c0_85] : memref<2x6x128xf32, #tpu.memory_space<vmem>>, vector<1x2x128xf32>
          %209 = vector.shape_cast %208 : vector<1x2x128xf32> to vector<2x128xf32>
          %210 = vector.shape_cast %196 : vector<2x128xf32> to vector<1x2x128xf32>
          tpu.vector_store %arg4[%207, %c0_84, %c0_85], %210 {strides = array<i32>} : memref<2x6x128xf32, #tpu.memory_space<vmem>>, vector<1x2x128xf32>,
          %211 = arith.index_cast %3 : i32 to index
          %c2_86 = arith.constant 2 : index
          %c0_87 = arith.constant 0 : index
          %212 = vector.load %arg4[%211, %c2_86, %c0_87] : memref<2x6x128xf32, #tpu.memory_space<vmem>>, vector<1x2x128xf32>
          %213 = vector.shape_cast %212 : vector<1x2x128xf32> to vector<2x128xf32>
          %214 = vector.shape_cast %201 : vector<2x128xf32> to vector<1x2x128xf32>
          tpu.vector_store %arg4[%211, %c2_86, %c0_87], %214 {strides = array<i32>} : memref<2x6x128xf32, #tpu.memory_space<vmem>>, vector<1x2x128xf32>,
          %215 = arith.index_cast %3 : i32 to index
          %c4_88 = arith.constant 4 : index
          %c0_89 = arith.constant 0 : index
          %216 = vector.load %arg4[%215, %c4_88, %c0_89] : memref<2x6x128xf32, #tpu.memory_space<vmem>>, vector<1x2x128xf32>
          %217 = vector.shape_cast %216 : vector<1x2x128xf32> to vector<2x128xf32>
          %218 = vector.shape_cast %206 : vector<2x128xf32> to vector<1x2x128xf32>
          tpu.vector_store %arg4[%215, %c4_88, %c0_89], %218 {strides = array<i32>} : memref<2x6x128xf32, #tpu.memory_space<vmem>>, vector<1x2x128xf32>,
        } else {
        }
        %c5_i32_48 = arith.constant 5 : i32
        %82 = arith.muli %4, %c5_i32_48 : i32
        %c1_i32_49 = arith.constant 1 : i32
        %83 = arith.addi %82, %c1_i32_49 : i32
        %c3_i32_50 = arith.constant 3 : i32
        %84 = arith.addi %83, %c3_i32_50 : i32
        %85 = arith.index_cast %84 : i32 to index
        %86 = memref.load %arg2[%85] : memref<10xi32, #tpu.memory_space<smem>>
        %c0_i32_51 = arith.constant 0 : i32
        %87 = arith.cmpi eq, %86, %c0_i32_51 : i32
        %88 = arith.extui %87 : i1 to i32
        %c0_i32_52 = arith.constant 0 : i32
        %89 = arith.cmpi ne, %88, %c0_i32_52 : i32
        scf.if %89 {
          %99 = arith.index_cast %3 : i32 to index
          %c0 = arith.constant 0 : index
          %c0_59 = arith.constant 0 : index
          %100 = vector.load %arg4[%99, %c0, %c0_59] : memref<2x6x128xf32, #tpu.memory_space<vmem>>, vector<1x6x128xf32>
          %101 = vector.shape_cast %100 : vector<1x6x128xf32> to vector<6x128xf32>
          %102 = vector.broadcast %18 : f32 to vector<6x128xf32>
          %103 = arith.mulf %101, %102 : vector<6x128xf32>
          %cst = arith.constant 0.000000e+00 : f32
          %cst_60 = arith.constant 1.000000e+00 : f32
          %104 = vector.broadcast %cst : f32 to vector<6x128xf32>
          %105 = arith.maximumf %104, %103 : vector<6x128xf32>
          %106 = vector.broadcast %cst_60 : f32 to vector<6x128xf32>
          %107 = arith.minimumf %106, %105 : vector<6x128xf32>
          %108 = arith.index_cast %3 : i32 to index
          %c0_61 = arith.constant 0 : index
          %c0_62 = arith.constant 0 : index
          %109 = vector.load %arg4[%108, %c0_61, %c0_62] : memref<2x6x128xf32, #tpu.memory_space<vmem>>, vector<1x6x128xf32>
          %110 = vector.shape_cast %109 : vector<1x6x128xf32> to vector<6x128xf32>
          %111 = vector.shape_cast %107 : vector<6x128xf32> to vector<1x6x128xf32>
          tpu.vector_store %arg4[%108, %c0_61, %c0_62], %111 {strides = array<i32>} : memref<2x6x128xf32, #tpu.memory_space<vmem>>, vector<1x6x128xf32>,
        } else {
        }
        %c1_i32_53 = arith.constant 1 : i32
        %90 = arith.cmpi eq, %86, %c1_i32_53 : i32
        %91 = arith.extui %90 : i1 to i32
        %c0_i32_54 = arith.constant 0 : i32
        %92 = arith.cmpi ne, %91, %c0_i32_54 : i32
        scf.if %92 {
          %99 = arith.index_cast %3 : i32 to index
          %c0 = arith.constant 0 : index
          %c0_59 = arith.constant 0 : index
          %100 = vector.load %arg4[%99, %c0, %c0_59] : memref<2x6x128xf32, #tpu.memory_space<vmem>>, vector<1x2x128xf32>
          %101 = vector.shape_cast %100 : vector<1x2x128xf32> to vector<2x128xf32>
          %102 = arith.index_cast %3 : i32 to index
          %c2 = arith.constant 2 : index
          %c0_60 = arith.constant 0 : index
          %103 = vector.load %arg4[%102, %c2, %c0_60] : memref<2x6x128xf32, #tpu.memory_space<vmem>>, vector<1x2x128xf32>
          %104 = vector.shape_cast %103 : vector<1x2x128xf32> to vector<2x128xf32>
          %105 = arith.index_cast %3 : i32 to index
          %c4 = arith.constant 4 : index
          %c0_61 = arith.constant 0 : index
          %106 = vector.load %arg4[%105, %c4, %c0_61] : memref<2x6x128xf32, #tpu.memory_space<vmem>>, vector<1x2x128xf32>
          %107 = vector.shape_cast %106 : vector<1x2x128xf32> to vector<2x128xf32>
          %cst = arith.constant 2.989000e-01 : f32
          %108 = vector.broadcast %cst : f32 to vector<2x128xf32>
          %109 = arith.mulf %108, %101 : vector<2x128xf32>
          %cst_62 = arith.constant 5.870000e-01 : f32
          %110 = vector.broadcast %cst_62 : f32 to vector<2x128xf32>
          %111 = arith.mulf %110, %104 : vector<2x128xf32>
          %112 = arith.addf %109, %111 : vector<2x128xf32>
          %cst_63 = arith.constant 1.140000e-01 : f32
          %113 = vector.broadcast %cst_63 : f32 to vector<2x128xf32>
          %114 = arith.mulf %113, %107 : vector<2x128xf32>
          %115 = arith.addf %112, %114 : vector<2x128xf32>
          %116 = vector.shape_cast %115 : vector<2x128xf32> to vector<1x2x128xf32>
          %cst_64 = arith.constant dense<0.000000e+00> : vector<1xf32>
          %117 = vector.multi_reduction <add>, %116, %cst_64 [1, 2] : vector<1x2x128xf32> to vector<1xf32>
          %118 = vector.shape_cast %117 : vector<1xf32> to vector<1x1x1xf32>
          %119 = vector.extract %118[0, 0, 0] : f32 from vector<1x1x1xf32>
          %cst_65 = arith.constant 3.906250e-03 : f32
          %120 = arith.mulf %119, %cst_65 : f32
          %cst_66 = arith.constant 1.000000e+00 : f32
          %121 = arith.subf %cst_66, %22 : f32
          %122 = arith.mulf %121, %120 : f32
          %123 = vector.broadcast %122 : f32 to vector<2x128xf32>
          %124 = vector.broadcast %22 : f32 to vector<2x128xf32>
          %125 = arith.mulf %124, %101 : vector<2x128xf32>
          %126 = arith.addf %125, %123 : vector<2x128xf32>
          %cst_67 = arith.constant 0.000000e+00 : f32
          %cst_68 = arith.constant 1.000000e+00 : f32
          %127 = vector.broadcast %cst_67 : f32 to vector<2x128xf32>
          %128 = arith.maximumf %127, %126 : vector<2x128xf32>
          %129 = vector.broadcast %cst_68 : f32 to vector<2x128xf32>
          %130 = arith.minimumf %129, %128 : vector<2x128xf32>
          %131 = arith.index_cast %3 : i32 to index
          %c0_69 = arith.constant 0 : index
          %c0_70 = arith.constant 0 : index
          %132 = vector.load %arg4[%131, %c0_69, %c0_70] : memref<2x6x128xf32, #tpu.memory_space<vmem>>, vector<1x2x128xf32>
          %133 = vector.shape_cast %132 : vector<1x2x128xf32> to vector<2x128xf32>
          %134 = vector.shape_cast %130 : vector<2x128xf32> to vector<1x2x128xf32>
          tpu.vector_store %arg4[%131, %c0_69, %c0_70], %134 {strides = array<i32>} : memref<2x6x128xf32, #tpu.memory_space<vmem>>, vector<1x2x128xf32>,
          %135 = vector.broadcast %22 : f32 to vector<2x128xf32>
          %136 = arith.mulf %135, %104 : vector<2x128xf32>
          %137 = arith.addf %136, %123 : vector<2x128xf32>
          %cst_71 = arith.constant 0.000000e+00 : f32
          %cst_72 = arith.constant 1.000000e+00 : f32
          %138 = vector.broadcast %cst_71 : f32 to vector<2x128xf32>
          %139 = arith.maximumf %138, %137 : vector<2x128xf32>
          %140 = vector.broadcast %cst_72 : f32 to vector<2x128xf32>
          %141 = arith.minimumf %140, %139 : vector<2x128xf32>
          %142 = arith.index_cast %3 : i32 to index
          %c2_73 = arith.constant 2 : index
          %c0_74 = arith.constant 0 : index
          %143 = vector.load %arg4[%142, %c2_73, %c0_74] : memref<2x6x128xf32, #tpu.memory_space<vmem>>, vector<1x2x128xf32>
          %144 = vector.shape_cast %143 : vector<1x2x128xf32> to vector<2x128xf32>
          %145 = vector.shape_cast %141 : vector<2x128xf32> to vector<1x2x128xf32>
          tpu.vector_store %arg4[%142, %c2_73, %c0_74], %145 {strides = array<i32>} : memref<2x6x128xf32, #tpu.memory_space<vmem>>, vector<1x2x128xf32>,
          %146 = vector.broadcast %22 : f32 to vector<2x128xf32>
          %147 = arith.mulf %146, %107 : vector<2x128xf32>
          %148 = arith.addf %147, %123 : vector<2x128xf32>
          %cst_75 = arith.constant 0.000000e+00 : f32
          %cst_76 = arith.constant 1.000000e+00 : f32
          %149 = vector.broadcast %cst_75 : f32 to vector<2x128xf32>
          %150 = arith.maximumf %149, %148 : vector<2x128xf32>
          %151 = vector.broadcast %cst_76 : f32 to vector<2x128xf32>
          %152 = arith.minimumf %151, %150 : vector<2x128xf32>
          %153 = arith.index_cast %3 : i32 to index
          %c4_77 = arith.constant 4 : index
          %c0_78 = arith.constant 0 : index
          %154 = vector.load %arg4[%153, %c4_77, %c0_78] : memref<2x6x128xf32, #tpu.memory_space<vmem>>, vector<1x2x128xf32>
          %155 = vector.shape_cast %154 : vector<1x2x128xf32> to vector<2x128xf32>
          %156 = vector.shape_cast %152 : vector<2x128xf32> to vector<1x2x128xf32>
          tpu.vector_store %arg4[%153, %c4_77, %c0_78], %156 {strides = array<i32>} : memref<2x6x128xf32, #tpu.memory_space<vmem>>, vector<1x2x128xf32>,
        } else {
        }
        %c2_i32_55 = arith.constant 2 : i32
        %93 = arith.cmpi eq, %86, %c2_i32_55 : i32
        %94 = arith.extui %93 : i1 to i32
        %c0_i32_56 = arith.constant 0 : i32
        %95 = arith.cmpi ne, %94, %c0_i32_56 : i32
        scf.if %95 {
          %99 = arith.index_cast %3 : i32 to index
          %c0 = arith.constant 0 : index
          %c0_59 = arith.constant 0 : index
          %100 = vector.load %arg4[%99, %c0, %c0_59] : memref<2x6x128xf32, #tpu.memory_space<vmem>>, vector<1x2x128xf32>
          %101 = vector.shape_cast %100 : vector<1x2x128xf32> to vector<2x128xf32>
          %102 = arith.index_cast %3 : i32 to index
          %c2 = arith.constant 2 : index
          %c0_60 = arith.constant 0 : index
          %103 = vector.load %arg4[%102, %c2, %c0_60] : memref<2x6x128xf32, #tpu.memory_space<vmem>>, vector<1x2x128xf32>
          %104 = vector.shape_cast %103 : vector<1x2x128xf32> to vector<2x128xf32>
          %105 = arith.index_cast %3 : i32 to index
          %c4 = arith.constant 4 : index
          %c0_61 = arith.constant 0 : index
          %106 = vector.load %arg4[%105, %c4, %c0_61] : memref<2x6x128xf32, #tpu.memory_space<vmem>>, vector<1x2x128xf32>
          %107 = vector.shape_cast %106 : vector<1x2x128xf32> to vector<2x128xf32>
          %cst = arith.constant 1.000000e+00 : f32
          %108 = arith.subf %cst, %26 : f32
          %cst_62 = arith.constant 2.989000e-01 : f32
          %109 = vector.broadcast %cst_62 : f32 to vector<2x128xf32>
          %110 = arith.mulf %109, %101 : vector<2x128xf32>
          %cst_63 = arith.constant 5.870000e-01 : f32
          %111 = vector.broadcast %cst_63 : f32 to vector<2x128xf32>
          %112 = arith.mulf %111, %104 : vector<2x128xf32>
          %113 = arith.addf %110, %112 : vector<2x128xf32>
          %cst_64 = arith.constant 1.140000e-01 : f32
          %114 = vector.broadcast %cst_64 : f32 to vector<2x128xf32>
          %115 = arith.mulf %114, %107 : vector<2x128xf32>
          %116 = arith.addf %113, %115 : vector<2x128xf32>
          %117 = vector.broadcast %108 : f32 to vector<2x128xf32>
          %118 = arith.mulf %117, %116 : vector<2x128xf32>
          %119 = vector.broadcast %26 : f32 to vector<2x128xf32>
          %120 = arith.mulf %119, %101 : vector<2x128xf32>
          %121 = arith.addf %120, %118 : vector<2x128xf32>
          %cst_65 = arith.constant 0.000000e+00 : f32
          %cst_66 = arith.constant 1.000000e+00 : f32
          %122 = vector.broadcast %cst_65 : f32 to vector<2x128xf32>
          %123 = arith.maximumf %122, %121 : vector<2x128xf32>
          %124 = vector.broadcast %cst_66 : f32 to vector<2x128xf32>
          %125 = arith.minimumf %124, %123 : vector<2x128xf32>
          %126 = arith.index_cast %3 : i32 to index
          %c0_67 = arith.constant 0 : index
          %c0_68 = arith.constant 0 : index
          %127 = vector.load %arg4[%126, %c0_67, %c0_68] : memref<2x6x128xf32, #tpu.memory_space<vmem>>, vector<1x2x128xf32>
          %128 = vector.shape_cast %127 : vector<1x2x128xf32> to vector<2x128xf32>
          %129 = vector.shape_cast %125 : vector<2x128xf32> to vector<1x2x128xf32>
          tpu.vector_store %arg4[%126, %c0_67, %c0_68], %129 {strides = array<i32>} : memref<2x6x128xf32, #tpu.memory_space<vmem>>, vector<1x2x128xf32>,
          %130 = vector.broadcast %26 : f32 to vector<2x128xf32>
          %131 = arith.mulf %130, %104 : vector<2x128xf32>
          %132 = arith.addf %131, %118 : vector<2x128xf32>
          %cst_69 = arith.constant 0.000000e+00 : f32
          %cst_70 = arith.constant 1.000000e+00 : f32
          %133 = vector.broadcast %cst_69 : f32 to vector<2x128xf32>
          %134 = arith.maximumf %133, %132 : vector<2x128xf32>
          %135 = vector.broadcast %cst_70 : f32 to vector<2x128xf32>
          %136 = arith.minimumf %135, %134 : vector<2x128xf32>
          %137 = arith.index_cast %3 : i32 to index
          %c2_71 = arith.constant 2 : index
          %c0_72 = arith.constant 0 : index
          %138 = vector.load %arg4[%137, %c2_71, %c0_72] : memref<2x6x128xf32, #tpu.memory_space<vmem>>, vector<1x2x128xf32>
          %139 = vector.shape_cast %138 : vector<1x2x128xf32> to vector<2x128xf32>
          %140 = vector.shape_cast %136 : vector<2x128xf32> to vector<1x2x128xf32>
          tpu.vector_store %arg4[%137, %c2_71, %c0_72], %140 {strides = array<i32>} : memref<2x6x128xf32, #tpu.memory_space<vmem>>, vector<1x2x128xf32>,
          %141 = vector.broadcast %26 : f32 to vector<2x128xf32>
          %142 = arith.mulf %141, %107 : vector<2x128xf32>
          %143 = arith.addf %142, %118 : vector<2x128xf32>
          %cst_73 = arith.constant 0.000000e+00 : f32
          %cst_74 = arith.constant 1.000000e+00 : f32
          %144 = vector.broadcast %cst_73 : f32 to vector<2x128xf32>
          %145 = arith.maximumf %144, %143 : vector<2x128xf32>
          %146 = vector.broadcast %cst_74 : f32 to vector<2x128xf32>
          %147 = arith.minimumf %146, %145 : vector<2x128xf32>
          %148 = arith.index_cast %3 : i32 to index
          %c4_75 = arith.constant 4 : index
          %c0_76 = arith.constant 0 : index
          %149 = vector.load %arg4[%148, %c4_75, %c0_76] : memref<2x6x128xf32, #tpu.memory_space<vmem>>, vector<1x2x128xf32>
          %150 = vector.shape_cast %149 : vector<1x2x128xf32> to vector<2x128xf32>
          %151 = vector.shape_cast %147 : vector<2x128xf32> to vector<1x2x128xf32>
          tpu.vector_store %arg4[%148, %c4_75, %c0_76], %151 {strides = array<i32>} : memref<2x6x128xf32, #tpu.memory_space<vmem>>, vector<1x2x128xf32>,
        } else {
        }
        %c3_i32_57 = arith.constant 3 : i32
        %96 = arith.cmpi eq, %86, %c3_i32_57 : i32
        %97 = arith.extui %96 : i1 to i32
        %c0_i32_58 = arith.constant 0 : i32
        %98 = arith.cmpi ne, %97, %c0_i32_58 : i32
        scf.if %98 {
          %99 = arith.index_cast %3 : i32 to index
          %c0 = arith.constant 0 : index
          %c0_59 = arith.constant 0 : index
          %100 = vector.load %arg4[%99, %c0, %c0_59] : memref<2x6x128xf32, #tpu.memory_space<vmem>>, vector<1x2x128xf32>
          %101 = vector.shape_cast %100 : vector<1x2x128xf32> to vector<2x128xf32>
          %102 = arith.index_cast %3 : i32 to index
          %c2 = arith.constant 2 : index
          %c0_60 = arith.constant 0 : index
          %103 = vector.load %arg4[%102, %c2, %c0_60] : memref<2x6x128xf32, #tpu.memory_space<vmem>>, vector<1x2x128xf32>
          %104 = vector.shape_cast %103 : vector<1x2x128xf32> to vector<2x128xf32>
          %105 = arith.index_cast %3 : i32 to index
          %c4 = arith.constant 4 : index
          %c0_61 = arith.constant 0 : index
          %106 = vector.load %arg4[%105, %c4, %c0_61] : memref<2x6x128xf32, #tpu.memory_space<vmem>>, vector<1x2x128xf32>
          %107 = vector.shape_cast %106 : vector<1x2x128xf32> to vector<2x128xf32>
          %108 = arith.maximumf %101, %104 : vector<2x128xf32>
          %109 = arith.maximumf %108, %107 : vector<2x128xf32>
          %110 = arith.minimumf %101, %104 : vector<2x128xf32>
          %111 = arith.minimumf %110, %107 : vector<2x128xf32>
          %112 = arith.cmpf oeq, %109, %111 : vector<2x128xf32>
          %113 = arith.subf %109, %111 : vector<2x128xf32>
          %cst = arith.constant 1.000000e+00 : f32
          %114 = vector.broadcast %cst : f32 to vector<2x128xf32>
          %115 = arith.select %112, %114, %109 : vector<2x128xi1>, vector<2x128xf32>
          %116 = tpu.reciprocal %115 {approx = true} : vector<2x128xf32> -> vector<2x128xf32>
          %117 = arith.select %112, %114, %113 : vector<2x128xi1>, vector<2x128xf32>
          %118 = tpu.reciprocal %117 {approx = true} : vector<2x128xf32> -> vector<2x128xf32>
          %119 = arith.mulf %113, %116 : vector<2x128xf32>
          %cst_62 = arith.constant 1.000000e+00 : f32
          %120 = vector.broadcast %cst_62 : f32 to vector<2x128xf32>
          %121 = arith.minimumf %119, %120 : vector<2x128xf32>
          %122 = arith.subf %109, %101 : vector<2x128xf32>
          %123 = arith.mulf %122, %118 : vector<2x128xf32>
          %124 = arith.subf %109, %104 : vector<2x128xf32>
          %125 = arith.mulf %124, %118 : vector<2x128xf32>
          %126 = arith.subf %109, %107 : vector<2x128xf32>
          %127 = arith.mulf %126, %118 : vector<2x128xf32>
          %128 = arith.cmpf oeq, %109, %101 : vector<2x128xf32>
          %129 = arith.subf %127, %125 : vector<2x128xf32>
          %cst_63 = arith.constant 0.000000e+00 : f32
          %130 = vector.broadcast %cst_63 : f32 to vector<2x128xf32>
          %131 = arith.select %128, %129, %130 : vector<2x128xi1>, vector<2x128xf32>
          %132 = arith.cmpf oeq, %109, %104 : vector<2x128xf32>
          %cst_64 = arith.constant dense<true> : vector<2x128xi1>
          %133 = arith.xori %128, %cst_64 : vector<2x128xi1>
          %134 = arith.andi %132, %133 : vector<2x128xi1>
          %cst_65 = arith.constant 2.000000e+00 : f32
          %135 = vector.broadcast %cst_65 : f32 to vector<2x128xf32>
          %136 = arith.addf %135, %123 : vector<2x128xf32>
          %137 = arith.subf %136, %127 : vector<2x128xf32>
          %cst_66 = arith.constant 0.000000e+00 : f32
          %138 = vector.broadcast %cst_66 : f32 to vector<2x128xf32>
          %139 = arith.select %134, %137, %138 : vector<2x128xi1>, vector<2x128xf32>
          %140 = arith.cmpf one, %109, %104 : vector<2x128xf32>
          %cst_67 = arith.constant dense<true> : vector<2x128xi1>
          %141 = arith.xori %128, %cst_67 : vector<2x128xi1>
          %142 = arith.andi %140, %141 : vector<2x128xi1>
          %cst_68 = arith.constant 4.000000e+00 : f32
          %143 = vector.broadcast %cst_68 : f32 to vector<2x128xf32>
          %144 = arith.addf %143, %125 : vector<2x128xf32>
          %145 = arith.subf %144, %123 : vector<2x128xf32>
          %cst_69 = arith.constant 0.000000e+00 : f32
          %146 = vector.broadcast %cst_69 : f32 to vector<2x128xf32>
          %147 = arith.select %142, %145, %146 : vector<2x128xi1>, vector<2x128xf32>
          %148 = arith.addf %131, %139 : vector<2x128xf32>
          %149 = arith.addf %148, %147 : vector<2x128xf32>
          %cst_70 = arith.constant 0.166666672 : f32
          %150 = vector.broadcast %cst_70 : f32 to vector<2x128xf32>
          %151 = arith.mulf %149, %150 : vector<2x128xf32>
          %cst_71 = arith.constant 1.000000e+00 : f32
          %152 = vector.broadcast %cst_71 : f32 to vector<2x128xf32>
          %153 = arith.addf %151, %152 : vector<2x128xf32>
          %154 = math.floor %153 : vector<2x128xf32>
          %155 = arith.subf %153, %154 : vector<2x128xf32>
          %156 = vector.broadcast %30 : f32 to vector<2x128xf32>
          %157 = arith.addf %155, %156 : vector<2x128xf32>
          %158 = math.floor %157 : vector<2x128xf32>
          %159 = arith.subf %157, %158 : vector<2x128xf32>
          %cst_72 = arith.constant 6.000000e+00 : f32
          %160 = vector.broadcast %cst_72 : f32 to vector<2x128xf32>
          %161 = arith.mulf %159, %160 : vector<2x128xf32>
          %162 = math.floor %161 : vector<2x128xf32>
          %163 = arith.subf %161, %162 : vector<2x128xf32>
          %cst_73 = arith.constant 6.000000e+00 : f32
          %164 = vector.broadcast %cst_73 : f32 to vector<2x128xf32>
          %165 = arith.cmpf oge, %162, %164 : vector<2x128xf32>
          %cst_74 = arith.constant 6.000000e+00 : f32
          %166 = vector.broadcast %cst_74 : f32 to vector<2x128xf32>
          %167 = arith.subf %162, %166 : vector<2x128xf32>
          %168 = arith.select %165, %167, %162 : vector<2x128xi1>, vector<2x128xf32>
          %cst_75 = arith.constant 1.000000e+00 : f32
          %169 = vector.broadcast %cst_75 : f32 to vector<2x128xf32>
          %170 = arith.subf %169, %121 : vector<2x128xf32>
          %171 = arith.mulf %109, %170 : vector<2x128xf32>
          %172 = arith.mulf %121, %163 : vector<2x128xf32>
          %cst_76 = arith.constant 1.000000e+00 : f32
          %173 = vector.broadcast %cst_76 : f32 to vector<2x128xf32>
          %174 = arith.subf %173, %172 : vector<2x128xf32>
          %175 = arith.mulf %109, %174 : vector<2x128xf32>
          %cst_77 = arith.constant 1.000000e+00 : f32
          %176 = vector.broadcast %cst_77 : f32 to vector<2x128xf32>
          %177 = arith.subf %176, %163 : vector<2x128xf32>
          %178 = arith.mulf %121, %177 : vector<2x128xf32>
          %cst_78 = arith.constant 1.000000e+00 : f32
          %179 = vector.broadcast %cst_78 : f32 to vector<2x128xf32>
          %180 = arith.subf %179, %178 : vector<2x128xf32>
          %181 = arith.mulf %109, %180 : vector<2x128xf32>
          %cst_79 = arith.constant 0.000000e+00 : f32
          %182 = vector.broadcast %cst_79 : f32 to vector<2x128xf32>
          %183 = arith.cmpf oeq, %168, %182 : vector<2x128xf32>
          %cst_80 = arith.constant 1.000000e+00 : f32
          %184 = vector.broadcast %cst_80 : f32 to vector<2x128xf32>
          %185 = arith.cmpf oeq, %168, %184 : vector<2x128xf32>
          %cst_81 = arith.constant 2.000000e+00 : f32
          %186 = vector.broadcast %cst_81 : f32 to vector<2x128xf32>
          %187 = arith.cmpf oeq, %168, %186 : vector<2x128xf32>
          %cst_82 = arith.constant 3.000000e+00 : f32
          %188 = vector.broadcast %cst_82 : f32 to vector<2x128xf32>
          %189 = arith.cmpf oeq, %168, %188 : vector<2x128xf32>
          %cst_83 = arith.constant 4.000000e+00 : f32
          %190 = vector.broadcast %cst_83 : f32 to vector<2x128xf32>
          %191 = arith.cmpf oeq, %168, %190 : vector<2x128xf32>
          %192 = arith.select %191, %181, %109 : vector<2x128xi1>, vector<2x128xf32>
          %193 = arith.select %189, %171, %192 : vector<2x128xi1>, vector<2x128xf32>
          %194 = arith.select %187, %171, %193 : vector<2x128xi1>, vector<2x128xf32>
          %195 = arith.select %185, %175, %194 : vector<2x128xi1>, vector<2x128xf32>
          %196 = arith.select %183, %109, %195 : vector<2x128xi1>, vector<2x128xf32>
          %197 = arith.select %191, %171, %171 : vector<2x128xi1>, vector<2x128xf32>
          %198 = arith.select %189, %175, %197 : vector<2x128xi1>, vector<2x128xf32>
          %199 = arith.select %187, %109, %198 : vector<2x128xi1>, vector<2x128xf32>
          %200 = arith.select %185, %109, %199 : vector<2x128xi1>, vector<2x128xf32>
          %201 = arith.select %183, %181, %200 : vector<2x128xi1>, vector<2x128xf32>
          %202 = arith.select %191, %109, %175 : vector<2x128xi1>, vector<2x128xf32>
          %203 = arith.select %189, %109, %202 : vector<2x128xi1>, vector<2x128xf32>
          %204 = arith.select %187, %181, %203 : vector<2x128xi1>, vector<2x128xf32>
          %205 = arith.select %185, %171, %204 : vector<2x128xi1>, vector<2x128xf32>
          %206 = arith.select %183, %171, %205 : vector<2x128xi1>, vector<2x128xf32>
          %207 = arith.index_cast %3 : i32 to index
          %c0_84 = arith.constant 0 : index
          %c0_85 = arith.constant 0 : index
          %208 = vector.load %arg4[%207, %c0_84, %c0_85] : memref<2x6x128xf32, #tpu.memory_space<vmem>>, vector<1x2x128xf32>
          %209 = vector.shape_cast %208 : vector<1x2x128xf32> to vector<2x128xf32>
          %210 = vector.shape_cast %196 : vector<2x128xf32> to vector<1x2x128xf32>
          tpu.vector_store %arg4[%207, %c0_84, %c0_85], %210 {strides = array<i32>} : memref<2x6x128xf32, #tpu.memory_space<vmem>>, vector<1x2x128xf32>,
          %211 = arith.index_cast %3 : i32 to index
          %c2_86 = arith.constant 2 : index
          %c0_87 = arith.constant 0 : index
          %212 = vector.load %arg4[%211, %c2_86, %c0_87] : memref<2x6x128xf32, #tpu.memory_space<vmem>>, vector<1x2x128xf32>
          %213 = vector.shape_cast %212 : vector<1x2x128xf32> to vector<2x128xf32>
          %214 = vector.shape_cast %201 : vector<2x128xf32> to vector<1x2x128xf32>
          tpu.vector_store %arg4[%211, %c2_86, %c0_87], %214 {strides = array<i32>} : memref<2x6x128xf32, #tpu.memory_space<vmem>>, vector<1x2x128xf32>,
          %215 = arith.index_cast %3 : i32 to index
          %c4_88 = arith.constant 4 : index
          %c0_89 = arith.constant 0 : index
          %216 = vector.load %arg4[%215, %c4_88, %c0_89] : memref<2x6x128xf32, #tpu.memory_space<vmem>>, vector<1x2x128xf32>
          %217 = vector.shape_cast %216 : vector<1x2x128xf32> to vector<2x128xf32>
          %218 = vector.shape_cast %206 : vector<2x128xf32> to vector<1x2x128xf32>
          tpu.vector_store %arg4[%215, %c4_88, %c0_89], %218 {strides = array<i32>} : memref<2x6x128xf32, #tpu.memory_space<vmem>>, vector<1x2x128xf32>,
        } else {
        }
      } else {
      }
    }
    %c2_i32_1 = arith.constant 2 : i32
    return
  }
  func.func @transform_0(%arg0: i32) -> i32 {
    %c0_i32 = arith.constant 0 : i32
    %c0_i32_0 = arith.constant 0 : i32
    return %c0_i32 : i32
  }
  func.func @transform_1(%arg0: i32) -> i32 {
    %c0_i32 = arith.constant 0 : i32
    %c0_i32_0 = arith.constant 0 : i32
    return %c0_i32 : i32
  }
  func.func @transform_2(%arg0: i32) -> (i32, i32, i32) {
    %c0_i32 = arith.constant 0 : i32
    %c0_i32_0 = arith.constant 0 : i32
    %c0_i32_1 = arith.constant 0 : i32
    return %arg0, %c0_i32, %c0_i32_0 : i32, i32, i32
  }
  func.func @transform_3(%arg0: i32) -> (i32, i32, i32) {
    %c0_i32 = arith.constant 0 : i32
    %c0_i32_0 = arith.constant 0 : i32
    %c0_i32_1 = arith.constant 0 : i32
    return %arg0, %c0_i32, %c0_i32_0 : i32, i32, i32
  }
}

</mosaic_0001>

<bundles_post_ra>
// kernel: batchwise_img_color_jitter_aug.3
= control target key start
LH: loop header
LB: loop body
LE: loop exit
PB: predicated region body
PF: predicated region fallthrough
CT: control target
= control target key end

     0   :  { %8 = vsyncpa [#allocation3], 0  ;;  %s1330_s0 = inlined_call_operand.vmem [shape: f32[8], index: 0, kind: input, shape index: {}]   ;;  %s1331_s1 = inlined_call_operand.vmem [shape: s32[10], index: 1, kind: input, shape index: {}]   ;;  %s1332_s2 = inlined_call_operand.vmem [shape: f32[2,6,128], index: 2, kind: input, shape index: {}]   ;;  %s1333_s3 = inlined_call_operand.vmem [shape: f32[2,6,128], index: 3, kind: output, shape index: {}]  }
   0x1   :  { %s15_s14 = sshll.u32 %s1330_s0, 4  ;;  %s16_s14 = int_to_ptr.vmem [resolvable:$true] %s15_s14 }
   0x2   :  { %9 = vsyncpa [#allocation5], 0  ;;  %s24_s17 = sshll.u32 %s1331_s1, 4  ;;  %s963_s18 = smov [#allocation2]   ;;  %s25_s17 = int_to_ptr.vmem [resolvable:$true] %s24_s17 }
   0x3   :  { %18 = dma.vmem_to_smem %s16_s14, 16, %s963_s18, [#allocation3]  }
   0x4   :  { %s964_s19 = smov [#allocation4]  }
   0x5   :  { %27 = dma.vmem_to_smem %s25_s17, 16, %s964_s19, [#allocation5]  }
   0x6   :  { %955 = dma.done.wait [#allocation3], 16  }
   0x7   :  { %956 = vsyncadd [#allocation3], 4294967280 }
   0x8   :  { %957 = dma.done.wait [#allocation5], 16  }
   0x9   :  { %958 = vsyncadd [#allocation5], 4294967280 }
   0xa   :  { %38 = sfence }
   0xb   :  { %s995_s20 = smov 0  }
   0xc LB: > { %s1001_s0 = smul.u32 5, %s961_s20  ;;  %s961_s20 = sphi %s995_s20, %s45_s20  }
   0xe   : > { %s48_s1 = sld [smem:[#allocation4 + %s1001_s0]] }
  0x14   : > { %p849_p0 = scmp.ne.s32.totalorder %s48_s1, 0 }
  0x15   : > { %s850_s21 = sshll.u32 (!%p849_p0), %s961_s20, 3 }
  0x16   : > { %52 = sbr.rel (%p849_p0) target bundleno = 29 (0x1d), region = 32  ;;  %s54_s24 = scalar_lea.vmem (!%p849_p0), %s1332_s2, %s850_s21 }
  0x17   : > { %s56_s27 = scalar_lea.vmem (!%p849_p0), %s1333_s3, %s850_s21 }
  0x1b   : > { %v55_v0 = vld [vmem:[%s54_s24] sm:$0x3f] }
  0x1c   : > { %57 = vst [vmem:[%s56_s27] sm:$0x3f] %v55_v0 }
  0x1d PF: > { %p851_p1 = scmp.eq.s32.totalorder %s48_s1, 0 }
  0x1e   : > { %s852_s28 = sshll.u32 (!%p851_p1), %s961_s20, 2  ;;  %s70_s29 = sadd.s32 (!%p851_p1), 1, %s1001_s0 }
  0x1f   : > { %61 = sbr.rel (%p851_p1) target bundleno = 1319 (0x527), region = 36  ;;  %s1013_s30 = sld [smem:[#allocation2 + %s852_s28]] (!%p851_p1) }
  0x20   : > { %s64_s4 = sadd.s32 (!%p851_p1), 1, %s852_s28  ;;  %s66_s6 = sadd.s32 (!%p851_p1), 2, %s852_s28 }
  0x21   : > { %s1015_s5 = sld [smem:[#allocation2 + %s64_s4]] (!%p851_p1)  ;;  %s68_s8 = sadd.s32 (!%p851_p1), 3, %s852_s28 }
  0x22   : > { %s1017_s7 = sld [smem:[#allocation2 + %s66_s6]] (!%p851_p1) }
  0x23   : > { %s1019_s9 = sld [smem:[#allocation2 + %s68_s8]] (!%p851_p1) }
  0x24   : > { %s1021_s10 = sld [smem:[#allocation4 + %s70_s29]] }
  0x2a   : > { %p853_p2 = scmp.ne.s32.totalorder %s1021_s10, 0 }
  0x2b   : > { %s854_s11 = sshll.u32 (!%p853_p2), %s961_s20, 3 }
  0x2c   : > { %75 = sbr.rel (%p853_p2) target bundleno = 57 (0x39), region = 40  ;;  %s77_s14 = scalar_lea.vmem (!%p853_p2), %s1332_s2, %s854_s11 }
  0x2d   : > { %s83_s17 = scalar_lea.vmem (!%p853_p2), %s1333_s3, %s854_s11 }
  0x31   : > { %v79_v1 = vstv %s1013_s30  ;;  %v78_v2 = vld [vmem:[%s77_s14] sm:$0x3f] }
  0x32   : > { %v80_v3 = vmul.f32 %v79_v1, %v78_v2 }
  0x34   : > { %v81_v4 = vmax.f32 %v80_v3, 0.0 }
  0x36   : > { %v82_v5 = vmin.f32 %v81_v4, 1.0 }
  0x38   : > { %84 = vst [vmem:[%s83_s17] sm:$0x3f] %v82_v5 }
  0x39 PF: > { %p855_p3 = scmp.ne.s32.totalorder %s1021_s10, 1 }
  0x3a   : > { %s856_s18 = sshll.u32 (!%p855_p3), %s961_s20, 3  ;;  %s111_s22 = ssub.f32 (!%p855_p3), 1.0, %s1015_s5 }
  0x3b   : > { %88 = sbr.rel (%p855_p3) target bundleno = 264 (0x108), region = 44  ;;  %s90_s21 = scalar_lea.vmem (!%p855_p3), %s1332_s2, %s856_s18 }
  0x3c   : > { %s119_s28 = scalar_lea.vmem (!%p855_p3), %s1333_s3, %s856_s18 }
  0x40   : > { %v91_v6 = vld [vmem:[%s90_s21] sm:$0x3]  ;;  %v92_v7 = vld [vmem:[%s90_s21 + $0x2] sm:$0x3]  ;;  %v93_v8 = vld [vmem:[%s90_s21 + $0x4] sm:$0x3]  ;;  %v114_v22 = vstv %s1015_s5 }
  0x41   : > { %v94_v9 = vmul.f32 0.2989, %v91_v6  ;;  %v95_v10 = vmul.f32 0.587, %v92_v7  ;;  %v97_v11 = vmul.f32 0.114, %v93_v8  ;;  %v126_v23 = vmul.f32 %v114_v22, %v93_v8 }
  0x42   : > { %vm99_vm0 = vcmask 1041408   ;;  %v115_v24 = vmul.f32 %v114_v22, %v91_v6  ;;  %v121_v25 = vmul.f32 %v114_v22, %v92_v7 }
  0x43   : > { %v96_v12 = vadd.f32 %v95_v10, %v94_v9 }
  0x45   : > { %v98_v13 = vadd.f32 %v97_v11, %v96_v12 }
  0x47   : > { %v100_v14 = vsel %vm99_vm0, %v98_v13, 0.0 }
  0x48   : > { %101 = vadd.xlane.f32.xlu0 %v100_v14 }
  0xbb   : > { %v102_v15 = vpop.xlane.xlu0 %101 }
  0xbc   : > { %v103_v16 = vrot.slane %v102_v15, 4 }
  0xbe   : > { %v104_v17 = vadd.f32 %v103_v16, %v102_v15 }
  0xc0   : > { %v105_v18 = vrot.slane %v104_v17, 2 }
  0xc2   : > { %v106_v19 = vadd.f32 %v105_v18, %v104_v17 }
  0xc4   : > { %v107_v20 = vrot.slane %v106_v19, 1 }
  0xc6   : > { %v108_v21 = vadd.f32 %v107_v20, %v106_v19 }
  0xc8   : > { %889 = vpush %v108_v21 }
  0xf9   : > { %s890_s23 = spop %889 }
  0xfa   : > { %s110_s24 = smul.f32 0.00390625, %s890_s23 }
  0xfc   : > { %s112_s25 = smul.f32 %s111_s22, %s110_s24 }
  0xfe   : > { %v113_v26 = vstv %s112_s25 }
  0xff   : > { %v116_v27 = vadd.f32 %v115_v24, %v113_v26  ;;  %v122_v28 = vadd.f32 %v121_v25, %v113_v26  ;;  %v127_v29 = vadd.f32 %v126_v23, %v113_v26 }
 0x101   : > { %v117_v30 = vmax.f32 %v116_v27, 0.0  ;;  %v123_v31 = vmax.f32 %v122_v28, 0.0  ;;  %v128_v32 = vmax.f32 %v127_v29, 0.0 }
 0x103   : > { %v118_v33 = vmin.f32 %v117_v30, 1.0  ;;  %v124_v34 = vmin.f32 %v123_v31, 1.0  ;;  %v129_v35 = vmin.f32 %v128_v32, 1.0 }
 0x105   : > { %120 = vst [vmem:[%s119_s28] sm:$0x3] %v118_v33 }
 0x106   : > { %125 = vst [vmem:[%s119_s28 + $0x2] sm:$0x3] %v124_v34 }
 0x107   : > { %130 = vst [vmem:[%s119_s28 + $0x4] sm:$0x3] %v129_v35 }
 0x108 PF: > { %p857_p4 = scmp.ne.s32.totalorder %s1021_s10, 2 }
 0x109   : > { %s858_s29 = sshll.u32 (!%p857_p4), %s961_s20, 3  ;;  %s140_s11 = ssub.f32 (!%p857_p4), 1.0, %s1017_s7 }
 0x10a   : > { %134 = sbr.rel (%p857_p4) target bundleno = 289 (0x121), region = 48  ;;  %s136_s8 = scalar_lea.vmem (!%p857_p4), %s1332_s2, %s858_s29 }
 0x10b   : > { %s153_s14 = scalar_lea.vmem (!%p857_p4), %s1333_s3, %s858_s29 }
 0x10f   : > { %v137_v36 = vld [vmem:[%s136_s8] sm:$0x3]  ;;  %v138_v37 = vld [vmem:[%s136_s8 + $0x2] sm:$0x3]  ;;  %v139_v38 = vld [vmem:[%s136_s8 + $0x4] sm:$0x3]  ;;  %v148_v42 = vstv %s1017_s7 }
 0x110   : > { %v141_v39 = vmul.f32 0.2989, %v137_v36  ;;  %v142_v40 = vmul.f32 0.587, %v138_v37  ;;  %v144_v41 = vmul.f32 0.114, %v139_v38  ;;  %v146_v44 = vstv %s140_s11 }
 0x111   : > { %v149_v46 = vmul.f32 %v148_v42, %v137_v36  ;;  %v155_v47 = vmul.f32 %v148_v42, %v138_v37  ;;  %v160_v48 = vmul.f32 %v148_v42, %v139_v38 }
 0x112   : > { %v143_v43 = vadd.f32 %v142_v40, %v141_v39 }
 0x114   : > { %v145_v45 = vadd.f32 %v144_v41, %v143_v43 }
 0x116   : > { %v147_v49 = vmul.f32 %v146_v44, %v145_v45 }
 0x118   : > { %v150_v50 = vadd.f32 %v149_v46, %v147_v49  ;;  %v156_v51 = vadd.f32 %v155_v47, %v147_v49  ;;  %v161_v52 = vadd.f32 %v160_v48, %v147_v49 }
 0x11a   : > { %v151_v53 = vmax.f32 %v150_v50, 0.0  ;;  %v157_v54 = vmax.f32 %v156_v51, 0.0  ;;  %v162_v55 = vmax.f32 %v161_v52, 0.0 }
 0x11c   : > { %v152_v56 = vmin.f32 %v151_v53, 1.0  ;;  %v158_v57 = vmin.f32 %v157_v54, 1.0  ;;  %v163_v58 = vmin.f32 %v162_v55, 1.0 }
 0x11e   : > { %154 = vst [vmem:[%s153_s14] sm:$0x3] %v152_v56 }
 0x11f   : > { %159 = vst [vmem:[%s153_s14 + $0x2] sm:$0x3] %v158_v57 }
 0x120   : > { %164 = vst [vmem:[%s153_s14 + $0x4] sm:$0x3] %v163_v58 }
 0x121 PF: > { %p859_p5 = scmp.ne.s32.totalorder %s1021_s10, 3 }
 0x122   : > { %s860_s15 = sshll.u32 (!%p859_p5), %s961_s20, 3 }
 0x123   : > { %168 = sbr.rel (%p859_p5) target bundleno = 356 (0x164), region = 52  ;;  %s170_s18 = scalar_lea.vmem (!%p859_p5), %s1332_s2, %s860_s15 }
 0x124   : > { %s250_s1 = scalar_lea.vmem (!%p859_p5), %s1333_s3, %s860_s15 }
 0x128   : > { %v171_v59 = vld [vmem:[%s170_s18] sm:$0x3]  ;;  %v172_v60 = vld [vmem:[%s170_s18 + $0x2] sm:$0x3]  ;;  %v173_v61 = vld [vmem:[%s170_s18 + $0x4] sm:$0x3]  ;;  %v212_v25 = vstv %s1019_s9 }
 0x129   : > { %v174_v62 = vmax.f32 %v171_v59, %v172_v60  ;;  %v176_v63 = vmin.f32 %v171_v59, %v172_v60  ;;  %vm965_vm4 = vmmov 1  }
 0x12b   : > { %v1063_v0 = vmax.f32 %v174_v62, %v173_v61  ;;  %v177_v1 = vmin.f32 %v176_v63, %v173_v61 }
 0x12d   : > { %vm178_vm1 = vcmp.eq.f32.partialorder %v1063_v0, %v177_v1  ;;  %v179_v2 = vsub.f32 %v1063_v0, %v177_v1  ;;  %v186_v4 = vsub.f32 %v1063_v0, %v171_v59  ;;  %v188_v5 = vsub.f32 %v1063_v0, %v172_v60 }
 0x12e   : > { %v190_v6 = vsub.f32 %v1063_v0, %v173_v61  ;;  %vm192_vm2 = vcmp.eq.f32.partialorder %v1063_v0, %v171_v59  ;;  %vm195_vm3 = vcmp.eq.f32.partialorder %v1063_v0, %v172_v60  ;;  %vm201_vm6 = vcmp.ne.f32.partialorder %v1063_v0, %v172_v60 }
 0x12f   : > { %v182_v3 = vsel %vm178_vm1, 1.0, %v179_v2  ;;  %vm196_vm5 = vmxor %vm192_vm2, %vm965_vm4  ;;  %v180_v21 = vsel %vm178_vm1, 1.0, %v1063_v0 }
 0x130   : > { %911 = vrcp.f32 %v182_v3  ;;  %vm197_vm7 = vmand %vm195_vm3, %vm196_vm5 }
 0x131   : > { %vm202_vm8 = vmand %vm201_vm6, %vm196_vm5  ;;  %913 = vrcp.f32 %v180_v21 }
 0x136   : > { %v912_v7 = vpop.eup %911 }
 0x137   : > { %v187_v8 = vmul.f32 %v912_v7, %v186_v4  ;;  %v189_v9 = vmul.f32 %v912_v7, %v188_v5  ;;  %v191_v10 = vmul.f32 %v912_v7, %v190_v6  ;;  %v914_v28 = vpop.eup %913 }
 0x138   : > { %v184_v30 = vmul.f32 %v914_v28, %v179_v2 }
 0x139   : > { %v193_v11 = vsub.f32 %v191_v10, %v189_v9  ;;  %v198_v12 = vadd.f32 2.0, %v187_v8  ;;  %v203_v13 = vadd.f32 4.0, %v189_v9 }
 0x13a   : > { %v185_v33 = vmin.f32 %v184_v30, 1.0 }
 0x13b   : > { %v194_v14 = vsel %vm192_vm2, %v193_v11, 0.0  ;;  %v199_v15 = vsub.f32 %v198_v12, %v191_v10  ;;  %v204_v16 = vsub.f32 %v203_v13, %v187_v8 }
 0x13c   : > { %v222_v37 = vsub.f32 1.0, %v185_v33 }
 0x13d   : > { %v200_v17 = vsel %vm197_vm7, %v199_v15, 0.0  ;;  %v205_v18 = vsel %vm202_vm8, %v204_v16, 0.0 }
 0x13e   : > { %v206_v19 = vadd.f32 %v200_v17, %v194_v14  ;;  %v223_v41 = vmul.f32 %v222_v37, %v1063_v0 }
 0x140   : > { %v207_v20 = vadd.f32 %v206_v19, %v205_v18 }
 0x142   : > { %v208_v22 = vmul.f32 0.16666667, %v207_v20 }
 0x144   : > { %v209_v23 = vadd.f32 1.0, %v208_v22 }
 0x146   : > { %v210_v24 = vfloor.f32 %v209_v23 }
 0x148   : > { %v211_v26 = vsub.f32 %v209_v23, %v210_v24 }
 0x14a   : > { %v213_v27 = vadd.f32 %v212_v25, %v211_v26 }
 0x14c   : > { %v214_v29 = vfloor.f32 %v213_v27 }
 0x14e   : > { %v215_v31 = vsub.f32 %v213_v27, %v214_v29 }
 0x150   : > { %v216_v32 = vmul.f32 6.0, %v215_v31 }
 0x152   : > { %v217_v34 = vfloor.f32 %v216_v32 }
 0x154   : > { %v218_v35 = vsub.f32 %v216_v32, %v217_v34  ;;  %vm219_vm9 = vcmp.ge.f32.partialorder %v217_v34, 6.0  ;;  %v861_v36 = vadd.f32 -6.0, %v217_v34 }
 0x156   : > { %v221_v38 = vsel %vm219_vm9, %v861_v36, %v217_v34  ;;  %v224_v39 = vmul.f32 %v218_v35, %v185_v33  ;;  %v227_v40 = vsub.f32 1.0, %v218_v35 }
 0x157   : > { %vm234_vm10 = vcmp.eq.f32.partialorder %v221_v38, 3.0  ;;  %vm235_vm11 = vcmp.eq.f32.partialorder %v221_v38, 4.0  ;;  %vm233_vm12 = vcmp.eq.f32.partialorder %v221_v38, 2.0  ;;  %vm232_vm13 = vcmp.eq.f32.partialorder %v221_v38, 1.0 }
 0x158   : > { %v225_v42 = vsub.f32 1.0, %v224_v39  ;;  %v228_v43 = vmul.f32 %v227_v40, %v185_v33  ;;  %vm231_vm14 = vcmp.eq.f32.partialorder %v221_v38, 0.0 }
 0x15a   : > { %v226_v44 = vmul.f32 %v225_v42, %v1063_v0  ;;  %v229_v45 = vsub.f32 1.0, %v228_v43 }
 0x15c   : > { %v230_v46 = vmul.f32 %v229_v45, %v1063_v0  ;;  %v241_v47 = vsel %vm234_vm10, %v226_v44, %v223_v41  ;;  %v245_v48 = vsel %vm235_vm11, %v1063_v0, %v226_v44 }
 0x15d   : > { %v242_v49 = vsel %vm233_vm12, %v1063_v0, %v241_v47  ;;  %v246_v50 = vsel %vm234_vm10, %v1063_v0, %v245_v48 }
 0x15e   : > { %v236_v51 = vsel %vm235_vm11, %v230_v46, %v1063_v0  ;;  %v243_v52 = vsel %vm232_vm13, %v1063_v0, %v242_v49  ;;  %v247_v53 = vsel %vm233_vm12, %v230_v46, %v246_v50 }
 0x15f   : > { %v237_v54 = vsel %vm234_vm10, %v223_v41, %v236_v51  ;;  %v244_v55 = vsel %vm231_vm14, %v230_v46, %v243_v52  ;;  %v248_v56 = vsel %vm232_vm13, %v223_v41, %v247_v53 }
 0x160   : > { %v238_v57 = vsel %vm233_vm12, %v223_v41, %v237_v54  ;;  %252 = vst [vmem:[%s250_s1 + $0x2] sm:$0x3] %v244_v55  ;;  %v249_v58 = vsel %vm231_vm14, %v223_v41, %v248_v56 }
 0x161   : > { %v239_v59 = vsel %vm232_vm13, %v226_v44, %v238_v57  ;;  %253 = vst [vmem:[%s250_s1 + $0x4] sm:$0x3] %v249_v58 }
 0x162   : > { %v240_v60 = vsel %vm231_vm14, %v1063_v0, %v239_v59 }
 0x163   : > { %251 = vst [vmem:[%s250_s1] sm:$0x3] %v240_v60 }
 0x164 PF: > { %s254_s21 = sadd.s32 2, %s1001_s0 }
 0x165   : > { %s1103_s22 = sld [smem:[#allocation4 + %s254_s21]] }
 0x16b   : > { %p862_p6 = scmp.ne.s32.totalorder %s1103_s22, 0 }
 0x16c   : > { %s863_s23 = sshll.u32 (!%p862_p6), %s961_s20, 3 }
 0x16d   : > { %259 = sbr.rel (%p862_p6) target bundleno = 378 (0x17a), region = 56  ;;  %s261_s26 = scalar_lea.vmem (!%p862_p6), %s1333_s3, %s863_s23 }
 0x172   : > { %v263_v61 = vstv %s1013_s30  ;;  %v262_v62 = vld [vmem:[%s261_s26] sm:$0x3f] }
 0x173   : > { %v264_v63 = vmul.f32 %v263_v61, %v262_v62 }
 0x175   : > { %v265_v0 = vmax.f32 %v264_v63, 0.0 }
 0x177   : > { %v266_v1 = vmin.f32 %v265_v0, 1.0 }
 0x179   : > { %267 = vst [vmem:[%s261_s26] sm:$0x3f] %v266_v1 }
 0x17a PF: > { %p864_p7 = scmp.ne.s32.totalorder %s1103_s22, 1 }
 0x17b   : > { %s865_s27 = sshll.u32 (!%p864_p7), %s961_s20, 3  ;;  %s294_s6 = ssub.f32 (!%p864_p7), 1.0, %s1015_s5 }
 0x17c   : > { %271 = sbr.rel (%p864_p7) target bundleno = 585 (0x249), region = 60  ;;  %s1116_s4 = scalar_lea.vmem (!%p864_p7), %s1333_s3, %s865_s27 }
 0x181   : > { %v274_v2 = vld [vmem:[%s1116_s4] sm:$0x3]  ;;  %v275_v3 = vld [vmem:[%s1116_s4 + $0x2] sm:$0x3]  ;;  %v276_v4 = vld [vmem:[%s1116_s4 + $0x4] sm:$0x3]  ;;  %v297_v18 = vstv %s1015_s5 }
 0x182   : > { %v277_v5 = vmul.f32 0.2989, %v274_v2  ;;  %v278_v6 = vmul.f32 0.587, %v275_v3  ;;  %v280_v7 = vmul.f32 0.114, %v276_v4  ;;  %v298_v19 = vmul.f32 %v297_v18, %v274_v2 }
 0x183   : > { %vm282_vm15 = vcmask 1041408   ;;  %v303_v20 = vmul.f32 %v297_v18, %v275_v3  ;;  %v308_v21 = vmul.f32 %v297_v18, %v276_v4 }
 0x184   : > { %v279_v8 = vadd.f32 %v278_v6, %v277_v5 }
 0x186   : > { %v281_v9 = vadd.f32 %v280_v7, %v279_v8 }
 0x188   : > { %v283_v10 = vsel %vm282_vm15, %v281_v9, 0.0 }
 0x189   : > { %284 = vadd.xlane.f32.xlu0 %v283_v10 }
 0x1fc   : > { %v285_v11 = vpop.xlane.xlu0 %284 }
 0x1fd   : > { %v286_v12 = vrot.slane %v285_v11, 4 }
 0x1ff   : > { %v287_v13 = vadd.f32 %v286_v12, %v285_v11 }
 0x201   : > { %v288_v14 = vrot.slane %v287_v13, 2 }
 0x203   : > { %v289_v15 = vadd.f32 %v288_v14, %v287_v13 }
 0x205   : > { %v290_v16 = vrot.slane %v289_v15, 1 }
 0x207   : > { %v291_v17 = vadd.f32 %v290_v16, %v289_v15 }
 0x209   : > { %891 = vpush %v291_v17 }
 0x23a   : > { %s892_s8 = spop %891 }
 0x23b   : > { %s293_s11 = smul.f32 0.00390625, %s892_s8 }
 0x23d   : > { %s295_s12 = smul.f32 %s294_s6, %s293_s11 }
 0x23f   : > { %v296_v22 = vstv %s295_s12 }
 0x240   : > { %v299_v23 = vadd.f32 %v298_v19, %v296_v22  ;;  %v304_v24 = vadd.f32 %v303_v20, %v296_v22  ;;  %v309_v25 = vadd.f32 %v308_v21, %v296_v22 }
 0x242   : > { %v300_v26 = vmax.f32 %v299_v23, 0.0  ;;  %v305_v27 = vmax.f32 %v304_v24, 0.0  ;;  %v310_v28 = vmax.f32 %v309_v25, 0.0 }
 0x244   : > { %v301_v29 = vmin.f32 %v300_v26, 1.0  ;;  %v306_v30 = vmin.f32 %v305_v27, 1.0  ;;  %v311_v31 = vmin.f32 %v310_v28, 1.0 }
 0x246   : > { %302 = vst [vmem:[%s1116_s4] sm:$0x3] %v301_v29 }
 0x247   : > { %307 = vst [vmem:[%s1116_s4 + $0x2] sm:$0x3] %v306_v30 }
 0x248   : > { %312 = vst [vmem:[%s1116_s4 + $0x4] sm:$0x3] %v311_v31 }
 0x249 PF: > { %p866_p8 = scmp.ne.s32.totalorder %s1103_s22, 2 }
 0x24a   : > { %s867_s13 = sshll.u32 (!%p866_p8), %s961_s20, 3  ;;  %s322_s17 = ssub.f32 (!%p866_p8), 1.0, %s1017_s7 }
 0x24b   : > { %316 = sbr.rel (%p866_p8) target bundleno = 610 (0x262), region = 64  ;;  %s318_s16 = scalar_lea.vmem (!%p866_p8), %s1333_s3, %s867_s13 }
 0x250   : > { %v319_v32 = vld [vmem:[%s318_s16] sm:$0x3]  ;;  %v320_v33 = vld [vmem:[%s318_s16 + $0x2] sm:$0x3]  ;;  %v321_v34 = vld [vmem:[%s318_s16 + $0x4] sm:$0x3]  ;;  %v330_v38 = vstv %s1017_s7 }
 0x251   : > { %v323_v35 = vmul.f32 0.2989, %v319_v32  ;;  %v324_v36 = vmul.f32 0.587, %v320_v33  ;;  %v326_v37 = vmul.f32 0.114, %v321_v34  ;;  %v328_v40 = vstv %s322_s17 }
 0x252   : > { %v331_v42 = vmul.f32 %v330_v38, %v319_v32  ;;  %v336_v43 = vmul.f32 %v330_v38, %v320_v33  ;;  %v341_v44 = vmul.f32 %v330_v38, %v321_v34 }
 0x253   : > { %v325_v39 = vadd.f32 %v324_v36, %v323_v35 }
 0x255   : > { %v327_v41 = vadd.f32 %v326_v37, %v325_v39 }
 0x257   : > { %v329_v45 = vmul.f32 %v328_v40, %v327_v41 }
 0x259   : > { %v332_v46 = vadd.f32 %v331_v42, %v329_v45  ;;  %v337_v47 = vadd.f32 %v336_v43, %v329_v45  ;;  %v342_v48 = vadd.f32 %v341_v44, %v329_v45 }
 0x25b   : > { %v333_v49 = vmax.f32 %v332_v46, 0.0  ;;  %v338_v50 = vmax.f32 %v337_v47, 0.0  ;;  %v343_v51 = vmax.f32 %v342_v48, 0.0 }
 0x25d   : > { %v334_v52 = vmin.f32 %v333_v49, 1.0  ;;  %v339_v53 = vmin.f32 %v338_v50, 1.0  ;;  %v344_v54 = vmin.f32 %v343_v51, 1.0 }
 0x25f   : > { %335 = vst [vmem:[%s318_s16] sm:$0x3] %v334_v52 }
 0x260   : > { %340 = vst [vmem:[%s318_s16 + $0x2] sm:$0x3] %v339_v53 }
 0x261   : > { %345 = vst [vmem:[%s318_s16 + $0x4] sm:$0x3] %v344_v54 }
 0x262 PF: > { %p868_p9 = scmp.ne.s32.totalorder %s1103_s22, 3 }
 0x263   : > { %s869_s18 = sshll.u32 (!%p868_p9), %s961_s20, 3 }
 0x264   : > { %349 = sbr.rel (%p868_p9) target bundleno = 677 (0x2a5), region = 68  ;;  %s1138_s1 = scalar_lea.vmem (!%p868_p9), %s1333_s3, %s869_s18 }
 0x269   : > { %v352_v55 = vld [vmem:[%s1138_s1] sm:$0x3]  ;;  %v353_v56 = vld [vmem:[%s1138_s1 + $0x2] sm:$0x3]  ;;  %v354_v57 = vld [vmem:[%s1138_s1 + $0x4] sm:$0x3]  ;;  %v393_v21 = vstv %s1019_s9 }
 0x26a   : > { %v355_v58 = vmax.f32 %v352_v55, %v353_v56  ;;  %v357_v59 = vmin.f32 %v352_v55, %v353_v56  ;;  %vm966_vm3 = vmmov 1  }
 0x26c   : > { %v1143_v60 = vmax.f32 %v355_v58, %v354_v57  ;;  %v358_v61 = vmin.f32 %v357_v59, %v354_v57 }
 0x26e   : > { %vm359_vm0 = vcmp.eq.f32.partialorder %v1143_v60, %v358_v61  ;;  %v360_v62 = vsub.f32 %v1143_v60, %v358_v61  ;;  %v367_v0 = vsub.f32 %v1143_v60, %v352_v55  ;;  %v369_v1 = vsub.f32 %v1143_v60, %v353_v56 }
 0x26f   : > { %v371_v2 = vsub.f32 %v1143_v60, %v354_v57  ;;  %vm373_vm1 = vcmp.eq.f32.partialorder %v1143_v60, %v352_v55  ;;  %vm376_vm2 = vcmp.eq.f32.partialorder %v1143_v60, %v353_v56  ;;  %vm382_vm5 = vcmp.ne.f32.partialorder %v1143_v60, %v353_v56 }
 0x270   : > { %v363_v63 = vsel %vm359_vm0, 1.0, %v360_v62  ;;  %vm377_vm4 = vmxor %vm373_vm1, %vm966_vm3  ;;  %v361_v17 = vsel %vm359_vm0, 1.0, %v1143_v60 }
 0x271   : > { %915 = vrcp.f32 %v363_v63  ;;  %vm378_vm6 = vmand %vm376_vm2, %vm377_vm4 }
 0x272   : > { %vm383_vm7 = vmand %vm382_vm5, %vm377_vm4  ;;  %917 = vrcp.f32 %v361_v17 }
 0x277   : > { %v916_v3 = vpop.eup %915 }
 0x278   : > { %v368_v4 = vmul.f32 %v916_v3, %v367_v0  ;;  %v370_v5 = vmul.f32 %v916_v3, %v369_v1  ;;  %v372_v6 = vmul.f32 %v916_v3, %v371_v2  ;;  %v918_v24 = vpop.eup %917 }
 0x279   : > { %v365_v26 = vmul.f32 %v918_v24, %v360_v62 }
 0x27a   : > { %v374_v7 = vsub.f32 %v372_v6, %v370_v5  ;;  %v379_v8 = vadd.f32 2.0, %v368_v4  ;;  %v384_v9 = vadd.f32 4.0, %v370_v5 }
 0x27b   : > { %v366_v29 = vmin.f32 %v365_v26, 1.0 }
 0x27c   : > { %v375_v10 = vsel %vm373_vm1, %v374_v7, 0.0  ;;  %v380_v11 = vsub.f32 %v379_v8, %v372_v6  ;;  %v385_v12 = vsub.f32 %v384_v9, %v368_v4 }
 0x27d   : > { %v403_v33 = vsub.f32 1.0, %v366_v29 }
 0x27e   : > { %v381_v13 = vsel %vm378_vm6, %v380_v11, 0.0  ;;  %v386_v14 = vsel %vm383_vm7, %v385_v12, 0.0 }
 0x27f   : > { %v387_v15 = vadd.f32 %v381_v13, %v375_v10  ;;  %v404_v37 = vmul.f32 %v403_v33, %v1143_v60 }
 0x281   : > { %v388_v16 = vadd.f32 %v387_v15, %v386_v14 }
 0x283   : > { %v389_v18 = vmul.f32 0.16666667, %v388_v16 }
 0x285   : > { %v390_v19 = vadd.f32 1.0, %v389_v18 }
 0x287   : > { %v391_v20 = vfloor.f32 %v390_v19 }
 0x289   : > { %v392_v22 = vsub.f32 %v390_v19, %v391_v20 }
 0x28b   : > { %v394_v23 = vadd.f32 %v393_v21, %v392_v22 }
 0x28d   : > { %v395_v25 = vfloor.f32 %v394_v23 }
 0x28f   : > { %v396_v27 = vsub.f32 %v394_v23, %v395_v25 }
 0x291   : > { %v397_v28 = vmul.f32 6.0, %v396_v27 }
 0x293   : > { %v398_v30 = vfloor.f32 %v397_v28 }
 0x295   : > { %v399_v31 = vsub.f32 %v397_v28, %v398_v30  ;;  %vm400_vm8 = vcmp.ge.f32.partialorder %v398_v30, 6.0  ;;  %v870_v32 = vadd.f32 -6.0, %v398_v30 }
 0x297   : > { %v402_v34 = vsel %vm400_vm8, %v870_v32, %v398_v30  ;;  %v405_v35 = vmul.f32 %v399_v31, %v366_v29  ;;  %v408_v36 = vsub.f32 1.0, %v399_v31 }
 0x298   : > { %vm415_vm9 = vcmp.eq.f32.partialorder %v402_v34, 3.0  ;;  %vm416_vm10 = vcmp.eq.f32.partialorder %v402_v34, 4.0  ;;  %vm414_vm11 = vcmp.eq.f32.partialorder %v402_v34, 2.0  ;;  %vm413_vm12 = vcmp.eq.f32.partialorder %v402_v34, 1.0 }
 0x299   : > { %v406_v38 = vsub.f32 1.0, %v405_v35  ;;  %v409_v39 = vmul.f32 %v408_v36, %v366_v29  ;;  %vm412_vm13 = vcmp.eq.f32.partialorder %v402_v34, 0.0 }
 0x29b   : > { %v407_v40 = vmul.f32 %v406_v38, %v1143_v60  ;;  %v410_v41 = vsub.f32 1.0, %v409_v39 }
 0x29d   : > { %v411_v42 = vmul.f32 %v410_v41, %v1143_v60  ;;  %v422_v43 = vsel %vm415_vm9, %v407_v40, %v404_v37  ;;  %v426_v44 = vsel %vm416_vm10, %v1143_v60, %v407_v40 }
 0x29e   : > { %v423_v45 = vsel %vm414_vm11, %v1143_v60, %v422_v43  ;;  %v427_v46 = vsel %vm415_vm9, %v1143_v60, %v426_v44 }
 0x29f   : > { %v417_v47 = vsel %vm416_vm10, %v411_v42, %v1143_v60  ;;  %v424_v48 = vsel %vm413_vm12, %v1143_v60, %v423_v45  ;;  %v428_v49 = vsel %vm414_vm11, %v411_v42, %v427_v46 }
 0x2a0   : > { %v418_v50 = vsel %vm415_vm9, %v404_v37, %v417_v47  ;;  %v425_v51 = vsel %vm412_vm13, %v411_v42, %v424_v48  ;;  %v429_v52 = vsel %vm413_vm12, %v404_v37, %v428_v49 }
 0x2a1   : > { %v419_v53 = vsel %vm414_vm11, %v404_v37, %v418_v50  ;;  %432 = vst [vmem:[%s1138_s1 + $0x2] sm:$0x3] %v425_v51  ;;  %v430_v54 = vsel %vm412_vm13, %v404_v37, %v429_v52 }
 0x2a2   : > { %v420_v55 = vsel %vm413_vm12, %v407_v40, %v419_v53  ;;  %433 = vst [vmem:[%s1138_s1 + $0x4] sm:$0x3] %v430_v54 }
 0x2a3   : > { %v421_v56 = vsel %vm412_vm13, %v1143_v60, %v420_v55 }
 0x2a4   : > { %431 = vst [vmem:[%s1138_s1] sm:$0x3] %v421_v56 }
 0x2a5 PF: > { %s434_s21 = sadd.s32 3, %s1001_s0 }
 0x2a6   : > { %s1178_s22 = sld [smem:[#allocation4 + %s434_s21]] }
 0x2ac   : > { %p871_p10 = scmp.ne.s32.totalorder %s1178_s22, 0 }
 0x2ad   : > { %s872_s23 = sshll.u32 (!%p871_p10), %s961_s20, 3 }
 0x2ae   : > { %439 = sbr.rel (%p871_p10) target bundleno = 699 (0x2bb), region = 72  ;;  %s441_s26 = scalar_lea.vmem (!%p871_p10), %s1333_s3, %s872_s23 }
 0x2b3   : > { %v443_v57 = vstv %s1013_s30  ;;  %v442_v58 = vld [vmem:[%s441_s26] sm:$0x3f] }
 0x2b4   : > { %v444_v59 = vmul.f32 %v443_v57, %v442_v58 }
 0x2b6   : > { %v445_v60 = vmax.f32 %v444_v59, 0.0 }
 0x2b8   : > { %v446_v61 = vmin.f32 %v445_v60, 1.0 }
 0x2ba   : > { %447 = vst [vmem:[%s441_s26] sm:$0x3f] %v446_v61 }
 0x2bb PF: > { %p873_p11 = scmp.ne.s32.totalorder %s1178_s22, 1 }
 0x2bc   : > { %s874_s27 = sshll.u32 (!%p873_p11), %s961_s20, 3  ;;  %s474_s6 = ssub.f32 (!%p873_p11), 1.0, %s1015_s5 }
 0x2bd   : > { %451 = sbr.rel (%p873_p11) target bundleno = 906 (0x38a), region = 76  ;;  %s1191_s4 = scalar_lea.vmem (!%p873_p11), %s1333_s3, %s874_s27 }
 0x2c2   : > { %v454_v62 = vld [vmem:[%s1191_s4] sm:$0x3]  ;;  %v455_v63 = vld [vmem:[%s1191_s4 + $0x2] sm:$0x3]  ;;  %v456_v0 = vld [vmem:[%s1191_s4 + $0x4] sm:$0x3]  ;;  %v477_v14 = vstv %s1015_s5 }
 0x2c3   : > { %v457_v1 = vmul.f32 0.2989, %v454_v62  ;;  %v458_v2 = vmul.f32 0.587, %v455_v63  ;;  %v460_v3 = vmul.f32 0.114, %v456_v0  ;;  %v478_v15 = vmul.f32 %v477_v14, %v454_v62 }
 0x2c4   : > { %vm462_vm14 = vcmask 1041408   ;;  %v483_v16 = vmul.f32 %v477_v14, %v455_v63  ;;  %v488_v17 = vmul.f32 %v477_v14, %v456_v0 }
 0x2c5   : > { %v459_v4 = vadd.f32 %v458_v2, %v457_v1 }
 0x2c7   : > { %v461_v5 = vadd.f32 %v460_v3, %v459_v4 }
 0x2c9   : > { %v463_v6 = vsel %vm462_vm14, %v461_v5, 0.0 }
 0x2ca   : > { %464 = vadd.xlane.f32.xlu0 %v463_v6 }
 0x33d   : > { %v465_v7 = vpop.xlane.xlu0 %464 }
 0x33e   : > { %v466_v8 = vrot.slane %v465_v7, 4 }
 0x340   : > { %v467_v9 = vadd.f32 %v466_v8, %v465_v7 }
 0x342   : > { %v468_v10 = vrot.slane %v467_v9, 2 }
 0x344   : > { %v469_v11 = vadd.f32 %v468_v10, %v467_v9 }
 0x346   : > { %v470_v12 = vrot.slane %v469_v11, 1 }
 0x348   : > { %v471_v13 = vadd.f32 %v470_v12, %v469_v11 }
 0x34a   : > { %893 = vpush %v471_v13 }
 0x37b   : > { %s894_s8 = spop %893 }
 0x37c   : > { %s473_s11 = smul.f32 0.00390625, %s894_s8 }
 0x37e   : > { %s475_s12 = smul.f32 %s474_s6, %s473_s11 }
 0x380   : > { %v476_v18 = vstv %s475_s12 }
 0x381   : > { %v479_v19 = vadd.f32 %v478_v15, %v476_v18  ;;  %v484_v20 = vadd.f32 %v483_v16, %v476_v18  ;;  %v489_v21 = vadd.f32 %v488_v17, %v476_v18 }
 0x383   : > { %v480_v22 = vmax.f32 %v479_v19, 0.0  ;;  %v485_v23 = vmax.f32 %v484_v20, 0.0  ;;  %v490_v24 = vmax.f32 %v489_v21, 0.0 }
 0x385   : > { %v481_v25 = vmin.f32 %v480_v22, 1.0  ;;  %v486_v26 = vmin.f32 %v485_v23, 1.0  ;;  %v491_v27 = vmin.f32 %v490_v24, 1.0 }
 0x387   : > { %482 = vst [vmem:[%s1191_s4] sm:$0x3] %v481_v25 }
 0x388   : > { %487 = vst [vmem:[%s1191_s4 + $0x2] sm:$0x3] %v486_v26 }
 0x389   : > { %492 = vst [vmem:[%s1191_s4 + $0x4] sm:$0x3] %v491_v27 }
 0x38a PF: > { %p875_p12 = scmp.ne.s32.totalorder %s1178_s22, 2 }
 0x38b   : > { %s876_s13 = sshll.u32 (!%p875_p12), %s961_s20, 3  ;;  %s502_s17 = ssub.f32 (!%p875_p12), 1.0, %s1017_s7 }
 0x38c   : > { %496 = sbr.rel (%p875_p12) target bundleno = 931 (0x3a3), region = 80  ;;  %s498_s16 = scalar_lea.vmem (!%p875_p12), %s1333_s3, %s876_s13 }
 0x391   : > { %v499_v28 = vld [vmem:[%s498_s16] sm:$0x3]  ;;  %v500_v29 = vld [vmem:[%s498_s16 + $0x2] sm:$0x3]  ;;  %v501_v30 = vld [vmem:[%s498_s16 + $0x4] sm:$0x3]  ;;  %v510_v34 = vstv %s1017_s7 }
 0x392   : > { %v503_v31 = vmul.f32 0.2989, %v499_v28  ;;  %v504_v32 = vmul.f32 0.587, %v500_v29  ;;  %v506_v33 = vmul.f32 0.114, %v501_v30  ;;  %v508_v36 = vstv %s502_s17 }
 0x393   : > { %v511_v38 = vmul.f32 %v510_v34, %v499_v28  ;;  %v516_v39 = vmul.f32 %v510_v34, %v500_v29  ;;  %v521_v40 = vmul.f32 %v510_v34, %v501_v30 }
 0x394   : > { %v505_v35 = vadd.f32 %v504_v32, %v503_v31 }
 0x396   : > { %v507_v37 = vadd.f32 %v506_v33, %v505_v35 }
 0x398   : > { %v509_v41 = vmul.f32 %v508_v36, %v507_v37 }
 0x39a   : > { %v512_v42 = vadd.f32 %v511_v38, %v509_v41  ;;  %v517_v43 = vadd.f32 %v516_v39, %v509_v41  ;;  %v522_v44 = vadd.f32 %v521_v40, %v509_v41 }
 0x39c   : > { %v513_v45 = vmax.f32 %v512_v42, 0.0  ;;  %v518_v46 = vmax.f32 %v517_v43, 0.0  ;;  %v523_v47 = vmax.f32 %v522_v44, 0.0 }
 0x39e   : > { %v514_v48 = vmin.f32 %v513_v45, 1.0  ;;  %v519_v49 = vmin.f32 %v518_v46, 1.0  ;;  %v524_v50 = vmin.f32 %v523_v47, 1.0 }
 0x3a0   : > { %515 = vst [vmem:[%s498_s16] sm:$0x3] %v514_v48 }
 0x3a1   : > { %520 = vst [vmem:[%s498_s16 + $0x2] sm:$0x3] %v519_v49 }
 0x3a2   : > { %525 = vst [vmem:[%s498_s16 + $0x4] sm:$0x3] %v524_v50 }
 0x3a3 PF: > { %p877_p13 = scmp.ne.s32.totalorder %s1178_s22, 3 }
 0x3a4   : > { %s878_s18 = sshll.u32 (!%p877_p13), %s961_s20, 3 }
 0x3a5   : > { %529 = sbr.rel (%p877_p13) target bundleno = 998 (0x3e6), region = 84  ;;  %s1213_s1 = scalar_lea.vmem (!%p877_p13), %s1333_s3, %s878_s18 }
 0x3aa   : > { %v532_v51 = vld [vmem:[%s1213_s1] sm:$0x3]  ;;  %v533_v52 = vld [vmem:[%s1213_s1 + $0x2] sm:$0x3]  ;;  %v534_v53 = vld [vmem:[%s1213_s1 + $0x4] sm:$0x3]  ;;  %v573_v17 = vstv %s1019_s9 }
 0x3ab   : > { %v535_v54 = vmax.f32 %v532_v51, %v533_v52  ;;  %v537_v55 = vmin.f32 %v532_v51, %v533_v52  ;;  %vm967_vm2 = vmmov 1  }
 0x3ad   : > { %v1218_v56 = vmax.f32 %v535_v54, %v534_v53  ;;  %v538_v57 = vmin.f32 %v537_v55, %v534_v53 }
 0x3af   : > { %vm539_vm15 = vcmp.eq.f32.partialorder %v1218_v56, %v538_v57  ;;  %v540_v58 = vsub.f32 %v1218_v56, %v538_v57  ;;  %v547_v60 = vsub.f32 %v1218_v56, %v532_v51  ;;  %v549_v61 = vsub.f32 %v1218_v56, %v533_v52 }
 0x3b0   : > { %v551_v62 = vsub.f32 %v1218_v56, %v534_v53  ;;  %vm553_vm0 = vcmp.eq.f32.partialorder %v1218_v56, %v532_v51  ;;  %vm556_vm1 = vcmp.eq.f32.partialorder %v1218_v56, %v533_v52  ;;  %vm562_vm4 = vcmp.ne.f32.partialorder %v1218_v56, %v533_v52 }
 0x3b1   : > { %v543_v59 = vsel %vm539_vm15, 1.0, %v540_v58  ;;  %vm557_vm3 = vmxor %vm553_vm0, %vm967_vm2  ;;  %v541_v13 = vsel %vm539_vm15, 1.0, %v1218_v56 }
 0x3b2   : > { %919 = vrcp.f32 %v543_v59  ;;  %vm558_vm5 = vmand %vm556_vm1, %vm557_vm3 }
 0x3b3   : > { %vm563_vm6 = vmand %vm562_vm4, %vm557_vm3  ;;  %921 = vrcp.f32 %v541_v13 }
 0x3b8   : > { %v920_v63 = vpop.eup %919 }
 0x3b9   : > { %v548_v0 = vmul.f32 %v920_v63, %v547_v60  ;;  %v550_v1 = vmul.f32 %v920_v63, %v549_v61  ;;  %v552_v2 = vmul.f32 %v920_v63, %v551_v62  ;;  %v922_v20 = vpop.eup %921 }
 0x3ba   : > { %v545_v22 = vmul.f32 %v922_v20, %v540_v58 }
 0x3bb   : > { %v554_v3 = vsub.f32 %v552_v2, %v550_v1  ;;  %v559_v4 = vadd.f32 2.0, %v548_v0  ;;  %v564_v5 = vadd.f32 4.0, %v550_v1 }
 0x3bc   : > { %v546_v25 = vmin.f32 %v545_v22, 1.0 }
 0x3bd   : > { %v555_v6 = vsel %vm553_vm0, %v554_v3, 0.0  ;;  %v560_v7 = vsub.f32 %v559_v4, %v552_v2  ;;  %v565_v8 = vsub.f32 %v564_v5, %v548_v0 }
 0x3be   : > { %v583_v29 = vsub.f32 1.0, %v546_v25 }
 0x3bf   : > { %v561_v9 = vsel %vm558_vm5, %v560_v7, 0.0  ;;  %v566_v10 = vsel %vm563_vm6, %v565_v8, 0.0 }
 0x3c0   : > { %v567_v11 = vadd.f32 %v561_v9, %v555_v6  ;;  %v584_v33 = vmul.f32 %v583_v29, %v1218_v56 }
 0x3c2   : > { %v568_v12 = vadd.f32 %v567_v11, %v566_v10 }
 0x3c4   : > { %v569_v14 = vmul.f32 0.16666667, %v568_v12 }
 0x3c6   : > { %v570_v15 = vadd.f32 1.0, %v569_v14 }
 0x3c8   : > { %v571_v16 = vfloor.f32 %v570_v15 }
 0x3ca   : > { %v572_v18 = vsub.f32 %v570_v15, %v571_v16 }
 0x3cc   : > { %v574_v19 = vadd.f32 %v573_v17, %v572_v18 }
 0x3ce   : > { %v575_v21 = vfloor.f32 %v574_v19 }
 0x3d0   : > { %v576_v23 = vsub.f32 %v574_v19, %v575_v21 }
 0x3d2   : > { %v577_v24 = vmul.f32 6.0, %v576_v23 }
 0x3d4   : > { %v578_v26 = vfloor.f32 %v577_v24 }
 0x3d6   : > { %v579_v27 = vsub.f32 %v577_v24, %v578_v26  ;;  %vm580_vm7 = vcmp.ge.f32.partialorder %v578_v26, 6.0  ;;  %v879_v28 = vadd.f32 -6.0, %v578_v26 }
 0x3d8   : > { %v582_v30 = vsel %vm580_vm7, %v879_v28, %v578_v26  ;;  %v585_v31 = vmul.f32 %v579_v27, %v546_v25  ;;  %v588_v32 = vsub.f32 1.0, %v579_v27 }
 0x3d9   : > { %vm595_vm8 = vcmp.eq.f32.partialorder %v582_v30, 3.0  ;;  %vm596_vm9 = vcmp.eq.f32.partialorder %v582_v30, 4.0  ;;  %vm594_vm10 = vcmp.eq.f32.partialorder %v582_v30, 2.0  ;;  %vm593_vm11 = vcmp.eq.f32.partialorder %v582_v30, 1.0 }
 0x3da   : > { %v586_v34 = vsub.f32 1.0, %v585_v31  ;;  %v589_v35 = vmul.f32 %v588_v32, %v546_v25  ;;  %vm592_vm12 = vcmp.eq.f32.partialorder %v582_v30, 0.0 }
 0x3dc   : > { %v587_v36 = vmul.f32 %v586_v34, %v1218_v56  ;;  %v590_v37 = vsub.f32 1.0, %v589_v35 }
 0x3de   : > { %v591_v38 = vmul.f32 %v590_v37, %v1218_v56  ;;  %v602_v39 = vsel %vm595_vm8, %v587_v36, %v584_v33  ;;  %v606_v40 = vsel %vm596_vm9, %v1218_v56, %v587_v36 }
 0x3df   : > { %v603_v41 = vsel %vm594_vm10, %v1218_v56, %v602_v39  ;;  %v607_v42 = vsel %vm595_vm8, %v1218_v56, %v606_v40 }
 0x3e0   : > { %v597_v43 = vsel %vm596_vm9, %v591_v38, %v1218_v56  ;;  %v604_v44 = vsel %vm593_vm11, %v1218_v56, %v603_v41  ;;  %v608_v45 = vsel %vm594_vm10, %v591_v38, %v607_v42 }
 0x3e1   : > { %v598_v46 = vsel %vm595_vm8, %v584_v33, %v597_v43  ;;  %v605_v47 = vsel %vm592_vm12, %v591_v38, %v604_v44  ;;  %v609_v48 = vsel %vm593_vm11, %v584_v33, %v608_v45 }
 0x3e2   : > { %v599_v49 = vsel %vm594_vm10, %v584_v33, %v598_v46  ;;  %612 = vst [vmem:[%s1213_s1 + $0x2] sm:$0x3] %v605_v47  ;;  %v610_v50 = vsel %vm592_vm12, %v584_v33, %v609_v48 }
 0x3e3   : > { %v600_v51 = vsel %vm593_vm11, %v587_v36, %v599_v49  ;;  %613 = vst [vmem:[%s1213_s1 + $0x4] sm:$0x3] %v610_v50 }
 0x3e4   : > { %v601_v52 = vsel %vm592_vm12, %v1218_v56, %v600_v51 }
 0x3e5   : > { %611 = vst [vmem:[%s1213_s1] sm:$0x3] %v601_v52 }
 0x3e6 PF: > { %s614_s21 = sadd.s32 4, %s1001_s0 }
 0x3e7   : > { %s1253_s22 = sld [smem:[#allocation4 + %s614_s21]] }
 0x3ed   : > { %p880_p0 = scmp.ne.s32.totalorder %s1253_s22, 0 }
 0x3ee   : > { %s881_s23 = sshll.u32 (!%p880_p0), %s961_s20, 3 }
 0x3ef   : > { %619 = sbr.rel (%p880_p0) target bundleno = 1020 (0x3fc), region = 88  ;;  %s621_s26 = scalar_lea.vmem (!%p880_p0), %s1333_s3, %s881_s23 }
 0x3f4   : > { %v623_v53 = vstv %s1013_s30  ;;  %v622_v54 = vld [vmem:[%s621_s26] sm:$0x3f] }
 0x3f5   : > { %v624_v55 = vmul.f32 %v623_v53, %v622_v54 }
 0x3f7   : > { %v625_v56 = vmax.f32 %v624_v55, 0.0 }
 0x3f9   : > { %v626_v57 = vmin.f32 %v625_v56, 1.0 }
 0x3fb   : > { %627 = vst [vmem:[%s621_s26] sm:$0x3f] %v626_v57 }
 0x3fc PF: > { %p882_p1 = scmp.ne.s32.totalorder %s1253_s22, 1 }
 0x3fd   : > { %s883_s0 = sshll.u32 (!%p882_p1), %s961_s20, 3  ;;  %s654_s30 = ssub.f32 (!%p882_p1), 1.0, %s1015_s5 }
 0x3fe   : > { %631 = sbr.rel (%p882_p1) target bundleno = 1227 (0x4cb), region = 92  ;;  %s1266_s29 = scalar_lea.vmem (!%p882_p1), %s1333_s3, %s883_s0 }
 0x403   : > { %v634_v58 = vld [vmem:[%s1266_s29] sm:$0x3]  ;;  %v635_v59 = vld [vmem:[%s1266_s29 + $0x2] sm:$0x3]  ;;  %v636_v60 = vld [vmem:[%s1266_s29 + $0x4] sm:$0x3]  ;;  %v657_v10 = vstv %s1015_s5 }
 0x404   : > { %v637_v61 = vmul.f32 0.2989, %v634_v58  ;;  %v638_v62 = vmul.f32 0.587, %v635_v59  ;;  %v640_v63 = vmul.f32 0.114, %v636_v60  ;;  %v658_v11 = vmul.f32 %v657_v10, %v634_v58 }
 0x405   : > { %vm642_vm13 = vcmask 1041408   ;;  %v663_v12 = vmul.f32 %v657_v10, %v635_v59  ;;  %v668_v13 = vmul.f32 %v657_v10, %v636_v60 }
 0x406   : > { %v639_v0 = vadd.f32 %v638_v62, %v637_v61 }
 0x408   : > { %v641_v1 = vadd.f32 %v640_v63, %v639_v0 }
 0x40a   : > { %v643_v2 = vsel %vm642_vm13, %v641_v1, 0.0 }
 0x40b   : > { %644 = vadd.xlane.f32.xlu0 %v643_v2 }
 0x47e   : > { %v645_v3 = vpop.xlane.xlu0 %644 }
 0x47f   : > { %v646_v4 = vrot.slane %v645_v3, 4 }
 0x481   : > { %v647_v5 = vadd.f32 %v646_v4, %v645_v3 }
 0x483   : > { %v648_v6 = vrot.slane %v647_v5, 2 }
 0x485   : > { %v649_v7 = vadd.f32 %v648_v6, %v647_v5 }
 0x487   : > { %v650_v8 = vrot.slane %v649_v7, 1 }
 0x489   : > { %v651_v9 = vadd.f32 %v650_v8, %v649_v7 }
 0x48b   : > { %895 = vpush %v651_v9 }
 0x4bc   : > { %s896_s4 = spop %895 }
 0x4bd   : > { %s653_s6 = smul.f32 0.00390625, %s896_s4 }
 0x4bf   : > { %s655_s8 = smul.f32 %s654_s30, %s653_s6 }
 0x4c1   : > { %v656_v14 = vstv %s655_s8 }
 0x4c2   : > { %v659_v15 = vadd.f32 %v658_v11, %v656_v14  ;;  %v664_v16 = vadd.f32 %v663_v12, %v656_v14  ;;  %v669_v17 = vadd.f32 %v668_v13, %v656_v14 }
 0x4c4   : > { %v660_v18 = vmax.f32 %v659_v15, 0.0  ;;  %v665_v19 = vmax.f32 %v664_v16, 0.0  ;;  %v670_v20 = vmax.f32 %v669_v17, 0.0 }
 0x4c6   : > { %v661_v21 = vmin.f32 %v660_v18, 1.0  ;;  %v666_v22 = vmin.f32 %v665_v19, 1.0  ;;  %v671_v23 = vmin.f32 %v670_v20, 1.0 }
 0x4c8   : > { %662 = vst [vmem:[%s1266_s29] sm:$0x3] %v661_v21 }
 0x4c9   : > { %667 = vst [vmem:[%s1266_s29 + $0x2] sm:$0x3] %v666_v22 }
 0x4ca   : > { %672 = vst [vmem:[%s1266_s29 + $0x4] sm:$0x3] %v671_v23 }
 0x4cb PF: > { %p884_p2 = scmp.ne.s32.totalorder %s1253_s22, 2 }
 0x4cc   : > { %s885_s5 = sshll.u32 (!%p884_p2), %s961_s20, 3  ;;  %s682_s14 = ssub.f32 (!%p884_p2), 1.0, %s1017_s7 }
 0x4cd   : > { %676 = sbr.rel (%p884_p2) target bundleno = 1252 (0x4e4), region = 96  ;;  %s678_s13 = scalar_lea.vmem (!%p884_p2), %s1333_s3, %s885_s5 }
 0x4d2   : > { %v679_v24 = vld [vmem:[%s678_s13] sm:$0x3]  ;;  %v680_v25 = vld [vmem:[%s678_s13 + $0x2] sm:$0x3]  ;;  %v681_v26 = vld [vmem:[%s678_s13 + $0x4] sm:$0x3]  ;;  %v690_v30 = vstv %s1017_s7 }
 0x4d3   : > { %v683_v27 = vmul.f32 0.2989, %v679_v24  ;;  %v684_v28 = vmul.f32 0.587, %v680_v25  ;;  %v686_v29 = vmul.f32 0.114, %v681_v26  ;;  %v688_v32 = vstv %s682_s14 }
 0x4d4   : > { %v691_v34 = vmul.f32 %v690_v30, %v679_v24  ;;  %v696_v35 = vmul.f32 %v690_v30, %v680_v25  ;;  %v701_v36 = vmul.f32 %v690_v30, %v681_v26 }
 0x4d5   : > { %v685_v31 = vadd.f32 %v684_v28, %v683_v27 }
 0x4d7   : > { %v687_v33 = vadd.f32 %v686_v29, %v685_v31 }
 0x4d9   : > { %v689_v37 = vmul.f32 %v688_v32, %v687_v33 }
 0x4db   : > { %v692_v38 = vadd.f32 %v691_v34, %v689_v37  ;;  %v697_v39 = vadd.f32 %v696_v35, %v689_v37  ;;  %v702_v40 = vadd.f32 %v701_v36, %v689_v37 }
 0x4dd   : > { %v693_v41 = vmax.f32 %v692_v38, 0.0  ;;  %v698_v42 = vmax.f32 %v697_v39, 0.0  ;;  %v703_v43 = vmax.f32 %v702_v40, 0.0 }
 0x4df   : > { %v694_v44 = vmin.f32 %v693_v41, 1.0  ;;  %v699_v45 = vmin.f32 %v698_v42, 1.0  ;;  %v704_v46 = vmin.f32 %v703_v43, 1.0 }
 0x4e1   : > { %695 = vst [vmem:[%s678_s13] sm:$0x3] %v694_v44 }
 0x4e2   : > { %700 = vst [vmem:[%s678_s13 + $0x2] sm:$0x3] %v699_v45 }
 0x4e3   : > { %705 = vst [vmem:[%s678_s13 + $0x4] sm:$0x3] %v704_v46 }
 0x4e4 PF: > { %p886_p3 = scmp.ne.s32.totalorder %s1253_s22, 3 }
 0x4e5   : > { %s887_s7 = sshll.u32 (!%p886_p3), %s961_s20, 3 }
 0x4e6   : > { %709 = sbr.rel (%p886_p3) target bundleno = 1319 (0x527), region = 100  ;;  %s1288_s17 = scalar_lea.vmem (!%p886_p3), %s1333_s3, %s887_s7 }
 0x4eb   : > { %v712_v47 = vld [vmem:[%s1288_s17] sm:$0x3]  ;;  %v713_v48 = vld [vmem:[%s1288_s17 + $0x2] sm:$0x3]  ;;  %v714_v49 = vld [vmem:[%s1288_s17 + $0x4] sm:$0x3]  ;;  %v753_v13 = vstv %s1019_s9 }
 0x4ec   : > { %v715_v50 = vmax.f32 %v712_v47, %v713_v48  ;;  %v717_v51 = vmin.f32 %v712_v47, %v713_v48  ;;  %vm968_vm1 = vmmov 1  }
 0x4ee   : > { %v1293_v52 = vmax.f32 %v715_v50, %v714_v49  ;;  %v718_v53 = vmin.f32 %v717_v51, %v714_v49 }
 0x4f0   : > { %vm719_vm14 = vcmp.eq.f32.partialorder %v1293_v52, %v718_v53  ;;  %v720_v54 = vsub.f32 %v1293_v52, %v718_v53  ;;  %v727_v56 = vsub.f32 %v1293_v52, %v712_v47  ;;  %v729_v57 = vsub.f32 %v1293_v52, %v713_v48 }
 0x4f1   : > { %v731_v58 = vsub.f32 %v1293_v52, %v714_v49  ;;  %vm733_vm15 = vcmp.eq.f32.partialorder %v1293_v52, %v712_v47  ;;  %vm736_vm0 = vcmp.eq.f32.partialorder %v1293_v52, %v713_v48  ;;  %vm742_vm3 = vcmp.ne.f32.partialorder %v1293_v52, %v713_v48 }
 0x4f2   : > { %v723_v55 = vsel %vm719_vm14, 1.0, %v720_v54  ;;  %vm737_vm2 = vmxor %vm733_vm15, %vm968_vm1  ;;  %v721_v9 = vsel %vm719_vm14, 1.0, %v1293_v52 }
 0x4f3   : > { %923 = vrcp.f32 %v723_v55  ;;  %vm738_vm4 = vmand %vm736_vm0, %vm737_vm2 }
 0x4f4   : > { %vm743_vm5 = vmand %vm742_vm3, %vm737_vm2  ;;  %925 = vrcp.f32 %v721_v9 }
 0x4f9   : > { %v924_v59 = vpop.eup %923 }
 0x4fa   : > { %v728_v60 = vmul.f32 %v924_v59, %v727_v56  ;;  %v730_v61 = vmul.f32 %v924_v59, %v729_v57  ;;  %v732_v62 = vmul.f32 %v924_v59, %v731_v58  ;;  %v926_v16 = vpop.eup %925 }
 0x4fb   : > { %v725_v18 = vmul.f32 %v926_v16, %v720_v54 }
 0x4fc   : > { %v734_v63 = vsub.f32 %v732_v62, %v730_v61  ;;  %v739_v0 = vadd.f32 2.0, %v728_v60  ;;  %v744_v1 = vadd.f32 4.0, %v730_v61 }
 0x4fd   : > { %v726_v21 = vmin.f32 %v725_v18, 1.0 }
 0x4fe   : > { %v735_v2 = vsel %vm733_vm15, %v734_v63, 0.0  ;;  %v740_v3 = vsub.f32 %v739_v0, %v732_v62  ;;  %v745_v4 = vsub.f32 %v744_v1, %v728_v60 }
 0x4ff   : > { %v763_v25 = vsub.f32 1.0, %v726_v21 }
 0x500   : > { %v741_v5 = vsel %vm738_vm4, %v740_v3, 0.0  ;;  %v746_v6 = vsel %vm743_vm5, %v745_v4, 0.0 }
 0x501   : > { %v747_v7 = vadd.f32 %v741_v5, %v735_v2  ;;  %v764_v29 = vmul.f32 %v763_v25, %v1293_v52 }
 0x503   : > { %v748_v8 = vadd.f32 %v747_v7, %v746_v6 }
 0x505   : > { %v749_v10 = vmul.f32 0.16666667, %v748_v8 }
 0x507   : > { %v750_v11 = vadd.f32 1.0, %v749_v10 }
 0x509   : > { %v751_v12 = vfloor.f32 %v750_v11 }
 0x50b   : > { %v752_v14 = vsub.f32 %v750_v11, %v751_v12 }
 0x50d   : > { %v754_v15 = vadd.f32 %v753_v13, %v752_v14 }
 0x50f   : > { %v755_v17 = vfloor.f32 %v754_v15 }
 0x511   : > { %v756_v19 = vsub.f32 %v754_v15, %v755_v17 }
 0x513   : > { %v757_v20 = vmul.f32 6.0, %v756_v19 }
 0x515   : > { %v758_v22 = vfloor.f32 %v757_v20 }
 0x517   : > { %v759_v23 = vsub.f32 %v757_v20, %v758_v22  ;;  %vm760_vm6 = vcmp.ge.f32.partialorder %v758_v22, 6.0  ;;  %v888_v24 = vadd.f32 -6.0, %v758_v22 }
 0x519   : > { %v762_v26 = vsel %vm760_vm6, %v888_v24, %v758_v22  ;;  %v765_v27 = vmul.f32 %v759_v23, %v726_v21  ;;  %v768_v28 = vsub.f32 1.0, %v759_v23 }
 0x51a   : > { %vm775_vm7 = vcmp.eq.f32.partialorder %v762_v26, 3.0  ;;  %vm776_vm8 = vcmp.eq.f32.partialorder %v762_v26, 4.0  ;;  %vm774_vm9 = vcmp.eq.f32.partialorder %v762_v26, 2.0  ;;  %vm773_vm10 = vcmp.eq.f32.partialorder %v762_v26, 1.0 }
 0x51b   : > { %v766_v30 = vsub.f32 1.0, %v765_v27  ;;  %v769_v31 = vmul.f32 %v768_v28, %v726_v21  ;;  %vm772_vm11 = vcmp.eq.f32.partialorder %v762_v26, 0.0 }
 0x51d   : > { %v767_v32 = vmul.f32 %v766_v30, %v1293_v52  ;;  %v770_v33 = vsub.f32 1.0, %v769_v31 }
 0x51f   : > { %v771_v34 = vmul.f32 %v770_v33, %v1293_v52  ;;  %v782_v35 = vsel %vm775_vm7, %v767_v32, %v764_v29  ;;  %v786_v36 = vsel %vm776_vm8, %v1293_v52, %v767_v32 }
 0x520   : > { %v783_v37 = vsel %vm774_vm9, %v1293_v52, %v782_v35  ;;  %v787_v38 = vsel %vm775_vm7, %v1293_v52, %v786_v36 }
 0x521   : > { %v777_v39 = vsel %vm776_vm8, %v771_v34, %v1293_v52  ;;  %v784_v40 = vsel %vm773_vm10, %v1293_v52, %v783_v37  ;;  %v788_v41 = vsel %vm774_vm9, %v771_v34, %v787_v38 }
 0x522   : > { %v778_v42 = vsel %vm775_vm7, %v764_v29, %v777_v39  ;;  %v785_v43 = vsel %vm772_vm11, %v771_v34, %v784_v40  ;;  %v789_v44 = vsel %vm773_vm10, %v764_v29, %v788_v41 }
 0x523   : > { %v779_v45 = vsel %vm774_vm9, %v764_v29, %v778_v42  ;;  %792 = vst [vmem:[%s1288_s17 + $0x2] sm:$0x3] %v785_v43  ;;  %v790_v46 = vsel %vm772_vm11, %v764_v29, %v789_v44 }
 0x524   : > { %v780_v47 = vsel %vm773_vm10, %v767_v32, %v779_v45  ;;  %793 = vst [vmem:[%s1288_s17 + $0x4] sm:$0x3] %v790_v46 }
 0x525   : > { %v781_v48 = vsel %vm772_vm11, %v1293_v52, %v780_v47 }
 0x526   : > { %791 = vst [vmem:[%s1288_s17] sm:$0x3] %v781_v48 }
 0x527 PF: > { %s45_s20 = sadd.s32 1, %s961_s20  }
 0x528   : > { %p42_p4 = scmp.ge.s32.totalorder %s45_s20, 2  }
 0x52a   :  { %44 = sbr.rel (!%p42_p4) target bundleno = 12 (0xc), region = 141 }
 0x52f   :  { %798 = vsyncpa [#allocation3], 1 }
 0x530   :  { %799 = vsyncpa [#allocation5], 1 }

</bundles_post_ra>
